<compile_context>
chip_gen: v7x
topology: tpu7x:2x2x1
jax: 0.10.0
libtpu: 0.0.40
codegen_flags: <defaults>
</compile_context>

<pallas_src>
import numpy as np

import jax
import jax.numpy as jnp
from jax.experimental import pallas as pl
from jax.experimental.pallas import tpu as pltpu


def _round_up(x, m):
    return ((x + m - 1) // m) * m


# ---------------------------------------------------------------------------
# Fused Pallas kernel: conv1+pool -> conv2+pool -> fc1 -> fc2 -> log_softmax
# ---------------------------------------------------------------------------
def convnet_kernel(x_ref, w1b_ref, b1t_ref, w2b_ref, b2t_ref,
                   wf1_ref, bf1_ref, wf2_ref, bf2_ref, o_ref):
    tb = x_ref.shape[2]                    # batch tile (multiple of 16)
    f32 = jnp.float32
    bf16 = jnp.bfloat16

    x = x_ref[...]                         # [4, 6, tb, 160] bf16 (H im2col)

    # conv1 LHS slabs: lhs[off][(q, b), kh*28 + w] = image[b, 4*q + off + kh, w]
    # (off = 2*par + di; columns 140..159 are zero padding)
    lhs = [x[off].reshape(6 * tb, 160) for off in range(4)]

    # ---- conv1 + 2x2 maxpool + bias + ReLU ----------------------------------
    # One MXU matmul per (par, di): K = 160 (5-tap kh window folded into the
    # contraction), N = 512 (both dj pool columns folded into N, 256 each).
    w1m = w1b_ref[...]                     # [160, 512] bf16
    b1 = b1t_ref[...]                      # [1, 256]   f32
    h1p = []                               # h1p[par][(q,b), pw*20+c], ph = 2q+par
    for par in range(2):
        a0 = jnp.dot(lhs[2 * par + 0], w1m, preferred_element_type=f32)
        a1 = jnp.dot(lhs[2 * par + 1], w1m, preferred_element_type=f32)
        z = jnp.maximum(a0, a1)                        # max over di (pool rows)
        z = jnp.maximum(z[:, :256], z[:, 256:])        # max over dj (pool cols)
        h1p.append(jnp.maximum(z + b1, 0.0).astype(bf16))   # [6*tb, 256]

    # ---- conv2 + 2x2 maxpool + bias + ReLU ----------------------------------
    # 5 kh matmuls per di2 (tight accumulation chain for v7x MRB); dj2 folded
    # into N (2 x 256, oc padded 50->64).
    b2 = b2t_ref[...]                      # [1, 256] f32
    acc_d = []
    for di2 in range(2):
        acc = None
        for kh in range(5):
            u = di2 + kh                   # pooled-conv1 row offset
            l2 = h1p[u % 2][(u // 2) * tb:(u // 2 + 4) * tb, :]   # [4*tb, 256]
            t = jnp.dot(l2, w2b_ref[kh], preferred_element_type=f32)
            acc = t if acc is None else acc + t
        acc_d.append(acc)                  # [4*tb, 512]
    z2 = jnp.maximum(acc_d[0], acc_d[1])                 # max over di2
    z2 = jnp.maximum(z2[:, :256], z2[:, 256:])           # max over dj2
    h2 = jnp.maximum(z2 + b2, 0.0).astype(bf16)          # [4*tb, 256]

    # ---- fc1 (800 -> 512 padded) + ReLU, summed over the 4 output rows ------
    acc = None
    for r in range(4):
        t = jnp.dot(h2[r * tb:(r + 1) * tb, :], wf1_ref[r],
                    preferred_element_type=f32)
        acc = t if acc is None else acc + t
    a1v = jnp.maximum(acc + bf1_ref[...], 0.0).astype(bf16)   # [tb, 512]

    # ---- fc2 (512 -> 128 padded) + numerically stable log_softmax -----------
    logits = jnp.dot(a1v, wf2_ref[...], preferred_element_type=f32) + bf2_ref[...]
    m = jnp.max(logits, axis=1, keepdims=True)
    lse = jnp.log(jnp.sum(jnp.exp(logits - m), axis=1, keepdims=True)) + m
    o_ref[...] = logits - lse              # [tb, 128]


# ---------------------------------------------------------------------------
# One-time parameter preprocessing (host side, outside the forward pass)
# ---------------------------------------------------------------------------
def prepare_params(params):
    w1, b1, w2, b2, fw1, fb1, fw2, fb2 = [np.asarray(p, np.float32) for p in params]
    K = 5

    # conv1 banded weights, kh folded into K and dj folded into N:
    #   w1b[kh*28 + (2*pw + dj + kw), dj*256 + pw*20 + oc] = w1[oc, 0, kh, kw]
    # rows 140..159 and columns 240..255 / 496..511 stay zero (padding).
    w1m = w1.reshape(20, K, K)
    w1b = np.zeros((160, 512), np.float32)
    for kh in range(K):
        for kw in range(K):
            for dj in range(2):
                for pw in range(12):
                    col = dj * 256 + pw * 20
                    w1b[kh * 28 + 2 * pw + dj + kw, col:col + 20] = w1m[:, kh, kw]
    b1t = np.zeros((1, 256), np.float32)
    b1t[0, :240] = np.tile(b1, 12)

    # conv2 banded weights (dj2 folded into N, oc padded 50->64):
    #   w2b[kh][pw1*20 + ic, dj2*256 + pw2*64 + oc] = w2[oc, ic, kh, kw]
    #   with pw1 = 2*pw2 + dj2 + kw; rows 240..255 zero, oc 50..63 zero.
    w2b = np.zeros((K, 256, 512), np.float32)
    for kh in range(K):
        for kw in range(K):
            for dj in range(2):
                for pw2 in range(4):
                    pw1 = 2 * pw2 + dj + kw
                    col = dj * 256 + pw2 * 64
                    w2b[kh, pw1 * 20:pw1 * 20 + 20, col:col + 50] = w2[:, :, kh, kw].T
    b2t = np.zeros((1, 256), np.float32)
    for pw2 in range(4):
        b2t[0, pw2 * 64:pw2 * 64 + 50] = b2

    # fc1: split per conv2 output row h, rows follow the kernel's pw2*64 + oc
    # layout, columns permuted from PyTorch's NCHW flatten (c*16 + h*4 + w);
    # output padded 500 -> 512.
    wf1 = np.zeros((4, 256, 512), np.float32)
    for h in range(4):
        for w in range(4):
            for c in range(50):
                wf1[h, w * 64 + c, :500] = fw1[:, c * 16 + h * 4 + w]
    bf1 = np.zeros((1, 512), np.float32)
    bf1[0, :500] = fb1

    # fc2: padded to [512, 128]; pad logits get bias -1e30 (f32) so exp() == 0
    # and log_softmax over the 10 real classes is unchanged.
    wf2 = np.zeros((512, 128), np.float32)
    wf2[:500, :10] = fw2.T
    bf2 = np.full((1, 128), -1e30, np.float32)
    bf2[0, :10] = fb2

    bf16 = jnp.bfloat16
    return (jnp.asarray(w1b, bf16), jnp.asarray(b1t),
            jnp.asarray(w2b, bf16), jnp.asarray(b2t),
            jnp.asarray(wf1, bf16), jnp.asarray(bf1),
            jnp.asarray(wf2, bf16), jnp.asarray(bf2))


# ---------------------------------------------------------------------------
# Forward pass wrapper (single fused pallas_call)
# ---------------------------------------------------------------------------
def convnet_forward(x, prepped):
    w1b, b1t, w2b, b2t, wf1, bf1, wf2, bf2 = prepped
    B = x.shape[0]
    assert x.shape[1:] == (1, 28, 28)

    # Batch tile: >= 2 grid steps whenever B > 16 so v7x's two TensorCores
    # both get work; grows up to 256 for large batches (amortizes the ~0.35us
    # per-grid-step overhead on v6e).
    B16 = _round_up(B, 16)
    if B16 <= 16:
        tb = 16
    else:
        tb = min(256, _round_up((B16 + 1) // 2, 16))
    Bp = _round_up(B, tb)

    xi = x.reshape(B, 28, 28)
    if Bp != B:
        xi = jnp.pad(xi, ((0, Bp - B), (0, 0), (0, 0)))

    # H-only im2col (free in the wrapper): win[b, h1, kh*28 + w] = x[b, h1+kh, w]
    # for conv1 output row h1 = 4*q + off; K padded 140 -> 160; final layout
    # xin[off, q, b, :] so every in-kernel access is a contiguous leading slice.
    win = jnp.stack([xi[:, h1:h1 + 5, :] for h1 in range(24)], axis=1)  # [Bp,24,5,28]
    win = win.reshape(Bp, 6, 4, 140)
    win = jnp.pad(win, ((0, 0), (0, 0), (0, 0), (0, 20)))               # -> 160
    xin = win.transpose(2, 1, 0, 3).astype(jnp.bfloat16)                # [4,6,Bp,160]

    grid = (Bp // tb,)
    flops = 2 * Bp * (4 * 6 * 160 * 512        # conv1: 4 matmuls / element
                      + 10 * 4 * 256 * 512     # conv2: 10 matmuls / element
                      + 4 * 256 * 512          # fc1
                      + 512 * 128)             # fc2
    bytes_accessed = (xin.size * 2
                      + (w1b.size + w2b.size + wf1.size + wf2.size) * 2
                      + (b1t.size + b2t.size + bf1.size + bf2.size) * 4
                      + Bp * 128 * 4)

    out = pl.pallas_call(
        convnet_kernel,
        out_shape=jax.ShapeDtypeStruct((Bp, 128), jnp.float32),
        grid=grid,
        in_specs=[
            pl.BlockSpec((4, 6, tb, 160), lambda i: (0, 0, i, 0)),  # image im2col
            pl.BlockSpec((160, 512), lambda i: (0, 0)),             # conv1 banded
            pl.BlockSpec((1, 256), lambda i: (0, 0)),               # conv1 bias
            pl.BlockSpec((5, 256, 512), lambda i: (0, 0, 0)),       # conv2 banded
            pl.BlockSpec((1, 256), lambda i: (0, 0)),               # conv2 bias
            pl.BlockSpec((4, 256, 512), lambda i: (0, 0, 0)),       # fc1 split/permuted
            pl.BlockSpec((1, 512), lambda i: (0, 0)),               # fc1 bias
            pl.BlockSpec((512, 128), lambda i: (0, 0)),             # fc2 (padded)
            pl.BlockSpec((1, 128), lambda i: (0, 0)),               # fc2 bias
        ],
        out_specs=pl.BlockSpec((tb, 128), lambda i: (i, 0)),
        compiler_params=pltpu.CompilerParams(
            dimension_semantics=("parallel",),
            vmem_limit_bytes=48 * 1024 * 1024),
        cost_estimate=pl.CostEstimate(
            flops=flops, transcendentals=Bp * 129,
            bytes_accessed=bytes_accessed),
    )(xin, w1b, b1t, w2b, b2t, wf1, bf1, wf2, bf2)

    return out[:B, :10]


# ---------------------------------------------------------------------------
# Deterministic PyTorch-shaped init + pure-JAX reference
# ---------------------------------------------------------------------------
def init_params(key):
    ks = jax.random.split(key, 8)

    def u(k, shape, fan_in):
        bound = 1.0 / (fan_in ** 0.5)
        return jax.random.uniform(k, shape, jnp.float32, -bound, bound)

    w1 = u(ks[0], (20, 1, 5, 5), 1 * 5 * 5)
    b1 = u(ks[1], (20,), 1 * 5 * 5)
    w2 = u(ks[2], (50, 20, 5, 5), 20 * 5 * 5)
    b2 = u(ks[3], (50,), 20 * 5 * 5)
    fw1 = u(ks[4], (500, 800), 800)
    fb1 = u(ks[5], (500,), 800)
    fw2 = u(ks[6], (10, 500), 500)
    fb2 = u(ks[7], (10,), 500)
    return (w1, b1, w2, b2, fw1, fb1, fw2, fb2)


def reference_forward(x, params):
    w1, b1, w2, b2, fw1, fb1, fw2, fb2 = params

    def conv_block(y, w, b):
        y = jax.lax.conv_general_dilated(
            y, w, (1, 1), "VALID", dimension_numbers=("NCHW", "OIHW", "NCHW"))
        y = jnp.maximum(y + b[None, :, None, None], 0.0)
        return jax.lax.reduce_window(
            y, -jnp.inf, jax.lax.max, (1, 1, 2, 2), (1, 1, 2, 2), "VALID")

    y = conv_block(x, w1, b1)
    y = conv_block(y, w2, b2)
    y = y.reshape(y.shape[0], -1)
    y = jnp.maximum(y @ fw1.T + fb1, 0.0)
    y = y @ fw2.T + fb2
    return jax.nn.log_softmax(y, axis=1)


if __name__ == "__main__":
    key = jax.random.PRNGKey(0)
    kx, kp = jax.random.split(key)
    # MNIST-sized input implied by fc1 = 50*4*4 features
    x = jax.random.normal(kx, (2, 1, 28, 28), dtype=jnp.float32)
    params = init_params(kp)
    prepped = prepare_params(params)        # one-time weight preprocessing

    fwd = jax.jit(convnet_forward)
    out = jax.block_until_ready(fwd(x, prepped))

    ref = reference_forward(x, params)
    assert out.shape == (2, 10) and out.dtype == jnp.float32
    assert bool(jnp.all(jnp.isfinite(out)))
    err = float(jnp.max(jnp.abs(out - ref)))
    assert err < 5e-2, f"mismatch vs reference: max abs err {err}"

    print("KERNEL_OK")
</pallas_src>

<mosaic_0001>
module attributes {stable_mosaic.version = 11 : i64} {
  func.func @convnet_kernel(%arg0: i32, %arg1: memref<4x6x16x160xbf16, #tpu.memory_space<vmem>>, %arg2: memref<160x512xbf16, #tpu.memory_space<vmem>>, %arg3: memref<1x256xf32, #tpu.memory_space<vmem>>, %arg4: memref<5x256x512xbf16, #tpu.memory_space<vmem>>, %arg5: memref<1x256xf32, #tpu.memory_space<vmem>>, %arg6: memref<4x256x512xbf16, #tpu.memory_space<vmem>>, %arg7: memref<1x512xf32, #tpu.memory_space<vmem>>, %arg8: memref<512x128xbf16, #tpu.memory_space<vmem>>, %arg9: memref<1x128xf32, #tpu.memory_space<vmem>>, %arg10: memref<16x128xf32, #tpu.memory_space<vmem>>) attributes {dimension_semantics = [#tpu.dimension_semantics<parallel>], iteration_bounds = array<i64: 1>, scalar_prefetch = 0 : i64, scratch_operands = 0 : i64, tpu.core_type = #tpu.core_type<tc>, window_params = [{transform_indices = @transform_0, window_bounds = array<i64: 4, 6, 16, 160>}, {pipeline_mode = #tpu.pipeline_mode<synchronous>, transform_indices = @transform_1, window_bounds = array<i64: 160, 512>}, {pipeline_mode = #tpu.pipeline_mode<synchronous>, transform_indices = @transform_2, window_bounds = array<i64: 1, 256>}, {pipeline_mode = #tpu.pipeline_mode<synchronous>, transform_indices = @transform_3, window_bounds = array<i64: 5, 256, 512>}, {pipeline_mode = #tpu.pipeline_mode<synchronous>, transform_indices = @transform_4, window_bounds = array<i64: 1, 256>}, {pipeline_mode = #tpu.pipeline_mode<synchronous>, transform_indices = @transform_5, window_bounds = array<i64: 4, 256, 512>}, {pipeline_mode = #tpu.pipeline_mode<synchronous>, transform_indices = @transform_6, window_bounds = array<i64: 1, 512>}, {pipeline_mode = #tpu.pipeline_mode<synchronous>, transform_indices = @transform_7, window_bounds = array<i64: 512, 128>}, {pipeline_mode = #tpu.pipeline_mode<synchronous>, transform_indices = @transform_8, window_bounds = array<i64: 1, 128>}, {transform_indices = @transform_9, window_bounds = array<i64: 16, 128>}]} {
    %c0 = arith.constant 0 : index
    %c0_0 = arith.constant 0 : index
    %c0_1 = arith.constant 0 : index
    %c0_2 = arith.constant 0 : index
    %0 = vector.load %arg1[%c0, %c0_0, %c0_1, %c0_2] : memref<4x6x16x160xbf16, #tpu.memory_space<vmem>>, vector<4x6x16x160xbf16>
    %1 = vector.extract_strided_slice %0 {offsets = [0, 0, 0, 0], sizes = [1, 6, 16, 160], strides = [1, 1, 1, 1]} : vector<4x6x16x160xbf16> to vector<1x6x16x160xbf16>
    %2 = vector.shape_cast %1 : vector<1x6x16x160xbf16> to vector<6x16x160xbf16>
    %3 = vector.shape_cast %2 : vector<6x16x160xbf16> to vector<96x160xbf16>
    %4 = vector.extract_strided_slice %0 {offsets = [1, 0, 0, 0], sizes = [1, 6, 16, 160], strides = [1, 1, 1, 1]} : vector<4x6x16x160xbf16> to vector<1x6x16x160xbf16>
    %5 = vector.shape_cast %4 : vector<1x6x16x160xbf16> to vector<6x16x160xbf16>
    %6 = vector.shape_cast %5 : vector<6x16x160xbf16> to vector<96x160xbf16>
    %7 = vector.extract_strided_slice %0 {offsets = [2, 0, 0, 0], sizes = [1, 6, 16, 160], strides = [1, 1, 1, 1]} : vector<4x6x16x160xbf16> to vector<1x6x16x160xbf16>
    %8 = vector.shape_cast %7 : vector<1x6x16x160xbf16> to vector<6x16x160xbf16>
    %9 = vector.shape_cast %8 : vector<6x16x160xbf16> to vector<96x160xbf16>
    %10 = vector.extract_strided_slice %0 {offsets = [3, 0, 0, 0], sizes = [1, 6, 16, 160], strides = [1, 1, 1, 1]} : vector<4x6x16x160xbf16> to vector<1x6x16x160xbf16>
    %11 = vector.shape_cast %10 : vector<1x6x16x160xbf16> to vector<6x16x160xbf16>
    %12 = vector.shape_cast %11 : vector<6x16x160xbf16> to vector<96x160xbf16>
    %c0_3 = arith.constant 0 : index
    %c0_4 = arith.constant 0 : index
    %13 = vector.load %arg2[%c0_3, %c0_4] : memref<160x512xbf16, #tpu.memory_space<vmem>>, vector<160x512xbf16>
    %c0_5 = arith.constant 0 : index
    %c0_6 = arith.constant 0 : index
    %14 = vector.load %arg3[%c0_5, %c0_6] : memref<1x256xf32, #tpu.memory_space<vmem>>, vector<1x256xf32>
    %cst = arith.constant dense<0.000000e+00> : vector<96x512xf32>
    %15 = tpu.matmul %3, %13, %cst {dimension_numbers = #tpu.dot_dimension_numbers<[1], [0], [0], [1], [0, 0, 1, 1], [], []>} : vector<96x160xbf16>, vector<160x512xbf16>, vector<96x512xf32> -> vector<96x512xf32>
    %cst_7 = arith.constant dense<0.000000e+00> : vector<96x512xf32>
    %16 = tpu.matmul %6, %13, %cst_7 {dimension_numbers = #tpu.dot_dimension_numbers<[1], [0], [0], [1], [0, 0, 1, 1], [], []>} : vector<96x160xbf16>, vector<160x512xbf16>, vector<96x512xf32> -> vector<96x512xf32>
    %17 = arith.maximumf %15, %16 : vector<96x512xf32>
    %18 = vector.extract_strided_slice %17 {offsets = [0, 0], sizes = [96, 256], strides = [1, 1]} : vector<96x512xf32> to vector<96x256xf32>
    %19 = vector.extract_strided_slice %17 {offsets = [0, 256], sizes = [96, 256], strides = [1, 1]} : vector<96x512xf32> to vector<96x256xf32>
    %20 = arith.maximumf %18, %19 : vector<96x256xf32>
    %21 = vector.broadcast %14 : vector<1x256xf32> to vector<96x256xf32>
    %22 = arith.addf %20, %21 : vector<96x256xf32>
    %cst_8 = arith.constant 0.000000e+00 : f32
    %23 = vector.broadcast %cst_8 : f32 to vector<96x256xf32>
    %24 = arith.maximumf %22, %23 : vector<96x256xf32>
    %25 = arith.truncf %24 : vector<96x256xf32> to vector<96x256xbf16>
    %cst_9 = arith.constant dense<0.000000e+00> : vector<96x512xf32>
    %26 = tpu.matmul %9, %13, %cst_9 {dimension_numbers = #tpu.dot_dimension_numbers<[1], [0], [0], [1], [0, 0, 1, 1], [], []>} : vector<96x160xbf16>, vector<160x512xbf16>, vector<96x512xf32> -> vector<96x512xf32>
    %cst_10 = arith.constant dense<0.000000e+00> : vector<96x512xf32>
    %27 = tpu.matmul %12, %13, %cst_10 {dimension_numbers = #tpu.dot_dimension_numbers<[1], [0], [0], [1], [0, 0, 1, 1], [], []>} : vector<96x160xbf16>, vector<160x512xbf16>, vector<96x512xf32> -> vector<96x512xf32>
    %28 = arith.maximumf %26, %27 : vector<96x512xf32>
    %29 = vector.extract_strided_slice %28 {offsets = [0, 0], sizes = [96, 256], strides = [1, 1]} : vector<96x512xf32> to vector<96x256xf32>
    %30 = vector.extract_strided_slice %28 {offsets = [0, 256], sizes = [96, 256], strides = [1, 1]} : vector<96x512xf32> to vector<96x256xf32>
    %31 = arith.maximumf %29, %30 : vector<96x256xf32>
    %32 = vector.broadcast %14 : vector<1x256xf32> to vector<96x256xf32>
    %33 = arith.addf %31, %32 : vector<96x256xf32>
    %cst_11 = arith.constant 0.000000e+00 : f32
    %34 = vector.broadcast %cst_11 : f32 to vector<96x256xf32>
    %35 = arith.maximumf %33, %34 : vector<96x256xf32>
    %36 = arith.truncf %35 : vector<96x256xf32> to vector<96x256xbf16>
    %c0_12 = arith.constant 0 : index
    %c0_13 = arith.constant 0 : index
    %37 = vector.load %arg5[%c0_12, %c0_13] : memref<1x256xf32, #tpu.memory_space<vmem>>, vector<1x256xf32>
    %38 = vector.extract_strided_slice %25 {offsets = [0, 0], sizes = [64, 256], strides = [1, 1]} : vector<96x256xbf16> to vector<64x256xbf16>
    %c0_14 = arith.constant 0 : index
    %c0_15 = arith.constant 0 : index
    %c0_16 = arith.constant 0 : index
    %39 = vector.load %arg4[%c0_14, %c0_15, %c0_16] : memref<5x256x512xbf16, #tpu.memory_space<vmem>>, vector<1x256x512xbf16>
    %40 = vector.shape_cast %39 : vector<1x256x512xbf16> to vector<256x512xbf16>
    %cst_17 = arith.constant dense<0.000000e+00> : vector<64x512xf32>
    %41 = tpu.matmul %38, %40, %cst_17 {dimension_numbers = #tpu.dot_dimension_numbers<[1], [0], [0], [1], [0, 0, 1, 1], [], []>} : vector<64x256xbf16>, vector<256x512xbf16>, vector<64x512xf32> -> vector<64x512xf32>
    %42 = vector.extract_strided_slice %36 {offsets = [0, 0], sizes = [64, 256], strides = [1, 1]} : vector<96x256xbf16> to vector<64x256xbf16>
    %c1 = arith.constant 1 : index
    %c0_18 = arith.constant 0 : index
    %c0_19 = arith.constant 0 : index
    %43 = vector.load %arg4[%c1, %c0_18, %c0_19] : memref<5x256x512xbf16, #tpu.memory_space<vmem>>, vector<1x256x512xbf16>
    %44 = vector.shape_cast %43 : vector<1x256x512xbf16> to vector<256x512xbf16>
    %cst_20 = arith.constant dense<0.000000e+00> : vector<64x512xf32>
    %45 = tpu.matmul %42, %44, %cst_20 {dimension_numbers = #tpu.dot_dimension_numbers<[1], [0], [0], [1], [0, 0, 1, 1], [], []>} : vector<64x256xbf16>, vector<256x512xbf16>, vector<64x512xf32> -> vector<64x512xf32>
    %46 = arith.addf %41, %45 : vector<64x512xf32>
    %47 = vector.extract_strided_slice %25 {offsets = [16, 0], sizes = [64, 256], strides = [1, 1]} : vector<96x256xbf16> to vector<64x256xbf16>
    %c2 = arith.constant 2 : index
    %c0_21 = arith.constant 0 : index
    %c0_22 = arith.constant 0 : index
    %48 = vector.load %arg4[%c2, %c0_21, %c0_22] : memref<5x256x512xbf16, #tpu.memory_space<vmem>>, vector<1x256x512xbf16>
    %49 = vector.shape_cast %48 : vector<1x256x512xbf16> to vector<256x512xbf16>
    %cst_23 = arith.constant dense<0.000000e+00> : vector<64x512xf32>
    %50 = tpu.matmul %47, %49, %cst_23 {dimension_numbers = #tpu.dot_dimension_numbers<[1], [0], [0], [1], [0, 0, 1, 1], [], []>} : vector<64x256xbf16>, vector<256x512xbf16>, vector<64x512xf32> -> vector<64x512xf32>
    %51 = arith.addf %46, %50 : vector<64x512xf32>
    %52 = vector.extract_strided_slice %36 {offsets = [16, 0], sizes = [64, 256], strides = [1, 1]} : vector<96x256xbf16> to vector<64x256xbf16>
    %c3 = arith.constant 3 : index
    %c0_24 = arith.constant 0 : index
    %c0_25 = arith.constant 0 : index
    %53 = vector.load %arg4[%c3, %c0_24, %c0_25] : memref<5x256x512xbf16, #tpu.memory_space<vmem>>, vector<1x256x512xbf16>
    %54 = vector.shape_cast %53 : vector<1x256x512xbf16> to vector<256x512xbf16>
    %cst_26 = arith.constant dense<0.000000e+00> : vector<64x512xf32>
    %55 = tpu.matmul %52, %54, %cst_26 {dimension_numbers = #tpu.dot_dimension_numbers<[1], [0], [0], [1], [0, 0, 1, 1], [], []>} : vector<64x256xbf16>, vector<256x512xbf16>, vector<64x512xf32> -> vector<64x512xf32>
    %56 = arith.addf %51, %55 : vector<64x512xf32>
    %57 = vector.extract_strided_slice %25 {offsets = [32, 0], sizes = [64, 256], strides = [1, 1]} : vector<96x256xbf16> to vector<64x256xbf16>
    %c4 = arith.constant 4 : index
    %c0_27 = arith.constant 0 : index
    %c0_28 = arith.constant 0 : index
    %58 = vector.load %arg4[%c4, %c0_27, %c0_28] : memref<5x256x512xbf16, #tpu.memory_space<vmem>>, vector<1x256x512xbf16>
    %59 = vector.shape_cast %58 : vector<1x256x512xbf16> to vector<256x512xbf16>
    %cst_29 = arith.constant dense<0.000000e+00> : vector<64x512xf32>
    %60 = tpu.matmul %57, %59, %cst_29 {dimension_numbers = #tpu.dot_dimension_numbers<[1], [0], [0], [1], [0, 0, 1, 1], [], []>} : vector<64x256xbf16>, vector<256x512xbf16>, vector<64x512xf32> -> vector<64x512xf32>
    %61 = arith.addf %56, %60 : vector<64x512xf32>
    %62 = vector.extract_strided_slice %36 {offsets = [0, 0], sizes = [64, 256], strides = [1, 1]} : vector<96x256xbf16> to vector<64x256xbf16>
    %c0_30 = arith.constant 0 : index
    %c0_31 = arith.constant 0 : index
    %c0_32 = arith.constant 0 : index
    %63 = vector.load %arg4[%c0_30, %c0_31, %c0_32] : memref<5x256x512xbf16, #tpu.memory_space<vmem>>, vector<1x256x512xbf16>
    %64 = vector.shape_cast %63 : vector<1x256x512xbf16> to vector<256x512xbf16>
    %cst_33 = arith.constant dense<0.000000e+00> : vector<64x512xf32>
    %65 = tpu.matmul %62, %64, %cst_33 {dimension_numbers = #tpu.dot_dimension_numbers<[1], [0], [0], [1], [0, 0, 1, 1], [], []>} : vector<64x256xbf16>, vector<256x512xbf16>, vector<64x512xf32> -> vector<64x512xf32>
    %66 = vector.extract_strided_slice %25 {offsets = [16, 0], sizes = [64, 256], strides = [1, 1]} : vector<96x256xbf16> to vector<64x256xbf16>
    %c1_34 = arith.constant 1 : index
    %c0_35 = arith.constant 0 : index
    %c0_36 = arith.constant 0 : index
    %67 = vector.load %arg4[%c1_34, %c0_35, %c0_36] : memref<5x256x512xbf16, #tpu.memory_space<vmem>>, vector<1x256x512xbf16>
    %68 = vector.shape_cast %67 : vector<1x256x512xbf16> to vector<256x512xbf16>
    %cst_37 = arith.constant dense<0.000000e+00> : vector<64x512xf32>
    %69 = tpu.matmul %66, %68, %cst_37 {dimension_numbers = #tpu.dot_dimension_numbers<[1], [0], [0], [1], [0, 0, 1, 1], [], []>} : vector<64x256xbf16>, vector<256x512xbf16>, vector<64x512xf32> -> vector<64x512xf32>
    %70 = arith.addf %65, %69 : vector<64x512xf32>
    %71 = vector.extract_strided_slice %36 {offsets = [16, 0], sizes = [64, 256], strides = [1, 1]} : vector<96x256xbf16> to vector<64x256xbf16>
    %c2_38 = arith.constant 2 : index
    %c0_39 = arith.constant 0 : index
    %c0_40 = arith.constant 0 : index
    %72 = vector.load %arg4[%c2_38, %c0_39, %c0_40] : memref<5x256x512xbf16, #tpu.memory_space<vmem>>, vector<1x256x512xbf16>
    %73 = vector.shape_cast %72 : vector<1x256x512xbf16> to vector<256x512xbf16>
    %cst_41 = arith.constant dense<0.000000e+00> : vector<64x512xf32>
    %74 = tpu.matmul %71, %73, %cst_41 {dimension_numbers = #tpu.dot_dimension_numbers<[1], [0], [0], [1], [0, 0, 1, 1], [], []>} : vector<64x256xbf16>, vector<256x512xbf16>, vector<64x512xf32> -> vector<64x512xf32>
    %75 = arith.addf %70, %74 : vector<64x512xf32>
    %76 = vector.extract_strided_slice %25 {offsets = [32, 0], sizes = [64, 256], strides = [1, 1]} : vector<96x256xbf16> to vector<64x256xbf16>
    %c3_42 = arith.constant 3 : index
    %c0_43 = arith.constant 0 : index
    %c0_44 = arith.constant 0 : index
    %77 = vector.load %arg4[%c3_42, %c0_43, %c0_44] : memref<5x256x512xbf16, #tpu.memory_space<vmem>>, vector<1x256x512xbf16>
    %78 = vector.shape_cast %77 : vector<1x256x512xbf16> to vector<256x512xbf16>
    %cst_45 = arith.constant dense<0.000000e+00> : vector<64x512xf32>
    %79 = tpu.matmul %76, %78, %cst_45 {dimension_numbers = #tpu.dot_dimension_numbers<[1], [0], [0], [1], [0, 0, 1, 1], [], []>} : vector<64x256xbf16>, vector<256x512xbf16>, vector<64x512xf32> -> vector<64x512xf32>
    %80 = arith.addf %75, %79 : vector<64x512xf32>
    %81 = vector.extract_strided_slice %36 {offsets = [32, 0], sizes = [64, 256], strides = [1, 1]} : vector<96x256xbf16> to vector<64x256xbf16>
    %c4_46 = arith.constant 4 : index
    %c0_47 = arith.constant 0 : index
    %c0_48 = arith.constant 0 : index
    %82 = vector.load %arg4[%c4_46, %c0_47, %c0_48] : memref<5x256x512xbf16, #tpu.memory_space<vmem>>, vector<1x256x512xbf16>
    %83 = vector.shape_cast %82 : vector<1x256x512xbf16> to vector<256x512xbf16>
    %cst_49 = arith.constant dense<0.000000e+00> : vector<64x512xf32>
    %84 = tpu.matmul %81, %83, %cst_49 {dimension_numbers = #tpu.dot_dimension_numbers<[1], [0], [0], [1], [0, 0, 1, 1], [], []>} : vector<64x256xbf16>, vector<256x512xbf16>, vector<64x512xf32> -> vector<64x512xf32>
    %85 = arith.addf %80, %84 : vector<64x512xf32>
    %86 = arith.maximumf %61, %85 : vector<64x512xf32>
    %87 = vector.extract_strided_slice %86 {offsets = [0, 0], sizes = [64, 256], strides = [1, 1]} : vector<64x512xf32> to vector<64x256xf32>
    %88 = vector.extract_strided_slice %86 {offsets = [0, 256], sizes = [64, 256], strides = [1, 1]} : vector<64x512xf32> to vector<64x256xf32>
    %89 = arith.maximumf %87, %88 : vector<64x256xf32>
    %90 = vector.broadcast %37 : vector<1x256xf32> to vector<64x256xf32>
    %91 = arith.addf %89, %90 : vector<64x256xf32>
    %cst_50 = arith.constant 0.000000e+00 : f32
    %92 = vector.broadcast %cst_50 : f32 to vector<64x256xf32>
    %93 = arith.maximumf %91, %92 : vector<64x256xf32>
    %94 = arith.truncf %93 : vector<64x256xf32> to vector<64x256xbf16>
    %95 = vector.extract_strided_slice %94 {offsets = [0, 0], sizes = [16, 256], strides = [1, 1]} : vector<64x256xbf16> to vector<16x256xbf16>
    %c0_51 = arith.constant 0 : index
    %c0_52 = arith.constant 0 : index
    %c0_53 = arith.constant 0 : index
    %96 = vector.load %arg6[%c0_51, %c0_52, %c0_53] : memref<4x256x512xbf16, #tpu.memory_space<vmem>>, vector<1x256x512xbf16>
    %97 = vector.shape_cast %96 : vector<1x256x512xbf16> to vector<256x512xbf16>
    %cst_54 = arith.constant dense<0.000000e+00> : vector<16x512xf32>
    %98 = tpu.matmul %95, %97, %cst_54 {dimension_numbers = #tpu.dot_dimension_numbers<[1], [0], [0], [1], [0, 0, 1, 1], [], []>} : vector<16x256xbf16>, vector<256x512xbf16>, vector<16x512xf32> -> vector<16x512xf32>
    %99 = vector.extract_strided_slice %94 {offsets = [16, 0], sizes = [16, 256], strides = [1, 1]} : vector<64x256xbf16> to vector<16x256xbf16>
    %c1_55 = arith.constant 1 : index
    %c0_56 = arith.constant 0 : index
    %c0_57 = arith.constant 0 : index
    %100 = vector.load %arg6[%c1_55, %c0_56, %c0_57] : memref<4x256x512xbf16, #tpu.memory_space<vmem>>, vector<1x256x512xbf16>
    %101 = vector.shape_cast %100 : vector<1x256x512xbf16> to vector<256x512xbf16>
    %cst_58 = arith.constant dense<0.000000e+00> : vector<16x512xf32>
    %102 = tpu.matmul %99, %101, %cst_58 {dimension_numbers = #tpu.dot_dimension_numbers<[1], [0], [0], [1], [0, 0, 1, 1], [], []>} : vector<16x256xbf16>, vector<256x512xbf16>, vector<16x512xf32> -> vector<16x512xf32>
    %103 = arith.addf %98, %102 : vector<16x512xf32>
    %104 = vector.extract_strided_slice %94 {offsets = [32, 0], sizes = [16, 256], strides = [1, 1]} : vector<64x256xbf16> to vector<16x256xbf16>
    %c2_59 = arith.constant 2 : index
    %c0_60 = arith.constant 0 : index
    %c0_61 = arith.constant 0 : index
    %105 = vector.load %arg6[%c2_59, %c0_60, %c0_61] : memref<4x256x512xbf16, #tpu.memory_space<vmem>>, vector<1x256x512xbf16>
    %106 = vector.shape_cast %105 : vector<1x256x512xbf16> to vector<256x512xbf16>
    %cst_62 = arith.constant dense<0.000000e+00> : vector<16x512xf32>
    %107 = tpu.matmul %104, %106, %cst_62 {dimension_numbers = #tpu.dot_dimension_numbers<[1], [0], [0], [1], [0, 0, 1, 1], [], []>} : vector<16x256xbf16>, vector<256x512xbf16>, vector<16x512xf32> -> vector<16x512xf32>
    %108 = arith.addf %103, %107 : vector<16x512xf32>
    %109 = vector.extract_strided_slice %94 {offsets = [48, 0], sizes = [16, 256], strides = [1, 1]} : vector<64x256xbf16> to vector<16x256xbf16>
    %c3_63 = arith.constant 3 : index
    %c0_64 = arith.constant 0 : index
    %c0_65 = arith.constant 0 : index
    %110 = vector.load %arg6[%c3_63, %c0_64, %c0_65] : memref<4x256x512xbf16, #tpu.memory_space<vmem>>, vector<1x256x512xbf16>
    %111 = vector.shape_cast %110 : vector<1x256x512xbf16> to vector<256x512xbf16>
    %cst_66 = arith.constant dense<0.000000e+00> : vector<16x512xf32>
    %112 = tpu.matmul %109, %111, %cst_66 {dimension_numbers = #tpu.dot_dimension_numbers<[1], [0], [0], [1], [0, 0, 1, 1], [], []>} : vector<16x256xbf16>, vector<256x512xbf16>, vector<16x512xf32> -> vector<16x512xf32>
    %113 = arith.addf %108, %112 : vector<16x512xf32>
    %c0_67 = arith.constant 0 : index
    %c0_68 = arith.constant 0 : index
    %114 = vector.load %arg7[%c0_67, %c0_68] : memref<1x512xf32, #tpu.memory_space<vmem>>, vector<1x512xf32>
    %115 = vector.broadcast %114 : vector<1x512xf32> to vector<16x512xf32>
    %116 = arith.addf %113, %115 : vector<16x512xf32>
    %cst_69 = arith.constant 0.000000e+00 : f32
    %117 = vector.broadcast %cst_69 : f32 to vector<16x512xf32>
    %118 = arith.maximumf %116, %117 : vector<16x512xf32>
    %119 = arith.truncf %118 : vector<16x512xf32> to vector<16x512xbf16>
    %c0_70 = arith.constant 0 : index
    %c0_71 = arith.constant 0 : index
    %120 = vector.load %arg8[%c0_70, %c0_71] : memref<512x128xbf16, #tpu.memory_space<vmem>>, vector<512x128xbf16>
    %cst_72 = arith.constant dense<0.000000e+00> : vector<16x128xf32>
    %121 = tpu.matmul %119, %120, %cst_72 {dimension_numbers = #tpu.dot_dimension_numbers<[1], [0], [0], [1], [0, 0, 1, 1], [], []>} : vector<16x512xbf16>, vector<512x128xbf16>, vector<16x128xf32> -> vector<16x128xf32>
    %c0_73 = arith.constant 0 : index
    %c0_74 = arith.constant 0 : index
    %122 = vector.load %arg9[%c0_73, %c0_74] : memref<1x128xf32, #tpu.memory_space<vmem>>, vector<1x128xf32>
    %123 = vector.broadcast %122 : vector<1x128xf32> to vector<16x128xf32>
    %124 = arith.addf %121, %123 : vector<16x128xf32>
    %cst_75 = arith.constant dense<0xFF800000> : vector<16xf32>
    %125 = vector.multi_reduction <maximumf>, %124, %cst_75 [1] : vector<16x128xf32> to vector<16xf32>
    %126 = vector.shape_cast %125 : vector<16xf32> to vector<16x1xf32>
    %127 = vector.broadcast %126 : vector<16x1xf32> to vector<16x128xf32>
    %128 = arith.subf %124, %127 : vector<16x128xf32>
    %129 = math.exp %128 : vector<16x128xf32>
    %cst_76 = arith.constant dense<0.000000e+00> : vector<16xf32>
    %130 = vector.multi_reduction <add>, %129, %cst_76 [1] : vector<16x128xf32> to vector<16xf32>
    %131 = vector.shape_cast %130 : vector<16xf32> to vector<16x1xf32>
    %132 = math.log %131 : vector<16x1xf32>
    %133 = arith.addf %132, %126 : vector<16x1xf32>
    %134 = vector.broadcast %133 : vector<16x1xf32> to vector<16x128xf32>
    %135 = arith.subf %124, %134 : vector<16x128xf32>
    %c0_77 = arith.constant 0 : index
    %c0_78 = arith.constant 0 : index
    %136 = vector.load %arg10[%c0_77, %c0_78] : memref<16x128xf32, #tpu.memory_space<vmem>>, vector<16x128xf32>
    tpu.vector_store %arg10[%c0_77, %c0_78], %135 {strides = array<i32>} : memref<16x128xf32, #tpu.memory_space<vmem>>, vector<16x128xf32>,
    return
  }
  func.func @transform_0(%arg0: i32) -> (i32, i32, i32, i32) {
    %c0_i32 = arith.constant 0 : i32
    %c0_i32_0 = arith.constant 0 : i32
    %c0_i32_1 = arith.constant 0 : i32
    %c0_i32_2 = arith.constant 0 : i32
    return %c0_i32, %c0_i32_0, %arg0, %c0_i32_1 : i32, i32, i32, i32
  }
  func.func @transform_1(%arg0: i32) -> (i32, i32) {
    %c0_i32 = arith.constant 0 : i32
    %c0_i32_0 = arith.constant 0 : i32
    %c0_i32_1 = arith.constant 0 : i32
    return %c0_i32, %c0_i32_0 : i32, i32
  }
  func.func @transform_2(%arg0: i32) -> (i32, i32) {
    %c0_i32 = arith.constant 0 : i32
    %c0_i32_0 = arith.constant 0 : i32
    %c0_i32_1 = arith.constant 0 : i32
    return %c0_i32, %c0_i32_0 : i32, i32
  }
  func.func @transform_3(%arg0: i32) -> (i32, i32, i32) {
    %c0_i32 = arith.constant 0 : i32
    %c0_i32_0 = arith.constant 0 : i32
    %c0_i32_1 = arith.constant 0 : i32
    %c0_i32_2 = arith.constant 0 : i32
    return %c0_i32, %c0_i32_0, %c0_i32_1 : i32, i32, i32
  }
  func.func @transform_4(%arg0: i32) -> (i32, i32) {
    %c0_i32 = arith.constant 0 : i32
    %c0_i32_0 = arith.constant 0 : i32
    %c0_i32_1 = arith.constant 0 : i32
    return %c0_i32, %c0_i32_0 : i32, i32
  }
  func.func @transform_5(%arg0: i32) -> (i32, i32, i32) {
    %c0_i32 = arith.constant 0 : i32
    %c0_i32_0 = arith.constant 0 : i32
    %c0_i32_1 = arith.constant 0 : i32
    %c0_i32_2 = arith.constant 0 : i32
    return %c0_i32, %c0_i32_0, %c0_i32_1 : i32, i32, i32
  }
  func.func @transform_6(%arg0: i32) -> (i32, i32) {
    %c0_i32 = arith.constant 0 : i32
    %c0_i32_0 = arith.constant 0 : i32
    %c0_i32_1 = arith.constant 0 : i32
    return %c0_i32, %c0_i32_0 : i32, i32
  }
  func.func @transform_7(%arg0: i32) -> (i32, i32) {
    %c0_i32 = arith.constant 0 : i32
    %c0_i32_0 = arith.constant 0 : i32
    %c0_i32_1 = arith.constant 0 : i32
    return %c0_i32, %c0_i32_0 : i32, i32
  }
  func.func @transform_8(%arg0: i32) -> (i32, i32) {
    %c0_i32 = arith.constant 0 : i32
    %c0_i32_0 = arith.constant 0 : i32
    %c0_i32_1 = arith.constant 0 : i32
    return %c0_i32, %c0_i32_0 : i32, i32
  }
  func.func @transform_9(%arg0: i32) -> (i32, i32) {
    %c0_i32 = arith.constant 0 : i32
    %c0_i32_0 = arith.constant 0 : i32
    return %arg0, %c0_i32 : i32, i32
  }
}

</mosaic_0001>

<bundles_post_ra>
// kernel: convnet_forward.1
= control target key start
LH: loop header
LB: loop body
LE: loop exit
PB: predicated region body
PF: predicated region fallthrough
CT: control target
= control target key end

     0   :  { %vm376_vm0 = vcmask 261120   ;;  %s14597_s1 = inlined_call_operand.vmem [shape: bf16[160,512], index: 1, kind: input, shape index: {}]   ;;  %s14598_s0 = inlined_call_operand.vmem [shape: bf16[4,6,16,160], index: 0, kind: input, shape index: {}]   ;;  %s14599_s3 = inlined_call_operand.vmem [shape: bf16[5,256,512], index: 3, kind: input, shape index: {}]   ;;  %s14600_s2 = inlined_call_operand.vmem [shape: f32[1,256], index: 2, kind: input, shape index: {}]   ;;  %s14601_s5 = inlined_call_operand.vmem [shape: bf16[4,256,512], index: 5, kind: input, shape index: {}]   ;;  %s14602_s4 = inlined_call_operand.vmem [shape: f32[1,256], index: 4, kind: input, shape index: {}]   ;;  %s14603_s7 = inlined_call_operand.vmem [shape: bf16[512,128], index: 7, kind: input, shape index: {}]   ;;  %s14604_s6 = inlined_call_operand.vmem [shape: f32[1,512], index: 6, kind: input, shape index: {}]   ;;  %s14605_s8 = inlined_call_operand.vmem [shape: f32[1,128], index: 8, kind: input, shape index: {}]   ;;  %s14606_s9 = inlined_call_operand.vmem [shape: f32[16,128], index: 9, kind: output, shape index: {}]  }
   0x1   :  { %v10546_v0 = vld [vmem:[%s14597_s1 + $0x4] ss:$16 sps:$4 sm:$0xff]   ;;  %v10551_v1 = vld [vmem:[%s14597_s1 + $0xc] ss:$16 sps:$4 sm:$0xff]   ;;  %v10557_v2 = vld [vmem:[%s14597_s1] ss:$16 sps:$4 sm:$0xff]  }
   0x2   :  { %395 = vmatprep.subr.bf16.mxu0 %v10546_v0  ;;  %v10562_v3 = vld [vmem:[%s14597_s1 + $0x8] ss:$16 sps:$4 sm:$0xff]   ;;  %488 = vmatprep.subr.bf16.mxu1 %v10551_v1  ;;  %v10568_v4 = vld [vmem:[%s14597_s1 + $0x24] ss:$16 sps:$4 sm:$0xff]   ;;  %v10575_v5 = vld [vmem:[%s14597_s1 + $0x2c] ss:$16 sps:$4 sm:$0xff]  }
   0x3   :  { %396 = vmatpush1.bf16.msra.mxu0 %v10557_v2  ;;  %489 = vmatpush1.bf16.msra.mxu1 %v10562_v3  ;;  %v10580_v6 = vld [vmem:[%s14597_s1 + $0x20] ss:$16 sps:$4 sm:$0xff]   ;;  %v10586_v7 = vld [vmem:[%s14597_s1 + $0x28] ss:$16 sps:$4 sm:$0xff]   ;;  %v10592_v8 = vld [vmem:[%s14597_s1 + $0x44] ss:$16 sps:$4 sm:$0xff]  }
   0x4   :  { %397 = vmatprep.subr.bf16.mxu0 %v10568_v4  ;;  %490 = vmatprep.subr.bf16.mxu1 %v10575_v5  ;;  %v10597_v9 = vld [vmem:[%s14597_s1 + $0x4c] ss:$16 sps:$4 sm:$0xff]   ;;  %v10602_v10 = vld [vmem:[%s14597_s1 + $0x40] ss:$16 sps:$4 sm:$0xff]   ;;  %v10607_v11 = vld [vmem:[%s14597_s1 + $0x48] ss:$16 sps:$4 sm:$0xff]  }
   0x5   :  { %v10614_v12 = vld [vmem:[%s14597_s1 + $0x64] ss:$16 sps:$4 sm:$0xff]   ;;  %v10621_v13 = vld [vmem:[%s14597_s1 + $0x6c] ss:$16 sps:$4 sm:$0xff]   ;;  %v10626_v14 = vld [vmem:[%s14597_s1 + $0x60] ss:$16 sps:$4 sm:$0xff]  }
   0x6   :  { %v10633_v15 = vld [vmem:[%s14597_s1 + $0x68] ss:$16 sps:$4 sm:$0xff]   ;;  %v10638_v16 = vld [vmem:[%s14597_s1 + $0x84] ss:$16 sps:$4 sm:$0xff]   ;;  %v10645_v17 = vld [vmem:[%s14597_s1 + $0x8c] ss:$16 sps:$4 sm:$0xff]  }
   0x7   :  { %398 = vmatpush1.bf16.msra.mxu0 %v10580_v6  ;;  %491 = vmatpush1.bf16.msra.mxu1 %v10586_v7  ;;  %v10650_v18 = vld [vmem:[%s14597_s1 + $0x80] ss:$16 sps:$4 sm:$0xff]   ;;  %v10655_v19 = vld [vmem:[%s14597_s1 + $0x88] ss:$16 sps:$4 sm:$0xff]   ;;  %v10662_v20 = vld [vmem:[%s14597_s1 + $0xa4] ss:$16 sps:$4 sm:$0xff]  }
   0x8   :  { %399 = vmatprep.subr.bf16.mxu0 %v10592_v8  ;;  %492 = vmatprep.subr.bf16.mxu1 %v10597_v9  ;;  %v10669_v21 = vld [vmem:[%s14597_s1 + $0xac] ss:$16 sps:$4 sm:$0xff]   ;;  %v10674_v22 = vld [vmem:[%s14597_s1 + $0xa0] ss:$16 sps:$4 sm:$0xff]   ;;  %v10681_v23 = vld [vmem:[%s14597_s1 + $0xa8] ss:$16 sps:$4 sm:$0xff]  }
   0x9   :  { %v10686_v24 = vld [vmem:[%s14597_s1 + $0xc4] ss:$16 sps:$4 sm:$0xff]   ;;  %v10693_v25 = vld [vmem:[%s14597_s1 + $0xcc] ss:$16 sps:$4 sm:$0xff]   ;;  %v10698_v26 = vld [vmem:[%s14597_s1 + $0xc0] ss:$16 sps:$4 sm:$0xff]  }
   0xa   :  { %v10703_v27 = vld [vmem:[%s14597_s1 + $0xc8] ss:$16 sps:$4 sm:$0xff]   ;;  %v10710_v28 = vld [vmem:[%s14597_s1 + $0xe4] ss:$16 sps:$4 sm:$0xff]   ;;  %v10717_v29 = vld [vmem:[%s14597_s1 + $0xec] ss:$16 sps:$4 sm:$0xff]  }
   0xb   :  { %400 = vmatpush1.bf16.msra.mxu0 %v10602_v10  ;;  %493 = vmatpush1.bf16.msra.mxu1 %v10607_v11  ;;  %v10722_v30 = vld [vmem:[%s14597_s1 + $0xe0] ss:$16 sps:$4 sm:$0xff]   ;;  %v10727_v31 = vld [vmem:[%s14597_s1 + $0xe8] ss:$16 sps:$4 sm:$0xff]   ;;  %v9199_v32 = vld [vmem:[%s14598_s0 + $0x4] ss:$8 sps:$4 sm:$0xff]  }
   0xc   :  { %401 = vmatprep.subr.bf16.mxu0 %v10614_v12  ;;  %494 = vmatprep.subr.bf16.mxu1 %v10621_v13  ;;  %v10737_v33 = vld [vmem:[%s14597_s1 + $0x104] ss:$16 sps:$4 sm:$0xff]   ;;  %v10744_v34 = vld [vmem:[%s14597_s1 + $0x10c] ss:$16 sps:$4 sm:$0xff]   ;;  %v10751_v35 = vld [vmem:[%s14597_s1 + $0x100] ss:$16 sps:$4 sm:$0xff]  }
   0xd   :  { %7672 = vmatprep.mubr.msk.bf16.mxu0 %vm376_vm0, %v9199_v32  ;;  %7678 = vmatprep.mubr.msk.bf16.mxu1 %vm376_vm0, %v9199_v32  ;;  %v10756_v36 = vld [vmem:[%s14597_s1 + $0x108] ss:$16 sps:$4 sm:$0xff]   ;;  %v10763_v37 = vld [vmem:[%s14597_s1 + $0x124] ss:$16 sps:$4 sm:$0xff]   ;;  %v10770_v38 = vld [vmem:[%s14597_s1 + $0x12c] ss:$16 sps:$4 sm:$0xff]  }
   0xe   :  { %v10775_v39 = vld [vmem:[%s14597_s1 + $0x120] ss:$16 sps:$4 sm:$0xff]   ;;  %v10782_v40 = vld [vmem:[%s14597_s1 + $0x128] ss:$16 sps:$4 sm:$0xff]   ;;  %v9200_v42 = vld [vmem:[%s14598_s0 + $0x14] ss:$8 sps:$4 sm:$0xff]  }
   0xf   :  { %402 = vmatpush1.bf16.msra.mxu0 %v10626_v14  ;;  %495 = vmatpush1.bf16.msra.mxu1 %v10633_v15  ;;  %v9197_v41 = vld [vmem:[%s14598_s0] ss:$8 sps:$4 sm:$0xff]   ;;  %v9202_v43 = vld [vmem:[%s14598_s0 + $0x10] ss:$8 sps:$4 sm:$0xff]   ;;  %v9203_v44 = vld [vmem:[%s14598_s0 + $0x24] ss:$8 sps:$4 sm:$0xff]  }
  0x10   :  { %403 = vmatprep.subr.bf16.mxu0 %v10638_v16  ;;  %496 = vmatprep.subr.bf16.mxu1 %v10645_v17  ;;  %v9205_v45 = vld [vmem:[%s14598_s0 + $0x20] ss:$8 sps:$4 sm:$0xff]   ;;  %v9206_v46 = vld [vmem:[%s14598_s0 + $0x34] ss:$8 sps:$4 sm:$0xff]   ;;  %v9208_v47 = vld [vmem:[%s14598_s0 + $0x30] ss:$8 sps:$4 sm:$0xff]  }
  0x11   :  { %v9209_v48 = vld [vmem:[%s14598_s0 + $0x44] ss:$8 sps:$4 sm:$0xff]   ;;  %v9211_v49 = vld [vmem:[%s14598_s0 + $0x40] ss:$8 sps:$4 sm:$0xff]   ;;  %v9212_v50 = vld [vmem:[%s14598_s0 + $0x54] ss:$8 sps:$4 sm:$0xff]  }
  0x12   :  { %v9214_v51 = vld [vmem:[%s14598_s0 + $0x50] ss:$8 sps:$4 sm:$0xff]   ;;  %v9217_v52 = vld [vmem:[%s14598_s0 + $0x64] ss:$8 sps:$4 sm:$0xff]   ;;  %v9215_v53 = vld [vmem:[%s14598_s0 + $0x60] ss:$8 sps:$4 sm:$0xff]  }
  0x13   :  { %404 = vmatpush1.bf16.msra.mxu0 %v10650_v18  ;;  %497 = vmatpush1.bf16.msra.mxu1 %v10655_v19  ;;  %v9218_v54 = vld [vmem:[%s14598_s0 + $0x74] ss:$8 sps:$4 sm:$0xff]   ;;  %v9220_v55 = vld [vmem:[%s14598_s0 + $0x70] ss:$8 sps:$4 sm:$0xff]   ;;  %v9221_v56 = vld [vmem:[%s14598_s0 + $0x84] ss:$8 sps:$4 sm:$0xff]  }
  0x14   :  { %405 = vmatprep.subr.bf16.mxu0 %v10662_v20  ;;  %498 = vmatprep.subr.bf16.mxu1 %v10669_v21  ;;  %v9223_v57 = vld [vmem:[%s14598_s0 + $0x80] ss:$8 sps:$4 sm:$0xff]   ;;  %v9224_v58 = vld [vmem:[%s14598_s0 + $0x94] ss:$8 sps:$4 sm:$0xff]   ;;  %v9226_v59 = vld [vmem:[%s14598_s0 + $0x90] ss:$8 sps:$4 sm:$0xff]  }
  0x15   :  { %v9227_v60 = vld [vmem:[%s14598_s0 + $0xa4] ss:$8 sps:$4 sm:$0xff]   ;;  %v9229_v61 = vld [vmem:[%s14598_s0 + $0xa0] ss:$8 sps:$4 sm:$0xff]   ;;  %v9230_v62 = vld [vmem:[%s14598_s0 + $0xb4] ss:$8 sps:$4 sm:$0xff]  }
  0x16   :  { %v9232_v63 = vld [vmem:[%s14598_s0 + $0xb0] ss:$8 sps:$4 sm:$0xff]   ;;  %v9235_v32 = vld [vmem:[%s14598_s0 + $0xc4] ss:$8 sps:$4 sm:$0xff]  }
  0x17   :  { %406 = vmatpush1.bf16.msra.mxu0 %v10674_v22  ;;  %499 = vmatpush1.bf16.msra.mxu1 %v10681_v23 }
  0x18   :  { %407 = vmatprep.subr.bf16.mxu0 %v10686_v24  ;;  %500 = vmatprep.subr.bf16.mxu1 %v10693_v25 }
  0x1b   :  { %408 = vmatpush1.bf16.msra.mxu0 %v10698_v26  ;;  %501 = vmatpush1.bf16.msra.mxu1 %v10703_v27 }
  0x1c   :  { %409 = vmatprep.subr.bf16.mxu0 %v10710_v28  ;;  %502 = vmatprep.subr.bf16.mxu1 %v10717_v29 }
  0x1f   :  { %410 = vmatpush1.bf16.msra.mxu0 %v10722_v30  ;;  %503 = vmatpush1.bf16.msra.mxu1 %v10727_v31 }
  0x20   :  { %411 = vmatprep.subr.bf16.mxu0 %v10737_v33  ;;  %504 = vmatprep.subr.bf16.mxu1 %v10744_v34 }
  0x23   :  { %412 = vmatpush1.bf16.msra.mxu0 %v10751_v35  ;;  %505 = vmatpush1.bf16.msra.mxu1 %v10756_v36 }
  0x24   :  { %413 = vmatprep.subr.bf16.mxu0 %v10763_v37  ;;  %506 = vmatprep.subr.bf16.mxu1 %v10770_v38 }
  0x27   :  { %414 = vmatpush1.bf16.msra.mxu0 %v10775_v39  ;;  %507 = vmatpush1.bf16.msra.mxu1 %v10782_v40 }
  0x28   :  { %653 = vmatprep.subr.bf16.mxu0 %v10546_v0  ;;  %746 = vmatprep.subr.bf16.mxu1 %v10551_v1 }
  0x2a   :  { %428 = vmatmul.mubr.bf16.vlgmr.msra.gmra.mrb[0].mxu0 %v9197_v41  ;;  %521 = vmatmul.mubr.bf16.vlgmr.msra.gmra.mrb[0].mxu1 %v9197_v41  ;;  %v9233_v41 = vld [vmem:[%s14598_s0 + $0xc0] ss:$8 sps:$4 sm:$0xff]  }
  0x2b   :  { %654 = vmatpush1.bf16.msra.mxu0 %v10557_v2  ;;  %747 = vmatpush1.bf16.msra.mxu1 %v10562_v3 }
  0x2c   :  { %655 = vmatprep.subr.bf16.mxu0 %v10568_v4  ;;  %748 = vmatprep.subr.bf16.mxu1 %v10575_v5 }
  0x2d   :  { %7673 = vmatprep.mubr.msk.bf16.mxu0 %vm376_vm0, %v9200_v42  ;;  %7679 = vmatprep.mubr.msk.bf16.mxu1 %vm376_vm0, %v9200_v42  ;;  %v9236_v42 = vld [vmem:[%s14598_s0 + $0xd4] ss:$8 sps:$4 sm:$0xff]  }
  0x2f   :  { %656 = vmatpush1.bf16.msra.mxu0 %v10580_v6  ;;  %749 = vmatpush1.bf16.msra.mxu1 %v10586_v7 }
  0x30   :  { %657 = vmatprep.subr.bf16.mxu0 %v10592_v8  ;;  %750 = vmatprep.subr.bf16.mxu1 %v10597_v9 }
  0x32   :  { %438 = vmatmul.mubr.bf16.gmra.mrb[4].mxu0 %v9202_v43  ;;  %531 = vmatmul.mubr.bf16.gmra.mrb[4].mxu1 %v9202_v43  ;;  %v9298_v43 = vld [vmem:[%s14599_s3 + $0x28c] ss:$16 sps:$4 sm:$0xff]  }
  0x33   :  { %658 = vmatpush1.bf16.msra.mxu0 %v10602_v10  ;;  %751 = vmatpush1.bf16.msra.mxu1 %v10607_v11 }
  0x34   :  { %7674 = vmatprep.mubr.msk.bf16.mxu0 %vm376_vm0, %v9203_v44  ;;  %7680 = vmatprep.mubr.msk.bf16.mxu1 %vm376_vm0, %v9203_v44  ;;  %v9301_v44 = vld [vmem:[%s14599_s3 + $0x2a4] ss:$16 sps:$4 sm:$0xff]  }
  0x35   :  { %659 = vmatprep.subr.bf16.mxu0 %v10614_v12  ;;  %752 = vmatprep.subr.bf16.mxu1 %v10621_v13 }
  0x37   :  { %660 = vmatpush1.bf16.msra.mxu0 %v10626_v14  ;;  %753 = vmatpush1.bf16.msra.mxu1 %v10633_v15 }
  0x38   :  { %661 = vmatprep.subr.bf16.mxu0 %v10638_v16  ;;  %754 = vmatprep.subr.bf16.mxu1 %v10645_v17 }
  0x3a   :  { %448 = vmatmul.mubr.bf16.gmra.mrb[8].mxu0 %v9205_v45  ;;  %541 = vmatmul.mubr.bf16.gmra.mrb[8].mxu1 %v9205_v45  ;;  %v9304_v45 = vld [vmem:[%s14599_s3 + $0x2ac] ss:$16 sps:$4 sm:$0xff]  }
  0x3b   :  { %662 = vmatpush1.bf16.msra.mxu0 %v10650_v18  ;;  %755 = vmatpush1.bf16.msra.mxu1 %v10655_v19 }
  0x3c   :  { %7675 = vmatprep.mubr.msk.bf16.mxu0 %vm376_vm0, %v9206_v46  ;;  %7681 = vmatprep.mubr.msk.bf16.mxu1 %vm376_vm0, %v9206_v46  ;;  %v9299_v46 = vld [vmem:[%s14599_s3 + $0x2a0] ss:$16 sps:$4 sm:$0xff]  }
  0x3d   :  { %663 = vmatprep.subr.bf16.mxu0 %v10662_v20  ;;  %756 = vmatprep.subr.bf16.mxu1 %v10669_v21 }
  0x3f   :  { %664 = vmatpush1.bf16.msra.mxu0 %v10674_v22  ;;  %757 = vmatpush1.bf16.msra.mxu1 %v10681_v23 }
  0x40   :  { %665 = vmatprep.subr.bf16.mxu0 %v10686_v24  ;;  %758 = vmatprep.subr.bf16.mxu1 %v10693_v25 }
  0x42   :  { %458 = vmatmul.mubr.bf16.gmra.mrb[12].mxu0 %v9208_v47  ;;  %551 = vmatmul.mubr.bf16.gmra.mrb[12].mxu1 %v9208_v47  ;;  %v9302_v47 = vld [vmem:[%s14599_s3 + $0x2a8] ss:$16 sps:$4 sm:$0xff]  }
  0x43   :  { %666 = vmatpush1.bf16.msra.mxu0 %v10698_v26  ;;  %759 = vmatpush1.bf16.msra.mxu1 %v10703_v27 }
  0x44   :  { %7676 = vmatprep.mubr.msk.bf16.mxu0 %vm376_vm0, %v9209_v48  ;;  %7682 = vmatprep.mubr.msk.bf16.mxu1 %vm376_vm0, %v9209_v48  ;;  %v9305_v48 = vld [vmem:[%s14599_s3 + $0x2c0] ss:$16 sps:$4 sm:$0xff]  }
  0x45   :  { %667 = vmatprep.subr.bf16.mxu0 %v10710_v28  ;;  %760 = vmatprep.subr.bf16.mxu1 %v10717_v29 }
  0x47   :  { %668 = vmatpush1.bf16.msra.mxu0 %v10722_v30  ;;  %761 = vmatpush1.bf16.msra.mxu1 %v10727_v31 }
  0x48   :  { %669 = vmatprep.subr.bf16.mxu0 %v10737_v33  ;;  %762 = vmatprep.subr.bf16.mxu1 %v10744_v34 }
  0x4a   :  { %468 = vmatmul.mubr.bf16.gmra.mrb[16].mxu0 %v9211_v49  ;;  %561 = vmatmul.mubr.bf16.gmra.mrb[16].mxu1 %v9211_v49  ;;  %v9307_v49 = vld [vmem:[%s14599_s3 + $0x2c4] ss:$16 sps:$4 sm:$0xff]  }
  0x4b   :  { %7677 = vmatprep.mubr.msk.bf16.mxu0 %vm376_vm0, %v9212_v50  ;;  %7683 = vmatprep.mubr.msk.bf16.mxu1 %vm376_vm0, %v9212_v50  ;;  %v9308_v50 = vld [vmem:[%s14599_s3 + $0x2c8] ss:$16 sps:$4 sm:$0xff]  }
  0x4c   :  { %670 = vmatpush1.bf16.msra.mxu0 %v10751_v35  ;;  %763 = vmatpush1.bf16.msra.mxu1 %v10756_v36 }
  0x4d   :  { %671 = vmatprep.subr.bf16.mxu0 %v10763_v37  ;;  %764 = vmatprep.subr.bf16.mxu1 %v10770_v38 }
  0x50   :  { %672 = vmatpush1.bf16.msra.mxu0 %v10775_v39  ;;  %765 = vmatpush1.bf16.msra.mxu1 %v10782_v40 }
  0x51   :  { %1054 = vmatprep.subr.bf16.mxu0 %v10546_v0  ;;  %1147 = vmatprep.subr.bf16.mxu1 %v10551_v1 }
  0x52   :  { %478 = vmatmul.mubr.bf16.gmra.mrb[20].mxu0 %v9214_v51  ;;  %571 = vmatmul.mubr.bf16.gmra.mrb[20].mxu1 %v9214_v51  ;;  %v9310_v51 = vld [vmem:[%s14599_s3 + $0x2cc] ss:$16 sps:$4 sm:$0xff]  }
  0x53   :  { %7696 = vmatprep.mubr.msk.bf16.mxu0 %vm376_vm0, %v9217_v52  ;;  %7702 = vmatprep.mubr.msk.bf16.mxu1 %vm376_vm0, %v9217_v52  ;;  %v9313_v52 = vld [vmem:[%s14599_s3 + $0x2e4] ss:$16 sps:$4 sm:$0xff]  }
  0x5a   :  { %686 = vmatmul.mubr.bf16.vlgmr.msra.gmra.mrb[24].mxu0 %v9215_v53  ;;  %779 = vmatmul.mubr.bf16.vlgmr.msra.gmra.mrb[24].mxu1 %v9215_v53  ;;  %v9316_v53 = vld [vmem:[%s14599_s3 + $0x2ec] ss:$16 sps:$4 sm:$0xff]  }
  0x5b   :  { %1055 = vmatpush1.bf16.msra.mxu0 %v10557_v2  ;;  %1148 = vmatpush1.bf16.msra.mxu1 %v10562_v3 }
  0x5c   :  { %1056 = vmatprep.subr.bf16.mxu0 %v10568_v4  ;;  %1149 = vmatprep.subr.bf16.mxu1 %v10575_v5 }
  0x5d   :  { %7697 = vmatprep.mubr.msk.bf16.mxu0 %vm376_vm0, %v9218_v54  ;;  %7703 = vmatprep.mubr.msk.bf16.mxu1 %vm376_vm0, %v9218_v54  ;;  %v9311_v54 = vld [vmem:[%s14599_s3 + $0x2e0] ss:$16 sps:$4 sm:$0xff]  }
  0x5f   :  { %1057 = vmatpush1.bf16.msra.mxu0 %v10580_v6  ;;  %1150 = vmatpush1.bf16.msra.mxu1 %v10586_v7 }
  0x60   :  { %1058 = vmatprep.subr.bf16.mxu0 %v10592_v8  ;;  %1151 = vmatprep.subr.bf16.mxu1 %v10597_v9 }
  0x62   :  { %696 = vmatmul.mubr.bf16.gmra.mrb[28].mxu0 %v9220_v55  ;;  %789 = vmatmul.mubr.bf16.gmra.mrb[28].mxu1 %v9220_v55  ;;  %v9314_v55 = vld [vmem:[%s14599_s3 + $0x2e8] ss:$16 sps:$4 sm:$0xff]  }
  0x63   :  { %1059 = vmatpush1.bf16.msra.mxu0 %v10602_v10  ;;  %1152 = vmatpush1.bf16.msra.mxu1 %v10607_v11 }
  0x64   :  { %7698 = vmatprep.mubr.msk.bf16.mxu0 %vm376_vm0, %v9221_v56  ;;  %7704 = vmatprep.mubr.msk.bf16.mxu1 %vm376_vm0, %v9221_v56  ;;  %v9317_v56 = vld [vmem:[%s14599_s3 + $0x300] ss:$16 sps:$4 sm:$0xff]  }
  0x65   :  { %1060 = vmatprep.subr.bf16.mxu0 %v10614_v12  ;;  %1153 = vmatprep.subr.bf16.mxu1 %v10621_v13 }
  0x67   :  { %1061 = vmatpush1.bf16.msra.mxu0 %v10626_v14  ;;  %1154 = vmatpush1.bf16.msra.mxu1 %v10633_v15 }
  0x68   :  { %1062 = vmatprep.subr.bf16.mxu0 %v10638_v16  ;;  %1155 = vmatprep.subr.bf16.mxu1 %v10645_v17 }
  0x6a   :  { %706 = vmatmul.mubr.bf16.gmra.mrb[32].mxu0 %v9223_v57  ;;  %799 = vmatmul.mubr.bf16.gmra.mrb[32].mxu1 %v9223_v57  ;;  %v9319_v57 = vld [vmem:[%s14599_s3 + $0x304] ss:$16 sps:$4 sm:$0xff]  }
  0x6b   :  { %1063 = vmatpush1.bf16.msra.mxu0 %v10650_v18  ;;  %1156 = vmatpush1.bf16.msra.mxu1 %v10655_v19 }
  0x6c   :  { %7699 = vmatprep.mubr.msk.bf16.mxu0 %vm376_vm0, %v9224_v58  ;;  %7705 = vmatprep.mubr.msk.bf16.mxu1 %vm376_vm0, %v9224_v58  ;;  %v9320_v58 = vld [vmem:[%s14599_s3 + $0x308] ss:$16 sps:$4 sm:$0xff]  }
  0x6d   :  { %1064 = vmatprep.subr.bf16.mxu0 %v10662_v20  ;;  %1157 = vmatprep.subr.bf16.mxu1 %v10669_v21 }
  0x6f   :  { %1065 = vmatpush1.bf16.msra.mxu0 %v10674_v22  ;;  %1158 = vmatpush1.bf16.msra.mxu1 %v10681_v23 }
  0x70   :  { %1066 = vmatprep.subr.bf16.mxu0 %v10686_v24  ;;  %1159 = vmatprep.subr.bf16.mxu1 %v10693_v25 }
  0x72   :  { %716 = vmatmul.mubr.bf16.gmra.mrb[36].mxu0 %v9226_v59  ;;  %809 = vmatmul.mubr.bf16.gmra.mrb[36].mxu1 %v9226_v59  ;;  %v9322_v59 = vld [vmem:[%s14599_s3 + $0x30c] ss:$16 sps:$4 sm:$0xff]  }
  0x73   :  { %1067 = vmatpush1.bf16.msra.mxu0 %v10698_v26  ;;  %1160 = vmatpush1.bf16.msra.mxu1 %v10703_v27 }
  0x74   :  { %7700 = vmatprep.mubr.msk.bf16.mxu0 %vm376_vm0, %v9227_v60  ;;  %7706 = vmatprep.mubr.msk.bf16.mxu1 %vm376_vm0, %v9227_v60 }
  0x75   :  { %1068 = vmatprep.subr.bf16.mxu0 %v10710_v28  ;;  %1161 = vmatprep.subr.bf16.mxu1 %v10717_v29 }
  0x77   :  { %1069 = vmatpush1.bf16.msra.mxu0 %v10722_v30  ;;  %1162 = vmatpush1.bf16.msra.mxu1 %v10727_v31 }
  0x78   :  { %1070 = vmatprep.subr.bf16.mxu0 %v10737_v33  ;;  %1163 = vmatprep.subr.bf16.mxu1 %v10744_v34 }
  0x7a   :  { %726 = vmatmul.mubr.bf16.gmra.mrb[40].mxu0 %v9229_v61  ;;  %819 = vmatmul.mubr.bf16.gmra.mrb[40].mxu1 %v9229_v61 }
  0x7b   :  { %7701 = vmatprep.mubr.msk.bf16.mxu0 %vm376_vm0, %v9230_v62  ;;  %7707 = vmatprep.mubr.msk.bf16.mxu1 %vm376_vm0, %v9230_v62  ;;  %v9325_v62 = vld [vmem:[%s14599_s3 + $0x324] ss:$16 sps:$4 sm:$0xff]  }
  0x7c   :  { %1071 = vmatpush1.bf16.msra.mxu0 %v10751_v35  ;;  %1164 = vmatpush1.bf16.msra.mxu1 %v10756_v36 }
  0x7d   :  { %1072 = vmatprep.subr.bf16.mxu0 %v10763_v37  ;;  %1165 = vmatprep.subr.bf16.mxu1 %v10770_v38 }
  0x80   :  { %1073 = vmatpush1.bf16.msra.mxu0 %v10775_v39  ;;  %1166 = vmatpush1.bf16.msra.mxu1 %v10782_v40 }
  0x81   :  { %1312 = vmatprep.subr.bf16.mxu0 %v10546_v0  ;;  %1405 = vmatprep.subr.bf16.mxu1 %v10551_v1  ;;  %v9238_v0 = vld [vmem:[%s14598_s0 + $0xd0] ss:$8 sps:$4 sm:$0xff]   ;;  %v9239_v1 = vld [vmem:[%s14598_s0 + $0xe4] ss:$8 sps:$4 sm:$0xff]  }
  0x82   :  { %736 = vmatmul.mubr.bf16.gmra.mrb[44].mxu0 %v9232_v63  ;;  %829 = vmatmul.mubr.bf16.gmra.mrb[44].mxu1 %v9232_v63  ;;  %v9328_v63 = vld [vmem:[%s14599_s3 + $0x32c] ss:$16 sps:$4 sm:$0xff]  }
  0x83   :  { %7720 = vmatprep.mubr.msk.bf16.mxu0 %vm376_vm0, %v9235_v32  ;;  %7726 = vmatprep.mubr.msk.bf16.mxu1 %vm376_vm0, %v9235_v32 }
  0x8a   :  { %1087 = vmatmul.mubr.bf16.vlgmr.msra.gmra.mrb[48].mxu0 %v9233_v41  ;;  %1180 = vmatmul.mubr.bf16.vlgmr.msra.gmra.mrb[48].mxu1 %v9233_v41 }
  0x8b   :  { %1313 = vmatpush1.bf16.msra.mxu0 %v10557_v2  ;;  %1406 = vmatpush1.bf16.msra.mxu1 %v10562_v3  ;;  %v9241_v2 = vld [vmem:[%s14598_s0 + $0xe0] ss:$8 sps:$4 sm:$0xff]   ;;  %v9242_v3 = vld [vmem:[%s14598_s0 + $0xf4] ss:$8 sps:$4 sm:$0xff]  }
  0x8c   :  { %1314 = vmatprep.subr.bf16.mxu0 %v10568_v4  ;;  %1407 = vmatprep.subr.bf16.mxu1 %v10575_v5  ;;  %v9244_v4 = vld [vmem:[%s14598_s0 + $0xf0] ss:$8 sps:$4 sm:$0xff]   ;;  %v9245_v5 = vld [vmem:[%s14598_s0 + $0x104] ss:$8 sps:$4 sm:$0xff]  }
  0x8d   :  { %7721 = vmatprep.mubr.msk.bf16.mxu0 %vm376_vm0, %v9236_v42  ;;  %7727 = vmatprep.mubr.msk.bf16.mxu1 %vm376_vm0, %v9236_v42  ;;  %v9323_v42 = vld [vmem:[%s14599_s3 + $0x320] ss:$16 sps:$4 sm:$0xff]  }
  0x8f   :  { %1315 = vmatpush1.bf16.msra.mxu0 %v10580_v6  ;;  %1408 = vmatpush1.bf16.msra.mxu1 %v10586_v7  ;;  %v9247_v6 = vld [vmem:[%s14598_s0 + $0x100] ss:$8 sps:$4 sm:$0xff]   ;;  %v9248_v7 = vld [vmem:[%s14598_s0 + $0x114] ss:$8 sps:$4 sm:$0xff]  }
  0x90   :  { %1316 = vmatprep.subr.bf16.mxu0 %v10592_v8  ;;  %1409 = vmatprep.subr.bf16.mxu1 %v10597_v9  ;;  %v9250_v8 = vld [vmem:[%s14598_s0 + $0x110] ss:$8 sps:$4 sm:$0xff]   ;;  %v9253_v9 = vld [vmem:[%s14598_s0 + $0x124] ss:$8 sps:$4 sm:$0xff]  }
  0x92   :  { %1097 = vmatmul.mubr.bf16.gmra.mrb[52].mxu0 %v9238_v0  ;;  %1190 = vmatmul.mubr.bf16.gmra.mrb[52].mxu1 %v9238_v0  ;;  %v9326_v0 = vld [vmem:[%s14599_s3 + $0x328] ss:$16 sps:$4 sm:$0xff]  }
  0x93   :  { %1317 = vmatpush1.bf16.msra.mxu0 %v10602_v10  ;;  %1410 = vmatpush1.bf16.msra.mxu1 %v10607_v11  ;;  %v9251_v10 = vld [vmem:[%s14598_s0 + $0x120] ss:$8 sps:$4 sm:$0xff]   ;;  %v9254_v11 = vld [vmem:[%s14598_s0 + $0x134] ss:$8 sps:$4 sm:$0xff]  }
  0x94   :  { %7722 = vmatprep.mubr.msk.bf16.mxu0 %vm376_vm0, %v9239_v1  ;;  %7728 = vmatprep.mubr.msk.bf16.mxu1 %vm376_vm0, %v9239_v1 }
  0x95   :  { %1318 = vmatprep.subr.bf16.mxu0 %v10614_v12  ;;  %1411 = vmatprep.subr.bf16.mxu1 %v10621_v13  ;;  %v9256_v12 = vld [vmem:[%s14598_s0 + $0x130] ss:$8 sps:$4 sm:$0xff]   ;;  %v9257_v13 = vld [vmem:[%s14598_s0 + $0x144] ss:$8 sps:$4 sm:$0xff]  }
  0x97   :  { %1319 = vmatpush1.bf16.msra.mxu0 %v10626_v14  ;;  %1412 = vmatpush1.bf16.msra.mxu1 %v10633_v15  ;;  %v9259_v14 = vld [vmem:[%s14598_s0 + $0x140] ss:$8 sps:$4 sm:$0xff]   ;;  %v9260_v15 = vld [vmem:[%s14598_s0 + $0x154] ss:$8 sps:$4 sm:$0xff]  }
  0x98   :  { %1320 = vmatprep.subr.bf16.mxu0 %v10638_v16  ;;  %1413 = vmatprep.subr.bf16.mxu1 %v10645_v17  ;;  %v9262_v16 = vld [vmem:[%s14598_s0 + $0x150] ss:$8 sps:$4 sm:$0xff]   ;;  %v9263_v17 = vld [vmem:[%s14598_s0 + $0x164] ss:$8 sps:$4 sm:$0xff]  }
  0x9a   :  { %1107 = vmatmul.mubr.bf16.gmra.mrb[56].mxu0 %v9241_v2  ;;  %1200 = vmatmul.mubr.bf16.gmra.mrb[56].mxu1 %v9241_v2 }
  0x9b   :  { %1321 = vmatpush1.bf16.msra.mxu0 %v10650_v18  ;;  %1414 = vmatpush1.bf16.msra.mxu1 %v10655_v19  ;;  %v9265_v18 = vld [vmem:[%s14598_s0 + $0x160] ss:$8 sps:$4 sm:$0xff]   ;;  %v9266_v19 = vld [vmem:[%s14598_s0 + $0x174] ss:$8 sps:$4 sm:$0xff]  }
  0x9c   :  { %7723 = vmatprep.mubr.msk.bf16.mxu0 %vm376_vm0, %v9242_v3  ;;  %7729 = vmatprep.mubr.msk.bf16.mxu1 %vm376_vm0, %v9242_v3 }
  0x9d   :  { %1322 = vmatprep.subr.bf16.mxu0 %v10662_v20  ;;  %1415 = vmatprep.subr.bf16.mxu1 %v10669_v21  ;;  %v9271_v20 = vld [vmem:[%s14599_s3 + $0x204] ss:$16 sps:$4 sm:$0xff]   ;;  %v9269_v21 = vld [vmem:[%s14599_s3 + $0x200] ss:$16 sps:$4 sm:$0xff]  }
  0x9f   :  { %1323 = vmatpush1.bf16.msra.mxu0 %v10674_v22  ;;  %1416 = vmatpush1.bf16.msra.mxu1 %v10681_v23  ;;  %v9272_v22 = vld [vmem:[%s14599_s3 + $0x208] ss:$16 sps:$4 sm:$0xff]   ;;  %v9274_v23 = vld [vmem:[%s14599_s3 + $0x20c] ss:$16 sps:$4 sm:$0xff]  }
  0xa0   :  { %1324 = vmatprep.subr.bf16.mxu0 %v10686_v24  ;;  %1417 = vmatprep.subr.bf16.mxu1 %v10693_v25  ;;  %v9268_v24 = vld [vmem:[%s14598_s0 + $0x170] ss:$8 sps:$4 sm:$0xff]   ;;  %v9277_v25 = vld [vmem:[%s14599_s3 + $0x224] ss:$16 sps:$4 sm:$0xff]  }
  0xa2   :  { %1117 = vmatmul.mubr.bf16.gmra.mrb[60].mxu0 %v9244_v4  ;;  %1210 = vmatmul.mubr.bf16.gmra.mrb[60].mxu1 %v9244_v4 }
  0xa3   :  { %1325 = vmatpush1.bf16.msra.mxu0 %v10698_v26  ;;  %1418 = vmatpush1.bf16.msra.mxu1 %v10703_v27  ;;  %v9280_v26 = vld [vmem:[%s14599_s3 + $0x22c] ss:$16 sps:$4 sm:$0xff]   ;;  %v9275_v27 = vld [vmem:[%s14599_s3 + $0x220] ss:$16 sps:$4 sm:$0xff]  }
  0xa4   :  { %7724 = vmatprep.mubr.msk.bf16.mxu0 %vm376_vm0, %v9245_v5  ;;  %7730 = vmatprep.mubr.msk.bf16.mxu1 %vm376_vm0, %v9245_v5  ;;  %v9329_v5 = vld [vmem:[%s14599_s3 + $0x340] ss:$16 sps:$4 sm:$0xff]  }
  0xa5   :  { %1326 = vmatprep.subr.bf16.mxu0 %v10710_v28  ;;  %1419 = vmatprep.subr.bf16.mxu1 %v10717_v29  ;;  %v9278_v28 = vld [vmem:[%s14599_s3 + $0x228] ss:$16 sps:$4 sm:$0xff]   ;;  %v9281_v29 = vld [vmem:[%s14599_s3 + $0x240] ss:$16 sps:$4 sm:$0xff]  }
  0xa7   :  { %1327 = vmatpush1.bf16.msra.mxu0 %v10722_v30  ;;  %1420 = vmatpush1.bf16.msra.mxu1 %v10727_v31  ;;  %v9283_v30 = vld [vmem:[%s14599_s3 + $0x244] ss:$16 sps:$4 sm:$0xff]   ;;  %v9284_v31 = vld [vmem:[%s14599_s3 + $0x248] ss:$16 sps:$4 sm:$0xff]  }
  0xa8   :  { %1328 = vmatprep.subr.bf16.mxu0 %v10737_v33  ;;  %1421 = vmatprep.subr.bf16.mxu1 %v10744_v34  ;;  %v9286_v33 = vld [vmem:[%s14599_s3 + $0x24c] ss:$16 sps:$4 sm:$0xff]   ;;  %v9289_v34 = vld [vmem:[%s14599_s3 + $0x264] ss:$16 sps:$4 sm:$0xff]  }
  0xaa   :  { %1127 = vmatmul.mubr.bf16.gmra.mrb[64].mxu0 %v9247_v6  ;;  %1220 = vmatmul.mubr.bf16.gmra.mrb[64].mxu1 %v9247_v6  ;;  %v9331_v6 = vld [vmem:[%s14599_s3 + $0x344] ss:$16 sps:$4 sm:$0xff]  }
  0xab   :  { %7725 = vmatprep.mubr.msk.bf16.mxu0 %vm376_vm0, %v9248_v7  ;;  %7731 = vmatprep.mubr.msk.bf16.mxu1 %vm376_vm0, %v9248_v7  ;;  %v9332_v7 = vld [vmem:[%s14599_s3 + $0x348] ss:$16 sps:$4 sm:$0xff]  }
  0xac   :  { %1329 = vmatpush1.bf16.msra.mxu0 %v10751_v35  ;;  %1422 = vmatpush1.bf16.msra.mxu1 %v10756_v36  ;;  %v9292_v35 = vld [vmem:[%s14599_s3 + $0x26c] ss:$16 sps:$4 sm:$0xff]   ;;  %v9287_v36 = vld [vmem:[%s14599_s3 + $0x260] ss:$16 sps:$4 sm:$0xff]  }
  0xad   :  { %1330 = vmatprep.subr.bf16.mxu0 %v10763_v37  ;;  %1423 = vmatprep.subr.bf16.mxu1 %v10770_v38  ;;  %v9290_v37 = vld [vmem:[%s14599_s3 + $0x268] ss:$16 sps:$4 sm:$0xff]   ;;  %v9293_v38 = vld [vmem:[%s14599_s3 + $0x280] ss:$16 sps:$4 sm:$0xff]  }
  0xb0   :  { %1331 = vmatpush1.bf16.msra.mxu0 %v10775_v39  ;;  %1424 = vmatpush1.bf16.msra.mxu1 %v10782_v40  ;;  %v9295_v39 = vld [vmem:[%s14599_s3 + $0x284] ss:$16 sps:$4 sm:$0xff]   ;;  %v9296_v40 = vld [vmem:[%s14599_s3 + $0x288] ss:$16 sps:$4 sm:$0xff]  }
  0xb1   :  { %2080 = vmatprep.subr.bf16.mxu0 %v9271_v20  ;;  %2153 = vmatprep.subr.bf16.mxu1 %v9274_v23  ;;  %v9344_v23 = vld [vmem:[%s14599_s3 + $0x388] ss:$16 sps:$4 sm:$0xff]  }
  0xb2   :  { %1137 = vmatmul.mubr.bf16.gmra.mrb[68].mxu0 %v9250_v8  ;;  %1230 = vmatmul.mubr.bf16.gmra.mrb[68].mxu1 %v9250_v8  ;;  %v9334_v8 = vld [vmem:[%s14599_s3 + $0x34c] ss:$16 sps:$4 sm:$0xff]  }
  0xb3   :  { %7744 = vmatprep.mubr.msk.bf16.mxu0 %vm376_vm0, %v9253_v9  ;;  %7750 = vmatprep.mubr.msk.bf16.mxu1 %vm376_vm0, %v9253_v9 }
  0xba   :  { %1345 = vmatmul.mubr.bf16.vlgmr.msra.gmra.mrb[72].mxu0 %v9251_v10  ;;  %1438 = vmatmul.mubr.bf16.vlgmr.msra.gmra.mrb[72].mxu1 %v9251_v10 }
  0xbb   :  { %7745 = vmatprep.mubr.msk.bf16.mxu0 %vm376_vm0, %v9254_v11  ;;  %7751 = vmatprep.mubr.msk.bf16.mxu1 %vm376_vm0, %v9254_v11  ;;  %v9337_v11 = vld [vmem:[%s14599_s3 + $0x364] ss:$16 sps:$4 sm:$0xff]  }
  0xbc   :  { %2081 = vmatpush1.bf16.msra.mxu0 %v9269_v21  ;;  %2154 = vmatpush1.bf16.msra.mxu1 %v9272_v22  ;;  %v9341_v21 = vld [vmem:[%s14599_s3 + $0x380] ss:$16 sps:$4 sm:$0xff]   ;;  %v9343_v22 = vld [vmem:[%s14599_s3 + $0x384] ss:$16 sps:$4 sm:$0xff]  }
  0xbd   :  { %2082 = vmatprep.subr.bf16.mxu0 %v9277_v25  ;;  %2155 = vmatprep.subr.bf16.mxu1 %v9280_v26 }
  0xc0   :  { %2083 = vmatpush1.bf16.msra.mxu0 %v9275_v27  ;;  %2156 = vmatpush1.bf16.msra.mxu1 %v9278_v28  ;;  %v9349_v27 = vld [vmem:[%s14599_s3 + $0x3a4] ss:$16 sps:$4 sm:$0xff]   ;;  %v9352_v28 = vld [vmem:[%s14599_s3 + $0x3ac] ss:$16 sps:$4 sm:$0xff]  }
  0xc1   :  { %2084 = vmatprep.subr.bf16.mxu0 %v9283_v30  ;;  %2157 = vmatprep.subr.bf16.mxu1 %v9286_v33  ;;  %v9350_v33 = vld [vmem:[%s14599_s3 + $0x3a8] ss:$16 sps:$4 sm:$0xff]  }
  0xc2   :  { %1355 = vmatmul.mubr.bf16.gmra.mrb[76].mxu0 %v9256_v12  ;;  %1448 = vmatmul.mubr.bf16.gmra.mrb[76].mxu1 %v9256_v12  ;;  %v9340_v12 = vld [vmem:[%s14599_s3 + $0x36c] ss:$16 sps:$4 sm:$0xff]  }
  0xc3   :  { %7746 = vmatprep.mubr.msk.bf16.mxu0 %vm376_vm0, %v9257_v13  ;;  %7752 = vmatprep.mubr.msk.bf16.mxu1 %vm376_vm0, %v9257_v13 }
  0xc4   :  { %2085 = vmatpush1.bf16.msra.mxu0 %v9281_v29  ;;  %2158 = vmatpush1.bf16.msra.mxu1 %v9284_v31  ;;  %v9347_v31 = vld [vmem:[%s14599_s3 + $0x3a0] ss:$16 sps:$4 sm:$0xff]  }
  0xc5   :  { %2086 = vmatprep.subr.bf16.mxu0 %v9289_v34  ;;  %2159 = vmatprep.subr.bf16.mxu1 %v9292_v35 }
  0xc8   :  { %2087 = vmatpush1.bf16.msra.mxu0 %v9287_v36  ;;  %2160 = vmatpush1.bf16.msra.mxu1 %v9290_v37 }
  0xc9   :  { %2088 = vmatprep.subr.bf16.mxu0 %v9295_v39  ;;  %2161 = vmatprep.subr.bf16.mxu1 %v9298_v43  ;;  %v9358_v39 = vld [vmem:[%s14599_s3 + $0x3cc] ss:$16 sps:$4 sm:$0xff]   ;;  %v9356_v43 = vld [vmem:[%s14599_s3 + $0x3c8] ss:$16 sps:$4 sm:$0xff]  }
  0xca   :  { %1365 = vmatmul.mubr.bf16.gmra.mrb[80].mxu0 %v9259_v14  ;;  %1458 = vmatmul.mubr.bf16.gmra.mrb[80].mxu1 %v9259_v14 }
  0xcb   :  { %7747 = vmatprep.mubr.msk.bf16.mxu0 %vm376_vm0, %v9260_v15  ;;  %7753 = vmatprep.mubr.msk.bf16.mxu1 %vm376_vm0, %v9260_v15  ;;  %v9335_v15 = vld [vmem:[%s14599_s3 + $0x360] ss:$16 sps:$4 sm:$0xff]  }
  0xcc   :  { %2089 = vmatpush1.bf16.msra.mxu0 %v9293_v38  ;;  %2162 = vmatpush1.bf16.msra.mxu1 %v9296_v40  ;;  %v9355_v38 = vld [vmem:[%s14599_s3 + $0x3c4] ss:$16 sps:$4 sm:$0xff]   ;;  %v9353_v40 = vld [vmem:[%s14599_s3 + $0x3c0] ss:$16 sps:$4 sm:$0xff]  }
  0xcd   :  { %2090 = vmatprep.subr.bf16.mxu0 %v9301_v44  ;;  %2163 = vmatprep.subr.bf16.mxu1 %v9304_v45 }
  0xd0   :  { %2091 = vmatpush1.bf16.msra.mxu0 %v9299_v46  ;;  %2164 = vmatpush1.bf16.msra.mxu1 %v9302_v47  ;;  %v9361_v46 = vld [vmem:[%s14599_s3 + $0x3e4] ss:$16 sps:$4 sm:$0xff]   ;;  %v9364_v47 = vld [vmem:[%s14599_s3 + $0x3ec] ss:$16 sps:$4 sm:$0xff]  }
  0xd1   :  { %2092 = vmatprep.subr.bf16.mxu0 %v9307_v49  ;;  %2165 = vmatprep.subr.bf16.mxu1 %v9310_v51  ;;  %v9362_v51 = vld [vmem:[%s14599_s3 + $0x3e8] ss:$16 sps:$4 sm:$0xff]  }
  0xd2   :  { %1375 = vmatmul.mubr.bf16.gmra.mrb[84].mxu0 %v9262_v16  ;;  %1468 = vmatmul.mubr.bf16.gmra.mrb[84].mxu1 %v9262_v16  ;;  %v9338_v16 = vld [vmem:[%s14599_s3 + $0x368] ss:$16 sps:$4 sm:$0xff]  }
  0xd3   :  { %7748 = vmatprep.mubr.msk.bf16.mxu0 %vm376_vm0, %v9263_v17  ;;  %7754 = vmatprep.mubr.msk.bf16.mxu1 %vm376_vm0, %v9263_v17 }
  0xd4   :  { %2093 = vmatpush1.bf16.msra.mxu0 %v9305_v48  ;;  %2166 = vmatpush1.bf16.msra.mxu1 %v9308_v50  ;;  %v9359_v50 = vld [vmem:[%s14599_s3 + $0x3e0] ss:$16 sps:$4 sm:$0xff]  }
  0xd5   :  { %2094 = vmatprep.subr.bf16.mxu0 %v9313_v52  ;;  %2167 = vmatprep.subr.bf16.mxu1 %v9316_v53 }
  0xd8   :  { %2095 = vmatpush1.bf16.msra.mxu0 %v9311_v54  ;;  %2168 = vmatpush1.bf16.msra.mxu1 %v9314_v55 }
  0xd9   :  { %2096 = vmatprep.subr.bf16.mxu0 %v9319_v57  ;;  %2169 = vmatprep.subr.bf16.mxu1 %v9322_v59  ;;  %v9370_v57 = vld [vmem:[%s14599_s3 + $0xc] ss:$16 sps:$4 sm:$0xff]  }
  0xda   :  { %1385 = vmatmul.mubr.bf16.gmra.mrb[88].mxu0 %v9265_v18  ;;  %1478 = vmatmul.mubr.bf16.gmra.mrb[88].mxu1 %v9265_v18 }
  0xdb   :  { %7749 = vmatprep.mubr.msk.bf16.mxu0 %vm376_vm0, %v9266_v19  ;;  %7755 = vmatprep.mubr.msk.bf16.mxu1 %vm376_vm0, %v9266_v19 }
  0xdc   :  { %2097 = vmatpush1.bf16.msra.mxu0 %v9317_v56  ;;  %2170 = vmatpush1.bf16.msra.mxu1 %v9320_v58  ;;  %v9367_v56 = vld [vmem:[%s14599_s3 + $0x4] ss:$16 sps:$4 sm:$0xff]  }
  0xdd   :  { %2098 = vmatprep.subr.bf16.mxu0 %v9325_v62  ;;  %2171 = vmatprep.subr.bf16.mxu1 %v9328_v63 }
  0xe0   :  { %2099 = vmatpush1.bf16.msra.mxu0 %v9323_v42  ;;  %2172 = vmatpush1.bf16.msra.mxu1 %v9326_v0 }
  0xe1   :  { %2100 = vmatprep.subr.bf16.mxu0 %v9331_v6  ;;  %2173 = vmatprep.subr.bf16.mxu1 %v9334_v8 }
  0xe2   :  { %1395 = vmatmul.mubr.bf16.gmra.mrb[92].mxu0 %v9268_v24  ;;  %1488 = vmatmul.mubr.bf16.gmra.mrb[92].mxu1 %v9268_v24  ;;  %v9346_v24 = vld [vmem:[%s14599_s3 + $0x38c] ss:$16 sps:$4 sm:$0xff]  }
  0xe4   :  { %2101 = vmatpush1.bf16.msra.mxu0 %v9329_v5  ;;  %2174 = vmatpush1.bf16.msra.mxu1 %v9332_v7  ;;  %v912_v7 = vlaneseq }
  0xe5   :  { %2102 = vmatprep.subr.bf16.mxu0 %v9337_v11  ;;  %2175 = vmatprep.subr.bf16.mxu1 %v9340_v12 }
  0xe8   :  { %2103 = vmatpush1.bf16.msra.mxu0 %v9335_v15  ;;  %2176 = vmatpush1.bf16.msra.mxu1 %v9338_v16  ;;  %v11381_v16 = vshrl.u32 %v912_v7, 7 }
  0xe9   :  { %2104 = vmatprep.subr.bf16.mxu0 %v9343_v22  ;;  %2177 = vmatprep.subr.bf16.mxu1 %v9346_v24 }
  0xea   :  { %14624 = vst [vmem:[#allocation2_spill] sm:$0xff] %v11381_v16 }
  0xec   :  { %2105 = vmatpush1.bf16.msra.mxu0 %v9341_v21  ;;  %2178 = vmatpush1.bf16.msra.mxu1 %v9344_v23 }
  0xed   :  { %2106 = vmatprep.subr.bf16.mxu0 %v9349_v27  ;;  %2179 = vmatprep.subr.bf16.mxu1 %v9352_v28  ;;  %v11392_v27 = vsub.s32 0, %v11381_v16  ;;  %v121_v28 = vld [vmem:[%s14600_s2] sm:$0x3] }
  0xef   :  { %14627 = vst [vmem:[#allocation5_spill] sm:$0xff] %v11392_v27 }
  0xf0   :  { %2107 = vmatpush1.bf16.msra.mxu0 %v9347_v31  ;;  %2180 = vmatpush1.bf16.msra.mxu1 %v9350_v33  ;;  %v11398_v31 = vsub.s32 1, %v11381_v16 }
  0xf1   :  { %2108 = vmatprep.subr.bf16.mxu0 %v9355_v38  ;;  %2181 = vmatprep.subr.bf16.mxu1 %v9358_v39 }
  0xf2   :  { %14628 = vst [vmem:[#allocation6_spill] sm:$0xff] %v11398_v31 }
  0xf4   :  { %2109 = vmatpush1.bf16.msra.mxu0 %v9353_v40  ;;  %2182 = vmatpush1.bf16.msra.mxu1 %v9356_v43  ;;  %v11403_v43 = vrot.slane %v121_v28, %v11392_v27 }
  0xf5   :  { %2110 = vmatprep.subr.bf16.mxu0 %v9361_v46  ;;  %2183 = vmatprep.subr.bf16.mxu1 %v9364_v47 }
  0xf8   :  { %2111 = vmatpush1.bf16.msra.mxu0 %v9359_v50  ;;  %2184 = vmatpush1.bf16.msra.mxu1 %v9362_v51 }
  0xf9   :  { %2546 = vmatprep.subr.bf16.mxu0 %v9367_v56  ;;  %2619 = vmatprep.subr.bf16.mxu1 %v9370_v57  ;;  %v11408_v56 = vrot.slane %v121_v28, %v11398_v31 }
  0xfd   :  { %v11203_v60 = vpop.f32.mrb[0].mxu0  ;;  %v11205_v61 = vpop.f32.mrb[0].mxu1 }
  0xfe   :  { %v11213_v32 = vpop.f32.mrb[1].mxu0  ;;  %v11215_v41 = vpop.f32.mrb[1].mxu1 }
  0xff   :  { %v11223_v1 = vpop.f32.mrb[2].mxu0  ;;  %v11225_v2 = vpop.f32.mrb[2].mxu1 }
 0x100   :  { %v11227_v3 = vpop.f32.mrb[3].mxu0  ;;  %v11229_v4 = vpop.f32.mrb[3].mxu1 }
 0x105   :  { %v11243_v9 = vpop.f32.mrb[4].mxu0  ;;  %v11245_v10 = vpop.f32.mrb[4].mxu1 }
 0x106   :  { %v11253_v13 = vpop.f32.mrb[5].mxu0  ;;  %v11255_v14 = vpop.f32.mrb[5].mxu1 }
 0x107   :  { %v11263_v17 = vpop.f32.mrb[6].mxu0  ;;  %v11265_v18 = vpop.f32.mrb[6].mxu1 }
 0x108   :  { %v11267_v19 = vpop.f32.mrb[7].mxu0  ;;  %v11269_v20 = vpop.f32.mrb[7].mxu1 }
 0x10d   :  { %v11283_v25 = vpop.f32.mrb[8].mxu0  ;;  %v11285_v26 = vpop.f32.mrb[8].mxu1 }
 0x10e   :  { %v11293_v29 = vpop.f32.mrb[9].mxu0  ;;  %v11295_v30 = vpop.f32.mrb[9].mxu1 }
 0x10f   :  { %v11303_v34 = vpop.f32.mrb[10].mxu0  ;;  %v11305_v35 = vpop.f32.mrb[10].mxu1 }
 0x110   :  { %v11307_v36 = vpop.f32.mrb[11].mxu0  ;;  %v11309_v37 = vpop.f32.mrb[11].mxu1 }
 0x115   :  { %v11323_v44 = vpop.f32.mrb[12].mxu0  ;;  %v11325_v45 = vpop.f32.mrb[12].mxu1 }
 0x116   :  { %v11333_v48 = vpop.f32.mrb[13].mxu0  ;;  %v11335_v49 = vpop.f32.mrb[13].mxu1 }
 0x117   :  { %v11343_v52 = vpop.f32.mrb[14].mxu0  ;;  %v11345_v53 = vpop.f32.mrb[14].mxu1 }
 0x118   :  { %v11347_v54 = vpop.f32.mrb[15].mxu0  ;;  %v11349_v55 = vpop.f32.mrb[15].mxu1 }
 0x11d   :  { %v11357_v58 = vpop.f32.mrb[16].mxu0  ;;  %v11359_v59 = vpop.f32.mrb[16].mxu1 }
 0x11e   :  { %v11361_v62 = vpop.f32.mrb[17].mxu0  ;;  %v11363_v63 = vpop.f32.mrb[17].mxu1 }
 0x11f   :  { %v11365_v42 = vpop.f32.mrb[18].mxu0  ;;  %v11367_v0 = vpop.f32.mrb[18].mxu1 }
 0x120   :  { %v11369_v5 = vpop.f32.mrb[19].mxu0  ;;  %v11371_v6 = vpop.f32.mrb[19].mxu1 }
 0x125   :  { %v11373_v8 = vpop.f32.mrb[20].mxu0  ;;  %v11375_v11 = vpop.f32.mrb[20].mxu1 }
 0x126   :  { %v11377_v12 = vpop.f32.mrb[21].mxu0  ;;  %v11379_v15 = vpop.f32.mrb[21].mxu1 }
 0x127   :  { %v11383_v21 = vpop.f32.mrb[22].mxu0  ;;  %v11385_v22 = vpop.f32.mrb[22].mxu1 }
 0x128   :  { %v11387_v23 = vpop.f32.mrb[23].mxu0  ;;  %v11389_v24 = vpop.f32.mrb[23].mxu1 }
 0x129   :  { %14625 = vst [vmem:[#allocation3_spill] sm:$0xff] %v11387_v23  ;;  %14626 = vst [vmem:[#allocation4_spill] sm:$0xff] %v11389_v24 }
 0x12d   :  { %v687_v33 = vpop.f32.mrb[24].mxu0  ;;  %v780_v38 = vpop.f32.mrb[24].mxu1 }
 0x12e   :  { %v839_v39 = vmax.f32 %v11203_v60, %v687_v33  ;;  %v841_v40 = vmax.f32 %v11205_v61, %v780_v38  ;;  %v689_v46 = vpop.f32.mrb[25].mxu0  ;;  %v782_v47 = vpop.f32.mrb[25].mxu1 }
 0x12f   :  { %v840_v50 = vmax.f32 %v11213_v32, %v689_v46  ;;  %v842_v51 = vmax.f32 %v11215_v41, %v782_v47  ;;  %v691_v57 = vpop.f32.mrb[26].mxu0  ;;  %v784_v7 = vpop.f32.mrb[26].mxu1 }
 0x130   :  { %v887_v16 = vmax.f32 %v839_v39, %v841_v40  ;;  %v843_v24 = vmax.f32 %v11223_v1, %v691_v57  ;;  %v845_v60 = vmax.f32 %v11225_v2, %v784_v7  ;;  %v693_v61 = vpop.f32.mrb[27].mxu0  ;;  %v786_v33 = vpop.f32.mrb[27].mxu1 }
 0x131   :  { %v888_v38 = vmax.f32 %v840_v50, %v842_v51  ;;  %v844_v27 = vmax.f32 %v11227_v3, %v693_v61  ;;  %v846_v23 = vmax.f32 %v11229_v4, %v786_v33 }
 0x132   :  { %v922_v32 = vadd.f32 %v11403_v43, %v887_v16  ;;  %v889_v41 = vmax.f32 %v843_v24, %v845_v60 }
 0x133   :  { %v923_v28 = vadd.f32 %v11408_v56, %v888_v38  ;;  %v890_v46 = vmax.f32 %v844_v27, %v846_v23 }
 0x134   :  { %v924_v47 = vadd.f32 %v11403_v43, %v889_v41  ;;  %v946_v39 = vmax.f32 %v922_v32, 0.0 }
 0x135   :  { %v925_v1 = vadd.f32 %v11408_v56, %v890_v46  ;;  %v697_v40 = vpop.f32.mrb[28].mxu0  ;;  %v790_v2 = vpop.f32.mrb[28].mxu1  ;;  %v947_v7 = vmax.f32 %v923_v28, 0.0 }
 0x136   :  { %v948_v57 = vmax.f32 %v924_v47, 0.0  ;;  %v847_v50 = vmax.f32 %v11243_v9, %v697_v40  ;;  %v849_v3 = vmax.f32 %v11245_v10, %v790_v2  ;;  %v699_v51 = vpop.f32.mrb[29].mxu0  ;;  %v792_v4 = vpop.f32.mrb[29].mxu1 }
 0x137   :  { %v949_v16 = vmax.f32 %v925_v1, 0.0  ;;  %v848_v24 = vmax.f32 %v11253_v13, %v699_v51  ;;  %v850_v23 = vmax.f32 %v11255_v14, %v792_v4  ;;  %v701_v27 = vpop.f32.mrb[30].mxu0  ;;  %v794_v60 = vpop.f32.mrb[30].mxu1 }
 0x138   :  { %v11422_v61 = vpack.c.bf16 %v948_v57, %v946_v39  ;;  %v891_v33 = vmax.f32 %v847_v50, %v849_v3  ;;  %v851_v38 = vmax.f32 %v11263_v17, %v701_v27  ;;  %v853_v32 = vmax.f32 %v11265_v18, %v794_v60  ;;  %v703_v9 = vpop.f32.mrb[31].mxu0  ;;  %v796_v41 = vpop.f32.mrb[31].mxu1 }
 0x139   :  { %v892_v10 = vmax.f32 %v848_v24, %v850_v23  ;;  %v852_v46 = vmax.f32 %v11267_v19, %v703_v9  ;;  %v854_v28 = vmax.f32 %v11269_v20, %v796_v41  ;;  %v11428_v47 = vpack.c.bf16 %v949_v16, %v947_v7 }
 0x13a   :  { %14629 = vst [vmem:[#allocation7_spill] sm:$0xff] %v11422_v61  ;;  %v926_v13 = vadd.f32 %v11403_v43, %v891_v33  ;;  %v893_v14 = vmax.f32 %v851_v38, %v853_v32 }
 0x13b   :  { %v927_v39 = vadd.f32 %v11408_v56, %v892_v10  ;;  %v894_v1 = vmax.f32 %v852_v46, %v854_v28 }
 0x13c   :  { %v928_v40 = vadd.f32 %v11403_v43, %v893_v14  ;;  %v950_v17 = vmax.f32 %v926_v13, 0.0 }
 0x13d   :  { %v929_v18 = vadd.f32 %v11408_v56, %v894_v1  ;;  %v707_v2 = vpop.f32.mrb[32].mxu0  ;;  %v800_v57 = vpop.f32.mrb[32].mxu1  ;;  %v951_v4 = vmax.f32 %v927_v39, 0.0 }
 0x13e   :  { %v952_v50 = vmax.f32 %v928_v40, 0.0  ;;  %v855_v19 = vmax.f32 %v11283_v25, %v707_v2  ;;  %v857_v20 = vmax.f32 %v11285_v26, %v800_v57  ;;  %v709_v3 = vpop.f32.mrb[33].mxu0  ;;  %v802_v51 = vpop.f32.mrb[33].mxu1 }
 0x13f   :  { %v953_v7 = vmax.f32 %v929_v18, 0.0  ;;  %v856_v16 = vmax.f32 %v11293_v29, %v709_v3  ;;  %v858_v24 = vmax.f32 %v11295_v30, %v802_v51  ;;  %v711_v23 = vpop.f32.mrb[34].mxu0  ;;  %v804_v27 = vpop.f32.mrb[34].mxu1 }
 0x140   :  { %v11438_v60 = vpack.c.bf16 %v952_v50, %v950_v17  ;;  %v895_v33 = vmax.f32 %v855_v19, %v857_v20  ;;  %v859_v38 = vmax.f32 %v11303_v34, %v711_v23  ;;  %v861_v32 = vmax.f32 %v11305_v35, %v804_v27  ;;  %v713_v25 = vpop.f32.mrb[35].mxu0  ;;  %v806_v9 = vpop.f32.mrb[35].mxu1 }
 0x141   :  { %v11442_v26 = vpack.c.bf16 %v953_v7, %v951_v4  ;;  %v896_v41 = vmax.f32 %v856_v16, %v858_v24  ;;  %v860_v10 = vmax.f32 %v11307_v36, %v713_v25  ;;  %v862_v29 = vmax.f32 %v11309_v37, %v806_v9 }
 0x142   :  { %14630 = vst [vmem:[#allocation8_spill] sm:$0xff] %v11438_v60  ;;  %v930_v30 = vadd.f32 %v11403_v43, %v895_v33  ;;  %v897_v46 = vmax.f32 %v859_v38, %v861_v32 }
 0x143   :  { %14631 = vst [vmem:[#allocation9_spill] sm:$0xff] %v11442_v26  ;;  %v931_v28 = vadd.f32 %v11408_v56, %v896_v41  ;;  %v898_v13 = vmax.f32 %v860_v10, %v862_v29 }
 0x144   :  { %v932_v14 = vadd.f32 %v11403_v43, %v897_v46  ;;  %v954_v1 = vmax.f32 %v930_v30, 0.0 }
 0x145   :  { %v933_v34 = vadd.f32 %v11408_v56, %v898_v13  ;;  %v717_v35 = vpop.f32.mrb[36].mxu0  ;;  %v810_v39 = vpop.f32.mrb[36].mxu1  ;;  %v955_v2 = vmax.f32 %v931_v28, 0.0 }
 0x146   :  { %v956_v40 = vmax.f32 %v932_v14, 0.0  ;;  %v863_v17 = vmax.f32 %v11323_v44, %v717_v35  ;;  %v865_v36 = vmax.f32 %v11325_v45, %v810_v39  ;;  %v719_v18 = vpop.f32.mrb[37].mxu0  ;;  %v812_v37 = vpop.f32.mrb[37].mxu1 }
 0x147   :  { %v957_v57 = vmax.f32 %v933_v34, 0.0  ;;  %v864_v50 = vmax.f32 %v11333_v48, %v719_v18  ;;  %v866_v19 = vmax.f32 %v11335_v49, %v812_v37  ;;  %v721_v20 = vpop.f32.mrb[38].mxu0  ;;  %v814_v3 = vpop.f32.mrb[38].mxu1 }
 0x148   :  { %v11454_v51 = vpack.c.bf16 %v956_v40, %v954_v1  ;;  %v899_v4 = vmax.f32 %v863_v17, %v865_v36  ;;  %v867_v7 = vmax.f32 %v11343_v52, %v721_v20  ;;  %v869_v16 = vmax.f32 %v11345_v53, %v814_v3  ;;  %v723_v44 = vpop.f32.mrb[39].mxu0  ;;  %v816_v24 = vpop.f32.mrb[39].mxu1 }
 0x149   :  { %v11458_v45 = vpack.c.bf16 %v957_v57, %v955_v2  ;;  %v900_v23 = vmax.f32 %v864_v50, %v866_v19  ;;  %v868_v27 = vmax.f32 %v11347_v54, %v723_v44  ;;  %v870_v48 = vmax.f32 %v11349_v55, %v816_v24 }
 0x14a   :  { %14632 = vst [vmem:[#allocation10_spill] sm:$0xff] %v11454_v51  ;;  %v934_v49 = vadd.f32 %v11403_v43, %v899_v4  ;;  %v901_v33 = vmax.f32 %v867_v7, %v869_v16 }
 0x14b   :  { %14633 = vst [vmem:[#allocation11_spill] sm:$0xff] %v11458_v45  ;;  %v935_v38 = vadd.f32 %v11408_v56, %v900_v23  ;;  %v902_v32 = vmax.f32 %v868_v27, %v870_v48 }
 0x14c   :  { %v936_v25 = vadd.f32 %v11403_v43, %v901_v33  ;;  %v958_v41 = vmax.f32 %v934_v49, 0.0 }
 0x14d   :  { %v937_v52 = vadd.f32 %v11408_v56, %v902_v32  ;;  %v727_v53 = vpop.f32.mrb[40].mxu0  ;;  %v820_v9 = vpop.f32.mrb[40].mxu1  ;;  %v959_v46 = vmax.f32 %v935_v38, 0.0 }
 0x14e   :  { %v960_v10 = vmax.f32 %v936_v25, 0.0  ;;  %v871_v29 = vmax.f32 %v11357_v58, %v727_v53  ;;  %v873_v54 = vmax.f32 %v11359_v59, %v820_v9  ;;  %v729_v30 = vpop.f32.mrb[41].mxu0  ;;  %v822_v55 = vpop.f32.mrb[41].mxu1  ;;  %v14638_v9 = vld [vmem:[#allocation3_spill] sm:$0xff] }
 0x14f   :  { %v961_v28 = vmax.f32 %v937_v52, 0.0  ;;  %v872_v13 = vmax.f32 %v11361_v62, %v729_v30  ;;  %v874_v14 = vmax.f32 %v11363_v63, %v822_v55  ;;  %v731_v34 = vpop.f32.mrb[42].mxu0  ;;  %v824_v35 = vpop.f32.mrb[42].mxu1 }
 0x150   :  { %v11470_v39 = vpack.c.bf16 %v960_v10, %v958_v41  ;;  %v903_v1 = vmax.f32 %v871_v29, %v873_v54  ;;  %v875_v40 = vmax.f32 %v11365_v42, %v731_v34  ;;  %v877_v17 = vmax.f32 %v11367_v0, %v824_v35  ;;  %v733_v58 = vpop.f32.mrb[43].mxu0  ;;  %v826_v36 = vpop.f32.mrb[43].mxu1  ;;  %v14639_v10 = vld [vmem:[#allocation4_spill] sm:$0xff] }
 0x151   :  { %v11474_v59 = vpack.c.bf16 %v961_v28, %v959_v46  ;;  %v904_v18 = vmax.f32 %v872_v13, %v874_v14  ;;  %v876_v37 = vmax.f32 %v11369_v5, %v733_v58  ;;  %v878_v62 = vmax.f32 %v11371_v6, %v826_v36 }
 0x152   :  { %14634 = vst [vmem:[#allocation12_spill] sm:$0xff] %v11470_v39  ;;  %v938_v63 = vadd.f32 %v11403_v43, %v903_v1  ;;  %v905_v2 = vmax.f32 %v875_v40, %v877_v17 }
 0x153   :  { %14635 = vst [vmem:[#allocation13_spill] sm:$0xff] %v11474_v59  ;;  %v939_v57 = vadd.f32 %v11408_v56, %v904_v18  ;;  %v906_v50 = vmax.f32 %v876_v37, %v878_v62 }
 0x154   :  { %v940_v19 = vadd.f32 %v11403_v43, %v905_v2  ;;  %v962_v3 = vmax.f32 %v938_v63, 0.0 }
 0x155   :  { %v941_v42 = vadd.f32 %v11408_v56, %v906_v50  ;;  %v737_v0 = vpop.f32.mrb[44].mxu0  ;;  %v830_v20 = vpop.f32.mrb[44].mxu1  ;;  %v963_v44 = vmax.f32 %v939_v57, 0.0 }
 0x156   :  { %v964_v4 = vmax.f32 %v940_v19, 0.0  ;;  %v879_v7 = vmax.f32 %v11373_v8, %v737_v0  ;;  %v881_v5 = vmax.f32 %v11375_v11, %v830_v20  ;;  %v739_v16 = vpop.f32.mrb[45].mxu0  ;;  %v832_v6 = vpop.f32.mrb[45].mxu1 }
 0x157   :  { %v965_v24 = vmax.f32 %v941_v42, 0.0  ;;  %v880_v23 = vmax.f32 %v11377_v12, %v739_v16  ;;  %v882_v27 = vmax.f32 %v11379_v15, %v832_v6  ;;  %v741_v48 = vpop.f32.mrb[46].mxu0  ;;  %v834_v49 = vpop.f32.mrb[46].mxu1 }
 0x158   :  { %v11486_v33 = vpack.c.bf16 %v964_v4, %v962_v3  ;;  %v907_v38 = vmax.f32 %v879_v7, %v881_v5  ;;  %v883_v32 = vmax.f32 %v11383_v21, %v741_v48  ;;  %v885_v25 = vmax.f32 %v11385_v22, %v834_v49  ;;  %v743_v8 = vpop.f32.mrb[47].mxu0  ;;  %v836_v52 = vpop.f32.mrb[47].mxu1 }
 0x159   :  { %v11490_v11 = vpack.c.bf16 %v965_v24, %v963_v44  ;;  %v908_v53 = vmax.f32 %v880_v23, %v882_v27  ;;  %v884_v41 = vmax.f32 %v14638_v9, %v743_v8  ;;  %v886_v12 = vmax.f32 %v14639_v10, %v836_v52 }
 0x15a   :  { %14636 = vst [vmem:[#allocation14_spill] sm:$0xff] %v11486_v33  ;;  %v942_v15 = vadd.f32 %v11403_v43, %v907_v38  ;;  %v909_v29 = vmax.f32 %v883_v32, %v885_v25 }
 0x15b   :  { %14637 = vst [vmem:[#allocation15_spill] sm:$0xff] %v11490_v11  ;;  %v943_v54 = vadd.f32 %v11408_v56, %v908_v53  ;;  %v910_v30 = vmax.f32 %v884_v41, %v886_v12 }
 0x15c   :  { %v944_v55 = vadd.f32 %v11403_v43, %v909_v29  ;;  %v966_v21 = vmax.f32 %v942_v15, 0.0 }
 0x15d   :  { %v945_v22 = vadd.f32 %v11408_v56, %v910_v30  ;;  %v11498_v46 = vpop.f32.mrb[48].mxu0  ;;  %v11500_v28 = vpop.f32.mrb[48].mxu1  ;;  %v967_v35 = vmax.f32 %v943_v54, 0.0 }
 0x15e   :  { %v968_v13 = vmax.f32 %v944_v55, 0.0  ;;  %v11502_v14 = vpop.f32.mrb[49].mxu0  ;;  %v11504_v34 = vpop.f32.mrb[49].mxu1 }
 0x15f   :  { %v969_v1 = vmax.f32 %v945_v22, 0.0  ;;  %v11506_v40 = vpop.f32.mrb[50].mxu0  ;;  %v11508_v17 = vpop.f32.mrb[50].mxu1 }
 0x160   :  { %v11510_v58 = vpack.c.bf16 %v968_v13, %v966_v21  ;;  %v11512_v36 = vpop.f32.mrb[51].mxu0  ;;  %v11514_v18 = vpop.f32.mrb[51].mxu1 }
 0x161   :  { %v11516_v37 = vpack.c.bf16 %v969_v1, %v967_v35 }
 0x162   :  { %14640 = vst [vmem:[#allocation3_spill] sm:$0xff] %v11510_v58 }
 0x163   :  { %14641 = vst [vmem:[#allocation4_spill] sm:$0xff] %v11516_v37 }
 0x165   :  { %v11518_v62 = vpop.f32.mrb[52].mxu0  ;;  %v11520_v63 = vpop.f32.mrb[52].mxu1 }
 0x166   :  { %v11522_v2 = vpop.f32.mrb[53].mxu0  ;;  %v11524_v57 = vpop.f32.mrb[53].mxu1 }
 0x167   :  { %v11526_v50 = vpop.f32.mrb[54].mxu0  ;;  %v11528_v19 = vpop.f32.mrb[54].mxu1 }
 0x168   :  { %v11530_v42 = vpop.f32.mrb[55].mxu0  ;;  %v11532_v0 = vpop.f32.mrb[55].mxu1 }
 0x16d   :  { %v11534_v20 = vpop.f32.mrb[56].mxu0  ;;  %v11536_v3 = vpop.f32.mrb[56].mxu1 }
 0x16e   :  { %v11538_v4 = vpop.f32.mrb[57].mxu0  ;;  %v11540_v7 = vpop.f32.mrb[57].mxu1 }
 0x16f   :  { %v11542_v5 = vpop.f32.mrb[58].mxu0  ;;  %v11544_v16 = vpop.f32.mrb[58].mxu1 }
 0x170   :  { %v11546_v6 = vpop.f32.mrb[59].mxu0  ;;  %v11548_v44 = vpop.f32.mrb[59].mxu1 }
 0x175   :  { %v11550_v24 = vpop.f32.mrb[60].mxu0  ;;  %v11552_v23 = vpop.f32.mrb[60].mxu1 }
 0x176   :  { %v11554_v27 = vpop.f32.mrb[61].mxu0  ;;  %v11556_v48 = vpop.f32.mrb[61].mxu1 }
 0x177   :  { %v11558_v49 = vpop.f32.mrb[62].mxu0  ;;  %v11560_v38 = vpop.f32.mrb[62].mxu1 }
 0x178   :  { %v11562_v32 = vpop.f32.mrb[63].mxu0  ;;  %v11564_v25 = vpop.f32.mrb[63].mxu1 }
 0x17d   :  { %v11566_v8 = vpop.f32.mrb[64].mxu0  ;;  %v11568_v52 = vpop.f32.mrb[64].mxu1 }
 0x17e   :  { %v11570_v53 = vpop.f32.mrb[65].mxu0  ;;  %v11572_v9 = vpop.f32.mrb[65].mxu1 }
 0x17f   :  { %v11574_v41 = vpop.f32.mrb[66].mxu0  ;;  %v11576_v10 = vpop.f32.mrb[66].mxu1 }
 0x180   :  { %v11578_v12 = vpop.f32.mrb[67].mxu0  ;;  %v11580_v15 = vpop.f32.mrb[67].mxu1 }
 0x185   :  { %v11582_v29 = vpop.f32.mrb[68].mxu0  ;;  %v11584_v54 = vpop.f32.mrb[68].mxu1 }
 0x186   :  { %v11586_v30 = vpop.f32.mrb[69].mxu0  ;;  %v11588_v55 = vpop.f32.mrb[69].mxu1 }
 0x187   :  { %v11590_v21 = vpop.f32.mrb[70].mxu0  ;;  %v11592_v22 = vpop.f32.mrb[70].mxu1 }
 0x188   :  { %14642 = vst [vmem:[#allocation16_spill] sm:$0xff] %v11592_v22  ;;  %v11594_v13 = vpop.f32.mrb[71].mxu0  ;;  %v11596_v35 = vpop.f32.mrb[71].mxu1 }
 0x189   :  { %14643 = vst [vmem:[#allocation17_spill] sm:$0xff] %v11594_v13  ;;  %14644 = vst [vmem:[#allocation18_spill] sm:$0xff] %v11596_v35 }
 0x18d   :  { %v1346_v1 = vpop.f32.mrb[72].mxu0  ;;  %v1439_v31 = vpop.f32.mrb[72].mxu1 }
 0x18e   :  { %v1498_v58 = vmax.f32 %v11498_v46, %v1346_v1  ;;  %v1500_v37 = vmax.f32 %v11500_v28, %v1439_v31  ;;  %v1348_v33 = vpop.f32.mrb[73].mxu0  ;;  %v1441_v11 = vpop.f32.mrb[73].mxu1 }
 0x18f   :  { %v1499_v39 = vmax.f32 %v11502_v14, %v1348_v33  ;;  %v1501_v59 = vmax.f32 %v11504_v34, %v1441_v11  ;;  %v1350_v51 = vpop.f32.mrb[74].mxu0  ;;  %v1443_v45 = vpop.f32.mrb[74].mxu1 }
 0x190   :  { %v1546_v60 = vmax.f32 %v1498_v58, %v1500_v37  ;;  %v1502_v26 = vmax.f32 %v11506_v40, %v1350_v51  ;;  %v1504_v61 = vmax.f32 %v11508_v17, %v1443_v45  ;;  %v1352_v35 = vpop.f32.mrb[75].mxu0  ;;  %v1445_v13 = vpop.f32.mrb[75].mxu1 }
 0x191   :  { %v1547_v22 = vmax.f32 %v1499_v39, %v1501_v59  ;;  %v1503_v46 = vmax.f32 %v11512_v36, %v1352_v35  ;;  %v1505_v31 = vmax.f32 %v11514_v18, %v1445_v13 }
 0x192   :  { %v1570_v28 = vadd.f32 %v1546_v60, %v11403_v43  ;;  %v1548_v1 = vmax.f32 %v1502_v26, %v1504_v61 }
 0x193   :  { %v1571_v33 = vadd.f32 %v1547_v22, %v11408_v56  ;;  %v1549_v11 = vmax.f32 %v1503_v46, %v1505_v31 }
 0x194   :  { %v1572_v14 = vadd.f32 %v1548_v1, %v11403_v43  ;;  %v1594_v45 = vmax.f32 %v1570_v28, 0.0 }
 0x195   :  { %v1573_v34 = vadd.f32 %v1549_v11, %v11408_v56  ;;  %v1356_v51 = vpop.f32.mrb[76].mxu0  ;;  %v1449_v40 = vpop.f32.mrb[76].mxu1  ;;  %v1595_v18 = vmax.f32 %v1571_v33, 0.0  ;;  %v9368_v11 = vld [vmem:[%s14599_s3 + $0x8] ss:$16 sps:$4 sm:$0xff]  }
 0x196   :  { %v1596_v17 = vmax.f32 %v1572_v14, 0.0  ;;  %v1506_v39 = vmax.f32 %v11518_v62, %v1356_v51  ;;  %v1508_v59 = vmax.f32 %v11520_v63, %v1449_v40  ;;  %v1358_v58 = vpop.f32.mrb[77].mxu0  ;;  %v1451_v36 = vpop.f32.mrb[77].mxu1  ;;  %v9373_v14 = vld [vmem:[%s14599_s3 + $0x24] ss:$16 sps:$4 sm:$0xff]  }
 0x197   :  { %v1597_v60 = vmax.f32 %v1573_v34, 0.0  ;;  %v1507_v61 = vmax.f32 %v11522_v2, %v1358_v58  ;;  %v1509_v26 = vmax.f32 %v11524_v57, %v1451_v36  ;;  %v1360_v37 = vpop.f32.mrb[78].mxu0  ;;  %v1453_v22 = vpop.f32.mrb[78].mxu1  ;;  %v9365_v57 = vld [vmem:[%s14599_s3] ss:$16 sps:$4 sm:$0xff]  }
 0x198   :  { %v11614_v13 = vpack.c.bf16 %v1596_v17, %v1594_v45  ;;  %v1550_v35 = vmax.f32 %v1506_v39, %v1508_v59  ;;  %v1510_v46 = vmax.f32 %v11526_v50, %v1360_v37  ;;  %v1512_v31 = vmax.f32 %v11528_v19, %v1453_v22  ;;  %v1362_v62 = vpop.f32.mrb[79].mxu0  ;;  %v1455_v28 = vpop.f32.mrb[79].mxu1  ;;  %v9371_v39 = vld [vmem:[%s14599_s3 + $0x20] ss:$16 sps:$4 sm:$0xff]   ;;  %v9374_v59 = vld [vmem:[%s14599_s3 + $0x28] ss:$16 sps:$4 sm:$0xff]  }
 0x199   :  { %v11618_v63 = vpack.c.bf16 %v1597_v60, %v1595_v18  ;;  %v1551_v1 = vmax.f32 %v1507_v61, %v1509_v26  ;;  %v1511_v33 = vmax.f32 %v11530_v42, %v1362_v62  ;;  %v1513_v2 = vmax.f32 %v11532_v0, %v1455_v28  ;;  %v9376_v42 = vld [vmem:[%s14599_s3 + $0x2c] ss:$16 sps:$4 sm:$0xff]   ;;  %v9379_v37 = vld [vmem:[%s14599_s3 + $0x44] ss:$16 sps:$4 sm:$0xff]  }
 0x19a   :  { %v1574_v50 = vadd.f32 %v1550_v35, %v11403_v43  ;;  %v1552_v19 = vmax.f32 %v1510_v46, %v1512_v31 }
 0x19b   :  { %v1575_v0 = vadd.f32 %v1551_v1, %v11408_v56  ;;  %v1553_v34 = vmax.f32 %v1511_v33, %v1513_v2  ;;  %2112 = vmatprep.mubr.bf16.mxu0 %v11618_v63  ;;  %2185 = vmatprep.mubr.bf16.mxu1 %v11618_v63 }
 0x19c   :  { %v1576_v51 = vadd.f32 %v1552_v19, %v11403_v43  ;;  %2113 = vmatmul.mubr.bf16.vlgmr.msra.gmra.mrb[96].mxu0 %v11614_v13  ;;  %2186 = vmatmul.mubr.bf16.vlgmr.msra.gmra.mrb[96].mxu1 %v11614_v13  ;;  %v1598_v58 = vmax.f32 %v1574_v50, 0.0 }
 0x19d   :  { %v1577_v40 = vadd.f32 %v1553_v34, %v11408_v56  ;;  %2547 = vmatpush1.bf16.msra.mxu0 %v9365_v57  ;;  %2620 = vmatpush1.bf16.msra.mxu1 %v9368_v11  ;;  %v1366_v45 = vpop.f32.mrb[80].mxu0  ;;  %v1459_v17 = vpop.f32.mrb[80].mxu1  ;;  %v1599_v22 = vmax.f32 %v1575_v0, 0.0  ;;  %v9382_v11 = vld [vmem:[%s14599_s3 + $0x4c] ss:$16 sps:$4 sm:$0xff]  }
 0x19e   :  { %v1600_v36 = vmax.f32 %v1576_v51, 0.0  ;;  %v1514_v18 = vmax.f32 %v11534_v20, %v1366_v45  ;;  %v1516_v60 = vmax.f32 %v11536_v3, %v1459_v17  ;;  %v1368_v61 = vpop.f32.mrb[81].mxu0  ;;  %v1461_v26 = vpop.f32.mrb[81].mxu1  ;;  %2548 = vmatprep.subr.bf16.mxu0 %v9373_v14  ;;  %2621 = vmatprep.subr.bf16.mxu1 %v9376_v42  ;;  %v9380_v42 = vld [vmem:[%s14599_s3 + $0x48] ss:$16 sps:$4 sm:$0xff]  }
 0x19f   :  { %v1601_v35 = vmax.f32 %v1577_v40, 0.0  ;;  %v1515_v46 = vmax.f32 %v11538_v4, %v1368_v61  ;;  %v1517_v31 = vmax.f32 %v11540_v7, %v1461_v26  ;;  %v1370_v62 = vpop.f32.mrb[82].mxu0  ;;  %v1463_v28 = vpop.f32.mrb[82].mxu1  ;;  %v9388_v34 = vld [vmem:[%s14599_s3 + $0x6c] ss:$16 sps:$4 sm:$0xff]  }
 0x1a0   :  { %v11655_v1 = vpack.c.bf16 %v1600_v36, %v1598_v58  ;;  %v1554_v20 = vmax.f32 %v1514_v18, %v1516_v60  ;;  %v1518_v3 = vmax.f32 %v11542_v5, %v1370_v62  ;;  %v1520_v33 = vmax.f32 %v11544_v16, %v1463_v28  ;;  %v1372_v2 = vpop.f32.mrb[83].mxu0  ;;  %v1465_v57 = vpop.f32.mrb[83].mxu1  ;;  %v9377_v5 = vld [vmem:[%s14599_s3 + $0x40] ss:$16 sps:$4 sm:$0xff]  }
 0x1a1   :  { %v11662_v50 = vpack.c.bf16 %v1601_v35, %v1599_v22  ;;  %v1555_v4 = vmax.f32 %v1515_v46, %v1517_v31  ;;  %v1519_v7 = vmax.f32 %v11546_v6, %v1372_v2  ;;  %v1521_v19 = vmax.f32 %v11548_v44, %v1465_v57  ;;  %2549 = vmatpush1.bf16.msra.mxu0 %v9371_v39  ;;  %v9385_v6 = vld [vmem:[%s14599_s3 + $0x64] ss:$16 sps:$4 sm:$0xff]   ;;  %v9383_v39 = vld [vmem:[%s14599_s3 + $0x60] ss:$16 sps:$4 sm:$0xff]   ;;  %v9394_v57 = vld [vmem:[%s14599_s3 + $0x8c] ss:$16 sps:$4 sm:$0xff]  }
 0x1a2   :  { %v1578_v16 = vadd.f32 %v1554_v20, %v11403_v43  ;;  %v1556_v14 = vmax.f32 %v1518_v3, %v1520_v33  ;;  %2622 = vmatpush1.bf16.msra.mxu1 %v9374_v59  ;;  %2550 = vmatprep.subr.bf16.mxu0 %v9379_v37  ;;  %v9386_v59 = vld [vmem:[%s14599_s3 + $0x68] ss:$16 sps:$4 sm:$0xff]   ;;  %v9391_v37 = vld [vmem:[%s14599_s3 + $0x84] ss:$16 sps:$4 sm:$0xff]  }
 0x1a3   :  { %v1579_v44 = vadd.f32 %v1555_v4, %v11408_v56  ;;  %v1557_v0 = vmax.f32 %v1519_v7, %v1521_v19  ;;  %2122 = vmatprep.mubr.bf16.mxu0 %v11662_v50  ;;  %2195 = vmatprep.mubr.bf16.mxu1 %v11662_v50  ;;  %v9392_v19 = vld [vmem:[%s14599_s3 + $0x88] ss:$16 sps:$4 sm:$0xff]  }
 0x1a4   :  { %v1580_v51 = vadd.f32 %v1556_v14, %v11403_v43  ;;  %2623 = vmatprep.subr.bf16.mxu1 %v9382_v11  ;;  %2123 = vmatmul.mubr.bf16.gmra.mrb[100].mxu0 %v11655_v1  ;;  %v1602_v58 = vmax.f32 %v1578_v16, 0.0  ;;  %v9400_v16 = vld [vmem:[%s14599_s3 + $0xac] ss:$16 sps:$4 sm:$0xff]  }
 0x1a5   :  { %v1581_v40 = vadd.f32 %v1557_v0, %v11408_v56  ;;  %2196 = vmatmul.mubr.bf16.gmra.mrb[100].mxu1 %v11655_v1  ;;  %2551 = vmatpush1.bf16.msra.mxu0 %v9377_v5  ;;  %v1376_v45 = vpop.f32.mrb[84].mxu0  ;;  %v1469_v17 = vpop.f32.mrb[84].mxu1  ;;  %v1603_v22 = vmax.f32 %v1579_v44, 0.0  ;;  %v9395_v0 = vld [vmem:[%s14599_s3 + $0xa0] ss:$16 sps:$4 sm:$0xff]  }
 0x1a6   :  { %v1604_v36 = vmax.f32 %v1580_v51, 0.0  ;;  %2624 = vmatpush1.bf16.msra.mxu1 %v9380_v42  ;;  %v1522_v18 = vmax.f32 %v11550_v24, %v1376_v45  ;;  %v1524_v60 = vmax.f32 %v11552_v23, %v1469_v17  ;;  %v1378_v61 = vpop.f32.mrb[85].mxu0  ;;  %v1471_v26 = vpop.f32.mrb[85].mxu1  ;;  %2552 = vmatprep.subr.bf16.mxu0 %v9385_v6 }
 0x1a7   :  { %v1605_v35 = vmax.f32 %v1581_v40, 0.0  ;;  %v1523_v46 = vmax.f32 %v11554_v27, %v1378_v61  ;;  %v1525_v31 = vmax.f32 %v11556_v48, %v1471_v26  ;;  %v1380_v62 = vpop.f32.mrb[86].mxu0  ;;  %v1473_v28 = vpop.f32.mrb[86].mxu1  ;;  %2625 = vmatprep.subr.bf16.mxu1 %v9388_v34  ;;  %v9398_v34 = vld [vmem:[%s14599_s3 + $0xa8] ss:$16 sps:$4 sm:$0xff]  }
 0x1a8   :  { %v11699_v20 = vpack.c.bf16 %v1604_v36, %v1602_v58  ;;  %v1558_v24 = vmax.f32 %v1522_v18, %v1524_v60  ;;  %v1526_v23 = vmax.f32 %v11558_v49, %v1380_v62  ;;  %v1528_v3 = vmax.f32 %v11560_v38, %v1473_v28  ;;  %v1382_v33 = vpop.f32.mrb[87].mxu0  ;;  %v1475_v2 = vpop.f32.mrb[87].mxu1  ;;  %v9389_v49 = vld [vmem:[%s14599_s3 + $0x80] ss:$16 sps:$4 sm:$0xff]   ;;  %v9403_v58 = vld [vmem:[%s14599_s3 + $0xc4] ss:$16 sps:$4 sm:$0xff]  }
 0x1a9   :  { %v11706_v11 = vpack.c.bf16 %v1605_v35, %v1603_v22  ;;  %v1559_v27 = vmax.f32 %v1523_v46, %v1525_v31  ;;  %v1527_v48 = vmax.f32 %v11562_v32, %v1382_v33  ;;  %v1529_v4 = vmax.f32 %v11564_v25, %v1475_v2  ;;  %2553 = vmatpush1.bf16.msra.mxu0 %v9383_v39  ;;  %v9397_v32 = vld [vmem:[%s14599_s3 + $0xa4] ss:$16 sps:$4 sm:$0xff]   ;;  %v9406_v62 = vld [vmem:[%s14599_s3 + $0xcc] ss:$16 sps:$4 sm:$0xff]  }
 0x1aa   :  { %v1582_v38 = vadd.f32 %v1558_v24, %v11403_v43  ;;  %v1560_v7 = vmax.f32 %v1526_v23, %v1528_v3  ;;  %2626 = vmatpush1.bf16.msra.mxu1 %v9386_v59  ;;  %2554 = vmatprep.subr.bf16.mxu0 %v9391_v37  ;;  %v9404_v3 = vld [vmem:[%s14599_s3 + $0xc8] ss:$16 sps:$4 sm:$0xff]  }
 0x1ab   :  { %v1583_v25 = vadd.f32 %v1559_v27, %v11408_v56  ;;  %v1561_v5 = vmax.f32 %v1527_v48, %v1529_v4  ;;  %2132 = vmatprep.mubr.bf16.mxu0 %v11706_v11  ;;  %2205 = vmatprep.mubr.bf16.mxu1 %v11706_v11 }
 0x1ac   :  { %v1584_v14 = vadd.f32 %v1560_v7, %v11403_v43  ;;  %2627 = vmatprep.subr.bf16.mxu1 %v9394_v57  ;;  %2133 = vmatmul.mubr.bf16.gmra.mrb[104].mxu0 %v11699_v20  ;;  %v1606_v51 = vmax.f32 %v1582_v38, 0.0  ;;  %v9412_v57 = vld [vmem:[%s14599_s3 + $0xec] ss:$16 sps:$4 sm:$0xff]   ;;  %v9410_v38 = vld [vmem:[%s14599_s3 + $0xe8] ss:$16 sps:$4 sm:$0xff]  }
 0x1ad   :  { %v1585_v42 = vadd.f32 %v1561_v5, %v11408_v56  ;;  %2206 = vmatmul.mubr.bf16.gmra.mrb[104].mxu1 %v11699_v20  ;;  %2555 = vmatpush1.bf16.msra.mxu0 %v9389_v49  ;;  %v1386_v6 = vpop.f32.mrb[88].mxu0  ;;  %v1479_v44 = vpop.f32.mrb[88].mxu1  ;;  %v1607_v36 = vmax.f32 %v1583_v25, 0.0  ;;  %v9407_v49 = vld [vmem:[%s14599_s3 + $0xe0] ss:$16 sps:$4 sm:$0xff]  }
 0x1ae   :  { %v1608_v40 = vmax.f32 %v1584_v14, 0.0  ;;  %2628 = vmatpush1.bf16.msra.mxu1 %v9392_v19  ;;  %v1530_v45 = vmax.f32 %v11566_v8, %v1386_v6  ;;  %v1532_v17 = vmax.f32 %v11568_v52, %v1479_v44  ;;  %v1388_v39 = vpop.f32.mrb[89].mxu0  ;;  %v1481_v59 = vpop.f32.mrb[89].mxu1  ;;  %2556 = vmatprep.subr.bf16.mxu0 %v9397_v32  ;;  %v9415_v14 = vld [vmem:[%s14599_s3 + $0x104] ss:$16 sps:$4 sm:$0xff]  }
 0x1af   :  { %v1609_v18 = vmax.f32 %v1585_v42, 0.0  ;;  %v1531_v60 = vmax.f32 %v11570_v53, %v1388_v39  ;;  %v1533_v61 = vmax.f32 %v11572_v9, %v1481_v59  ;;  %v1390_v26 = vpop.f32.mrb[90].mxu0  ;;  %v1483_v37 = vpop.f32.mrb[90].mxu1  ;;  %2629 = vmatprep.subr.bf16.mxu1 %v9400_v16 }
 0x1b0   :  { %v11743_v22 = vpack.c.bf16 %v1608_v40, %v1606_v51  ;;  %v1562_v8 = vmax.f32 %v1530_v45, %v1532_v17  ;;  %v1534_v52 = vmax.f32 %v11574_v41, %v1390_v26  ;;  %v1536_v35 = vmax.f32 %v11576_v10, %v1483_v37  ;;  %v1392_v46 = vpop.f32.mrb[91].mxu0  ;;  %v1485_v31 = vpop.f32.mrb[91].mxu1  ;;  %v9401_v41 = vld [vmem:[%s14599_s3 + $0xc0] ss:$16 sps:$4 sm:$0xff]   ;;  %v9416_v37 = vld [vmem:[%s14599_s3 + $0x108] ss:$16 sps:$4 sm:$0xff]  }
 0x1b1   :  { %v11750_v28 = vpack.c.bf16 %v1609_v18, %v1607_v36  ;;  %v1563_v53 = vmax.f32 %v1531_v60, %v1533_v61  ;;  %v1535_v9 = vmax.f32 %v11578_v12, %v1392_v46  ;;  %v1537_v24 = vmax.f32 %v11580_v15, %v1485_v31  ;;  %2557 = vmatpush1.bf16.msra.mxu0 %v9395_v0  ;;  %v9409_v12 = vld [vmem:[%s14599_s3 + $0xe4] ss:$16 sps:$4 sm:$0xff]   ;;  %v9413_v61 = vld [vmem:[%s14599_s3 + $0x100] ss:$16 sps:$4 sm:$0xff]   ;;  %v9424_v46 = vld [vmem:[%s14599_s3 + $0x12c] ss:$16 sps:$4 sm:$0xff]  }
 0x1b2   :  { %v1586_v10 = vadd.f32 %v1562_v8, %v11403_v43  ;;  %v1564_v23 = vmax.f32 %v1534_v52, %v1536_v35  ;;  %2630 = vmatpush1.bf16.msra.mxu1 %v9398_v34  ;;  %2558 = vmatprep.subr.bf16.mxu0 %v9403_v58  ;;  %v14645_v17 = vld [vmem:[#allocation16_spill] sm:$0xff]  ;;  %v14646_v58 = vld [vmem:[#allocation17_spill] sm:$0xff]  ;;  %v14647_v18 = vld [vmem:[#allocation18_spill] sm:$0xff] }
 0x1b3   :  { %v1587_v33 = vadd.f32 %v1563_v53, %v11408_v56  ;;  %v1565_v2 = vmax.f32 %v1535_v9, %v1537_v24  ;;  %2142 = vmatprep.mubr.bf16.mxu0 %v11750_v28  ;;  %2215 = vmatprep.mubr.bf16.mxu1 %v11750_v28  ;;  %v9421_v8 = vld [vmem:[%s14599_s3 + $0x124] ss:$16 sps:$4 sm:$0xff]   ;;  %v9419_v53 = vld [vmem:[%s14599_s3 + $0x120] ss:$16 sps:$4 sm:$0xff]  }
 0x1b4   :  { %v1588_v15 = vadd.f32 %v1564_v23, %v11403_v43  ;;  %2631 = vmatprep.subr.bf16.mxu1 %v9406_v62  ;;  %2143 = vmatmul.mubr.bf16.gmra.mrb[108].mxu0 %v11743_v22  ;;  %v1610_v7 = vmax.f32 %v1586_v10, 0.0  ;;  %v9427_v10 = vld [vmem:[%s14599_s3 + $0x144] ss:$16 sps:$4 sm:$0xff]  }
 0x1b5   :  { %v1589_v27 = vadd.f32 %v1565_v2, %v11408_v56  ;;  %2216 = vmatmul.mubr.bf16.gmra.mrb[108].mxu1 %v11743_v22  ;;  %2559 = vmatpush1.bf16.msra.mxu0 %v9401_v41  ;;  %v1396_v48 = vpop.f32.mrb[92].mxu0  ;;  %v1489_v4 = vpop.f32.mrb[92].mxu1  ;;  %v1611_v42 = vmax.f32 %v1587_v33, 0.0  ;;  %v9422_v41 = vld [vmem:[%s14599_s3 + $0x128] ss:$16 sps:$4 sm:$0xff]  }
 0x1b6   :  { %v1612_v19 = vmax.f32 %v1588_v15, 0.0  ;;  %2632 = vmatpush1.bf16.msra.mxu1 %v9404_v3  ;;  %v1538_v32 = vmax.f32 %v11582_v29, %v1396_v48  ;;  %v1540_v25 = vmax.f32 %v11584_v54, %v1489_v4  ;;  %2578 = vmatprep.mubr.bf16.mxu0 %v11428_v47  ;;  %v1398_v5 = vpop.f32.mrb[93].mxu0  ;;  %v1491_v16 = vpop.f32.mrb[93].mxu1  ;;  %v9418_v54 = vld [vmem:[%s14599_s3 + $0x10c] ss:$16 sps:$4 sm:$0xff]  }
 0x1b7   :  { %v1613_v6 = vmax.f32 %v1589_v27, 0.0  ;;  %2651 = vmatprep.mubr.bf16.mxu1 %v11428_v47  ;;  %v1539_v44 = vmax.f32 %v11586_v30, %v1398_v5  ;;  %v1541_v0 = vmax.f32 %v11588_v55, %v1491_v16  ;;  %v1400_v34 = vpop.f32.mrb[94].mxu0  ;;  %v1493_v29 = vpop.f32.mrb[94].mxu1  ;;  %2560 = vmatprep.subr.bf16.mxu0 %v9409_v12  ;;  %v9425_v33 = vld [vmem:[%s14599_s3 + $0x140] ss:$16 sps:$4 sm:$0xff]  }
 0x1b8   :  { %v11792_v51 = vpack.c.bf16 %v1612_v19, %v1610_v7  ;;  %v1566_v40 = vmax.f32 %v1538_v32, %v1540_v25  ;;  %v1542_v45 = vmax.f32 %v11590_v21, %v1400_v34  ;;  %v1544_v39 = vmax.f32 %v14645_v17, %v1493_v29  ;;  %2633 = vmatprep.subr.bf16.mxu1 %v9412_v57  ;;  %v1402_v47 = vpop.f32.mrb[95].mxu0  ;;  %v1495_v59 = vpop.f32.mrb[95].mxu1  ;;  %v9428_v12 = vld [vmem:[%s14599_s3 + $0x148] ss:$16 sps:$4 sm:$0xff]   ;;  %v9433_v15 = vld [vmem:[%s14599_s3 + $0x164] ss:$16 sps:$4 sm:$0xff]  }
 0x1b9   :  { %v11796_v30 = vpack.c.bf16 %v1613_v6, %v1611_v42  ;;  %v1567_v55 = vmax.f32 %v1539_v44, %v1541_v0  ;;  %v1543_v36 = vmax.f32 %v14646_v58, %v1402_v47  ;;  %v1545_v60 = vmax.f32 %v14647_v18, %v1495_v59  ;;  %2561 = vmatpush1.bf16.msra.mxu0 %v9407_v49  ;;  %v9436_v57 = vld [vmem:[%s14599_s3 + $0x16c] ss:$16 sps:$4 sm:$0xff]   ;;  %v9431_v27 = vld [vmem:[%s14599_s3 + $0x160] ss:$16 sps:$4 sm:$0xff]   ;;  %v9434_v48 = vld [vmem:[%s14599_s3 + $0x168] ss:$16 sps:$4 sm:$0xff]  }
 0x1ba   :  { %v1590_v26 = vadd.f32 %v1566_v40, %v11403_v43  ;;  %v1568_v21 = vmax.f32 %v1542_v45, %v1544_v39  ;;  %2634 = vmatpush1.bf16.msra.mxu1 %v9410_v38  ;;  %2562 = vmatprep.subr.bf16.mxu0 %v9415_v14  ;;  %v9439_v4 = vld [vmem:[%s14599_s3 + $0x184] ss:$16 sps:$4 sm:$0xff]   ;;  %v9442_v49 = vld [vmem:[%s14599_s3 + $0x18c] ss:$16 sps:$4 sm:$0xff]   ;;  %v9437_v38 = vld [vmem:[%s14599_s3 + $0x180] ss:$16 sps:$4 sm:$0xff]  }
 0x1bb   :  { %v1591_v52 = vadd.f32 %v1567_v55, %v11408_v56  ;;  %v1569_v35 = vmax.f32 %v1543_v36, %v1545_v60  ;;  %2635 = vmatprep.subr.bf16.mxu1 %v9418_v54  ;;  %v9440_v7 = vld [vmem:[%s14599_s3 + $0x188] ss:$16 sps:$4 sm:$0xff]   ;;  %v9445_v19 = vld [vmem:[%s14599_s3 + $0x1a4] ss:$16 sps:$4 sm:$0xff]   ;;  %v9448_v32 = vld [vmem:[%s14599_s3 + $0x1ac] ss:$16 sps:$4 sm:$0xff]  }
 0x1bc   :  { %v1592_v31 = vadd.f32 %v1568_v21, %v11403_v43  ;;  %v1614_v9 = vmax.f32 %v1590_v26, 0.0  ;;  %v9443_v25 = vld [vmem:[%s14599_s3 + $0x1a0] ss:$16 sps:$4 sm:$0xff]   ;;  %v9446_v5 = vld [vmem:[%s14599_s3 + $0x1a8] ss:$16 sps:$4 sm:$0xff]  }
 0x1bd   :  { %v1593_v62 = vadd.f32 %v1569_v35, %v11408_v56  ;;  %2563 = vmatpush1.bf16.msra.mxu0 %v9413_v61  ;;  %v1615_v43 = vmax.f32 %v1591_v52, 0.0  ;;  %v9430_v56 = vld [vmem:[%s14599_s3 + $0x14c] ss:$16 sps:$4 sm:$0xff]   ;;  %v9451_v16 = vld [vmem:[%s14599_s3 + $0x1c4] ss:$16 sps:$4 sm:$0xff]  }
 0x1be   :  { %v1616_v24 = vmax.f32 %v1592_v31, 0.0  ;;  %2636 = vmatpush1.bf16.msra.mxu1 %v9416_v37  ;;  %2564 = vmatprep.subr.bf16.mxu0 %v9421_v8  ;;  %v9454_v14 = vld [vmem:[%s14599_s3 + $0x1cc] ss:$16 sps:$4 sm:$0xff]   ;;  %v9449_v42 = vld [vmem:[%s14599_s3 + $0x1c0] ss:$16 sps:$4 sm:$0xff]  }
 0x1bf   :  { %v1617_v23 = vmax.f32 %v1593_v62, 0.0  ;;  %2637 = vmatprep.subr.bf16.mxu1 %v9424_v46  ;;  %v9452_v6 = vld [vmem:[%s14599_s3 + $0x1c8] ss:$16 sps:$4 sm:$0xff]   ;;  %v9457_v44 = vld [vmem:[%s14599_s3 + $0x1e4] ss:$16 sps:$4 sm:$0xff]  }
 0x1c0   :  { %v11828_v3 = vpack.c.bf16 %v1616_v24, %v1614_v9  ;;  %v9460_v0 = vld [vmem:[%s14599_s3 + $0x1ec] ss:$16 sps:$4 sm:$0xff]   ;;  %v9455_v34 = vld [vmem:[%s14599_s3 + $0x1e0] ss:$16 sps:$4 sm:$0xff]   ;;  %v9458_v29 = vld [vmem:[%s14599_s3 + $0x1e8] ss:$16 sps:$4 sm:$0xff]  }
 0x1c1   :  { %2565 = vmatpush1.bf16.msra.mxu0 %v9419_v53  ;;  %v11833_v2 = vpack.c.bf16 %v1617_v23, %v1615_v43  ;;  %v9463_v54 = vld [vmem:[%s14599_s3 + $0x404] ss:$16 sps:$4 sm:$0xff]   ;;  %v9466_v40 = vld [vmem:[%s14599_s3 + $0x40c] ss:$16 sps:$4 sm:$0xff]   ;;  %v9461_v45 = vld [vmem:[%s14599_s3 + $0x400] ss:$16 sps:$4 sm:$0xff]  }
 0x1c2   :  { %2638 = vmatpush1.bf16.msra.mxu1 %v9422_v41  ;;  %2566 = vmatprep.subr.bf16.mxu0 %v9427_v10  ;;  %v9464_v17 = vld [vmem:[%s14599_s3 + $0x408] ss:$16 sps:$4 sm:$0xff]   ;;  %v9469_v39 = vld [vmem:[%s14599_s3 + $0x424] ss:$16 sps:$4 sm:$0xff]   ;;  %v9472_v59 = vld [vmem:[%s14599_s3 + $0x42c] ss:$16 sps:$4 sm:$0xff]  }
 0x1c3   :  { %2639 = vmatprep.subr.bf16.mxu1 %v9430_v56  ;;  %v14648_v47 = vld [vmem:[#allocation7_spill] sm:$0xff]  ;;  %v14649_v55 = vld [vmem:[#allocation9_spill] sm:$0xff]  ;;  %v9467_v58 = vld [vmem:[%s14599_s3 + $0x420] ss:$16 sps:$4 sm:$0xff]  }
 0x1c4   :  { %v9470_v36 = vld [vmem:[%s14599_s3 + $0x428] ss:$16 sps:$4 sm:$0xff]   ;;  %v9475_v18 = vld [vmem:[%s14599_s3 + $0x444] ss:$16 sps:$4 sm:$0xff]   ;;  %v9478_v60 = vld [vmem:[%s14599_s3 + $0x44c] ss:$16 sps:$4 sm:$0xff]  }
 0x1c5   :  { %2567 = vmatpush1.bf16.msra.mxu0 %v9425_v33  ;;  %v9473_v61 = vld [vmem:[%s14599_s3 + $0x440] ss:$16 sps:$4 sm:$0xff]   ;;  %v9476_v26 = vld [vmem:[%s14599_s3 + $0x448] ss:$16 sps:$4 sm:$0xff]   ;;  %v9481_v21 = vld [vmem:[%s14599_s3 + $0x464] ss:$16 sps:$4 sm:$0xff]  }
 0x1c6   :  { %2640 = vmatpush1.bf16.msra.mxu1 %v9428_v12  ;;  %2568 = vmatprep.subr.bf16.mxu0 %v9433_v15  ;;  %v14650_v37 = vld [vmem:[#allocation8_spill] sm:$0xff]  ;;  %v9484_v8 = vld [vmem:[%s14599_s3 + $0x46c] ss:$16 sps:$4 sm:$0xff]   ;;  %v9482_v46 = vld [vmem:[%s14599_s3 + $0x468] ss:$16 sps:$4 sm:$0xff]  }
 0x1c7   :  { %2641 = vmatprep.subr.bf16.mxu1 %v9436_v57  ;;  %v14651_v52 = vld [vmem:[#allocation11_spill] sm:$0xff]  ;;  %v9479_v35 = vld [vmem:[%s14599_s3 + $0x460] ss:$16 sps:$4 sm:$0xff]   ;;  %v9487_v31 = vld [vmem:[%s14599_s3 + $0x484] ss:$16 sps:$4 sm:$0xff]  }
 0x1c8   :  { %v9490_v62 = vld [vmem:[%s14599_s3 + $0x48c] ss:$16 sps:$4 sm:$0xff]   ;;  %v9485_v53 = vld [vmem:[%s14599_s3 + $0x480] ss:$16 sps:$4 sm:$0xff]   ;;  %v9488_v9 = vld [vmem:[%s14599_s3 + $0x488] ss:$16 sps:$4 sm:$0xff]  }
 0x1c9   :  { %2569 = vmatpush1.bf16.msra.mxu0 %v9431_v27  ;;  %v9493_v24 = vld [vmem:[%s14599_s3 + $0x4a4] ss:$16 sps:$4 sm:$0xff]   ;;  %v9496_v10 = vld [vmem:[%s14599_s3 + $0x4ac] ss:$16 sps:$4 sm:$0xff]   ;;  %v9491_v23 = vld [vmem:[%s14599_s3 + $0x4a0] ss:$16 sps:$4 sm:$0xff]  }
 0x1ca   :  { %2642 = vmatpush1.bf16.msra.mxu1 %v9434_v48  ;;  %2570 = vmatprep.subr.bf16.mxu0 %v9439_v4  ;;  %v14652_v41 = vld [vmem:[#allocation10_spill] sm:$0xff]  ;;  %v14653_v43 = vld [vmem:[#allocation13_spill] sm:$0xff]  ;;  %v14654_v48 = vld [vmem:[#allocation12_spill] sm:$0xff] }
 0x1cb   :  { %2643 = vmatprep.subr.bf16.mxu1 %v9442_v49  ;;  %v9494_v56 = vld [vmem:[%s14599_s3 + $0x4a8] ss:$16 sps:$4 sm:$0xff]   ;;  %v9499_v33 = vld [vmem:[%s14599_s3 + $0x4c4] ss:$16 sps:$4 sm:$0xff]   ;;  %v9502_v12 = vld [vmem:[%s14599_s3 + $0x4cc] ss:$16 sps:$4 sm:$0xff]  }
 0x1cc   :  { %v9497_v15 = vld [vmem:[%s14599_s3 + $0x4c0] ss:$16 sps:$4 sm:$0xff]   ;;  %v9500_v57 = vld [vmem:[%s14599_s3 + $0x4c8] ss:$16 sps:$4 sm:$0xff]   ;;  %v9505_v27 = vld [vmem:[%s14599_s3 + $0x4e4] ss:$16 sps:$4 sm:$0xff]  }
 0x1cd   :  { %2571 = vmatpush1.bf16.msra.mxu0 %v9437_v38  ;;  %v9508_v4 = vld [vmem:[%s14599_s3 + $0x4ec] ss:$16 sps:$4 sm:$0xff]   ;;  %v9503_v49 = vld [vmem:[%s14599_s3 + $0x4e0] ss:$16 sps:$4 sm:$0xff]   ;;  %v9506_v38 = vld [vmem:[%s14599_s3 + $0x4e8] ss:$16 sps:$4 sm:$0xff]  }
 0x1ce   :  { %2644 = vmatpush1.bf16.msra.mxu1 %v9440_v7  ;;  %2572 = vmatprep.subr.bf16.mxu0 %v9445_v19  ;;  %v9511_v7 = vld [vmem:[%s14599_s3 + $0x504] ss:$16 sps:$4 sm:$0xff]   ;;  %v9514_v19 = vld [vmem:[%s14599_s3 + $0x50c] ss:$16 sps:$4 sm:$0xff]  }
 0x1cf   :  { %2645 = vmatprep.subr.bf16.mxu1 %v9448_v32  ;;  %v9509_v32 = vld [vmem:[%s14599_s3 + $0x500] ss:$16 sps:$4 sm:$0xff]  }
 0x1d1   :  { %2573 = vmatpush1.bf16.msra.mxu0 %v9443_v25  ;;  %v9512_v25 = vld [vmem:[%s14599_s3 + $0x508] ss:$16 sps:$4 sm:$0xff]  }
 0x1d2   :  { %2646 = vmatpush1.bf16.msra.mxu1 %v9446_v5  ;;  %2574 = vmatprep.subr.bf16.mxu0 %v9451_v16  ;;  %v9517_v5 = vld [vmem:[%s14599_s3 + $0x524] ss:$16 sps:$4 sm:$0xff]   ;;  %v9520_v16 = vld [vmem:[%s14599_s3 + $0x52c] ss:$16 sps:$4 sm:$0xff]  }
 0x1d3   :  { %2647 = vmatprep.subr.bf16.mxu1 %v9454_v14  ;;  %v9515_v14 = vld [vmem:[%s14599_s3 + $0x520] ss:$16 sps:$4 sm:$0xff]  }
 0x1d5   :  { %2575 = vmatpush1.bf16.msra.mxu0 %v9449_v42  ;;  %v9518_v42 = vld [vmem:[%s14599_s3 + $0x528] ss:$16 sps:$4 sm:$0xff]  }
 0x1d6   :  { %2648 = vmatpush1.bf16.msra.mxu1 %v9452_v6  ;;  %2576 = vmatprep.subr.bf16.mxu0 %v9457_v44  ;;  %v9523_v6 = vld [vmem:[%s14599_s3 + $0x544] ss:$16 sps:$4 sm:$0xff]   ;;  %v9526_v44 = vld [vmem:[%s14599_s3 + $0x54c] ss:$16 sps:$4 sm:$0xff]  }
 0x1d7   :  { %2649 = vmatprep.subr.bf16.mxu1 %v9460_v0  ;;  %v9521_v0 = vld [vmem:[%s14599_s3 + $0x540] ss:$16 sps:$4 sm:$0xff]  }
 0x1d9   :  { %2577 = vmatpush1.bf16.msra.mxu0 %v9455_v34  ;;  %v9524_v34 = vld [vmem:[%s14599_s3 + $0x548] ss:$16 sps:$4 sm:$0xff]  }
 0x1da   :  { %2650 = vmatpush1.bf16.msra.mxu1 %v9458_v29  ;;  %3077 = vmatprep.subr.bf16.mxu0 %v9463_v54  ;;  %v9529_v29 = vld [vmem:[%s14599_s3 + $0x564] ss:$16 sps:$4 sm:$0xff]   ;;  %v9532_v54 = vld [vmem:[%s14599_s3 + $0x56c] ss:$16 sps:$4 sm:$0xff]  }
 0x1db   :  { %3150 = vmatprep.subr.bf16.mxu1 %v9466_v40  ;;  %v9527_v40 = vld [vmem:[%s14599_s3 + $0x560] ss:$16 sps:$4 sm:$0xff]  }
 0x1dc   :  { %2579 = vmatmul.mubr.bf16.vlgmr.msra.gmra.mrb[96].mxu0 %v14648_v47 }
 0x1dd   :  { %2652 = vmatmul.mubr.bf16.vlgmr.msra.gmra.mrb[96].mxu1 %v14648_v47  ;;  %2588 = vmatprep.mubr.bf16.mxu0 %v14649_v55  ;;  %v9533_v47 = vld [vmem:[%s14599_s3 + $0x580] ss:$16 sps:$4 sm:$0xff]  }
 0x1de   :  { %2661 = vmatprep.mubr.bf16.mxu1 %v14649_v55  ;;  %3078 = vmatpush1.bf16.msra.mxu0 %v9461_v45  ;;  %v9530_v45 = vld [vmem:[%s14599_s3 + $0x568] ss:$16 sps:$4 sm:$0xff]  }
 0x1df   :  { %3151 = vmatpush1.bf16.msra.mxu1 %v9464_v17  ;;  %3079 = vmatprep.subr.bf16.mxu0 %v9469_v39  ;;  %v9535_v17 = vld [vmem:[%s14599_s3 + $0x584] ss:$16 sps:$4 sm:$0xff]   ;;  %v9538_v39 = vld [vmem:[%s14599_s3 + $0x58c] ss:$16 sps:$4 sm:$0xff]  }
 0x1e0   :  { %3152 = vmatprep.subr.bf16.mxu1 %v9472_v59  ;;  %v9536_v59 = vld [vmem:[%s14599_s3 + $0x588] ss:$16 sps:$4 sm:$0xff]  }
 0x1e2   :  { %3080 = vmatpush1.bf16.msra.mxu0 %v9467_v58  ;;  %v9541_v58 = vld [vmem:[%s14599_s3 + $0x5a4] ss:$16 sps:$4 sm:$0xff]  }
 0x1e3   :  { %3153 = vmatpush1.bf16.msra.mxu1 %v9470_v36  ;;  %3081 = vmatprep.subr.bf16.mxu0 %v9475_v18  ;;  %v9544_v36 = vld [vmem:[%s14599_s3 + $0x5ac] ss:$16 sps:$4 sm:$0xff]   ;;  %v9539_v18 = vld [vmem:[%s14599_s3 + $0x5a0] ss:$16 sps:$4 sm:$0xff]  }
 0x1e4   :  { %2589 = vmatmul.mubr.bf16.gmra.mrb[100].mxu0 %v14650_v37  ;;  %3154 = vmatprep.subr.bf16.mxu1 %v9478_v60  ;;  %v9542_v60 = vld [vmem:[%s14599_s3 + $0x5a8] ss:$16 sps:$4 sm:$0xff]  }
 0x1e5   :  { %2662 = vmatmul.mubr.bf16.gmra.mrb[100].mxu1 %v14650_v37  ;;  %2598 = vmatprep.mubr.bf16.mxu0 %v14651_v52 }
 0x1e6   :  { %2671 = vmatprep.mubr.bf16.mxu1 %v14651_v52  ;;  %3082 = vmatpush1.bf16.msra.mxu0 %v9473_v61  ;;  %v9547_v61 = vld [vmem:[%s14599_s3 + $0x5c4] ss:$16 sps:$4 sm:$0xff]  }
 0x1e7   :  { %3155 = vmatpush1.bf16.msra.mxu1 %v9476_v26  ;;  %3083 = vmatprep.subr.bf16.mxu0 %v9481_v21  ;;  %v9550_v26 = vld [vmem:[%s14599_s3 + $0x5cc] ss:$16 sps:$4 sm:$0xff]   ;;  %v9545_v21 = vld [vmem:[%s14599_s3 + $0x5c0] ss:$16 sps:$4 sm:$0xff]  }
 0x1e8   :  { %3156 = vmatprep.subr.bf16.mxu1 %v9484_v8  ;;  %v9548_v8 = vld [vmem:[%s14599_s3 + $0x5c8] ss:$16 sps:$4 sm:$0xff]  }
 0x1ea   :  { %3084 = vmatpush1.bf16.msra.mxu0 %v9479_v35  ;;  %v9553_v35 = vld [vmem:[%s14599_s3 + $0x5e4] ss:$16 sps:$4 sm:$0xff]  }
 0x1eb   :  { %3157 = vmatpush1.bf16.msra.mxu1 %v9482_v46  ;;  %3085 = vmatprep.subr.bf16.mxu0 %v9487_v31  ;;  %v9556_v46 = vld [vmem:[%s14599_s3 + $0x5ec] ss:$16 sps:$4 sm:$0xff]   ;;  %v9551_v31 = vld [vmem:[%s14599_s3 + $0x5e0] ss:$16 sps:$4 sm:$0xff]  }
 0x1ec   :  { %2599 = vmatmul.mubr.bf16.gmra.mrb[104].mxu0 %v14652_v41  ;;  %3158 = vmatprep.subr.bf16.mxu1 %v9490_v62  ;;  %v9554_v62 = vld [vmem:[%s14599_s3 + $0x5e8] ss:$16 sps:$4 sm:$0xff]  }
 0x1ed   :  { %2672 = vmatmul.mubr.bf16.gmra.mrb[104].mxu1 %v14652_v41  ;;  %2608 = vmatprep.mubr.bf16.mxu0 %v14653_v43 }
 0x1ee   :  { %2681 = vmatprep.mubr.bf16.mxu1 %v14653_v43  ;;  %3086 = vmatpush1.bf16.msra.mxu0 %v9485_v53  ;;  %v9559_v53 = vld [vmem:[%s14599_s3 + $0x604] ss:$16 sps:$4 sm:$0xff]  }
 0x1ef   :  { %3159 = vmatpush1.bf16.msra.mxu1 %v9488_v9  ;;  %3087 = vmatprep.subr.bf16.mxu0 %v9493_v24  ;;  %v9562_v9 = vld [vmem:[%s14599_s3 + $0x60c] ss:$16 sps:$4 sm:$0xff]   ;;  %v9557_v24 = vld [vmem:[%s14599_s3 + $0x600] ss:$16 sps:$4 sm:$0xff]  }
 0x1f0   :  { %3160 = vmatprep.subr.bf16.mxu1 %v9496_v10  ;;  %v9560_v10 = vld [vmem:[%s14599_s3 + $0x608] ss:$16 sps:$4 sm:$0xff]  }
 0x1f2   :  { %3088 = vmatpush1.bf16.msra.mxu0 %v9491_v23  ;;  %v9565_v23 = vld [vmem:[%s14599_s3 + $0x624] ss:$16 sps:$4 sm:$0xff]  }
 0x1f3   :  { %3161 = vmatpush1.bf16.msra.mxu1 %v9494_v56  ;;  %3089 = vmatprep.subr.bf16.mxu0 %v9499_v33  ;;  %v9568_v56 = vld [vmem:[%s14599_s3 + $0x62c] ss:$16 sps:$4 sm:$0xff]   ;;  %v9563_v33 = vld [vmem:[%s14599_s3 + $0x620] ss:$16 sps:$4 sm:$0xff]  }
 0x1f4   :  { %2609 = vmatmul.mubr.bf16.gmra.mrb[108].mxu0 %v14654_v48  ;;  %3162 = vmatprep.subr.bf16.mxu1 %v9502_v12  ;;  %v9566_v12 = vld [vmem:[%s14599_s3 + $0x628] ss:$16 sps:$4 sm:$0xff]  }
 0x1f5   :  { %2682 = vmatmul.mubr.bf16.gmra.mrb[108].mxu1 %v14654_v48  ;;  %3109 = vmatprep.mubr.bf16.mxu0 %v14649_v55 }
 0x1f6   :  { %3090 = vmatpush1.bf16.msra.mxu0 %v9497_v15  ;;  %3182 = vmatprep.mubr.bf16.mxu1 %v14649_v55  ;;  %v9571_v15 = vld [vmem:[%s14599_s3 + $0x644] ss:$16 sps:$4 sm:$0xff]  }
 0x1f7   :  { %3163 = vmatpush1.bf16.msra.mxu1 %v9500_v57  ;;  %3091 = vmatprep.subr.bf16.mxu0 %v9505_v27  ;;  %v9574_v57 = vld [vmem:[%s14599_s3 + $0x64c] ss:$16 sps:$4 sm:$0xff]   ;;  %v9569_v27 = vld [vmem:[%s14599_s3 + $0x640] ss:$16 sps:$4 sm:$0xff]  }
 0x1f8   :  { %3164 = vmatprep.subr.bf16.mxu1 %v9508_v4  ;;  %v9572_v4 = vld [vmem:[%s14599_s3 + $0x648] ss:$16 sps:$4 sm:$0xff]  }
 0x1fa   :  { %3092 = vmatpush1.bf16.msra.mxu0 %v9503_v49  ;;  %v9577_v49 = vld [vmem:[%s14599_s3 + $0x664] ss:$16 sps:$4 sm:$0xff]  }
 0x1fb   :  { %3165 = vmatpush1.bf16.msra.mxu1 %v9506_v38  ;;  %3093 = vmatprep.subr.bf16.mxu0 %v9511_v7  ;;  %v9580_v38 = vld [vmem:[%s14599_s3 + $0x66c] ss:$16 sps:$4 sm:$0xff]   ;;  %v9575_v7 = vld [vmem:[%s14599_s3 + $0x660] ss:$16 sps:$4 sm:$0xff]  }
 0x1fc   :  { %3166 = vmatprep.subr.bf16.mxu1 %v9514_v19  ;;  %v9578_v19 = vld [vmem:[%s14599_s3 + $0x668] ss:$16 sps:$4 sm:$0xff]  }
 0x1fe   :  { %3094 = vmatpush1.bf16.msra.mxu0 %v9509_v32  ;;  %v9583_v32 = vld [vmem:[%s14599_s3 + $0x684] ss:$16 sps:$4 sm:$0xff]  }
 0x1ff   :  { %3167 = vmatpush1.bf16.msra.mxu1 %v9512_v25  ;;  %3095 = vmatprep.subr.bf16.mxu0 %v9517_v5  ;;  %v9586_v25 = vld [vmem:[%s14599_s3 + $0x68c] ss:$16 sps:$4 sm:$0xff]   ;;  %v9581_v5 = vld [vmem:[%s14599_s3 + $0x680] ss:$16 sps:$4 sm:$0xff]  }
 0x200   :  { %3168 = vmatprep.subr.bf16.mxu1 %v9520_v16  ;;  %v9584_v16 = vld [vmem:[%s14599_s3 + $0x688] ss:$16 sps:$4 sm:$0xff]  }
 0x202   :  { %3096 = vmatpush1.bf16.msra.mxu0 %v9515_v14  ;;  %v9589_v14 = vld [vmem:[%s14599_s3 + $0x6a4] ss:$16 sps:$4 sm:$0xff]  }
 0x203   :  { %3169 = vmatpush1.bf16.msra.mxu1 %v9518_v42  ;;  %3097 = vmatprep.subr.bf16.mxu0 %v9523_v6  ;;  %v9592_v42 = vld [vmem:[%s14599_s3 + $0x6ac] ss:$16 sps:$4 sm:$0xff]  }
 0x204   :  { %3170 = vmatprep.subr.bf16.mxu1 %v9526_v44  ;;  %v14655_v6 = vld [vmem:[#allocation15_spill] sm:$0xff]  ;;  %v9587_v44 = vld [vmem:[%s14599_s3 + $0x6a0] ss:$16 sps:$4 sm:$0xff]  }
 0x206   :  { %3098 = vmatpush1.bf16.msra.mxu0 %v9521_v0  ;;  %v9590_v0 = vld [vmem:[%s14599_s3 + $0x6a8] ss:$16 sps:$4 sm:$0xff]  }
 0x207   :  { %3171 = vmatpush1.bf16.msra.mxu1 %v9524_v34  ;;  %3099 = vmatprep.subr.bf16.mxu0 %v9529_v29  ;;  %v9595_v34 = vld [vmem:[%s14599_s3 + $0x6c4] ss:$16 sps:$4 sm:$0xff]   ;;  %v9598_v29 = vld [vmem:[%s14599_s3 + $0x6cc] ss:$16 sps:$4 sm:$0xff]  }
 0x208   :  { %3172 = vmatprep.subr.bf16.mxu1 %v9532_v54  ;;  %v9593_v54 = vld [vmem:[%s14599_s3 + $0x6c0] ss:$16 sps:$4 sm:$0xff]  }
 0x20a   :  { %3100 = vmatpush1.bf16.msra.mxu0 %v9527_v40  ;;  %v9596_v40 = vld [vmem:[%s14599_s3 + $0x6c8] ss:$16 sps:$4 sm:$0xff]  }
 0x20b   :  { %3173 = vmatpush1.bf16.msra.mxu1 %v9530_v45  ;;  %3101 = vmatprep.subr.bf16.mxu0 %v9535_v17  ;;  %v9601_v45 = vld [vmem:[%s14599_s3 + $0x6e4] ss:$16 sps:$4 sm:$0xff]  }
 0x20c   :  { %3174 = vmatprep.subr.bf16.mxu1 %v9538_v39  ;;  %v14656_v17 = vld [vmem:[#allocation14_spill] sm:$0xff]  ;;  %v9604_v39 = vld [vmem:[%s14599_s3 + $0x6ec] ss:$16 sps:$4 sm:$0xff]  }
 0x20e   :  { %3102 = vmatpush1.bf16.msra.mxu0 %v9533_v47  ;;  %v9599_v47 = vld [vmem:[%s14599_s3 + $0x6e0] ss:$16 sps:$4 sm:$0xff]  }
 0x20f   :  { %3175 = vmatpush1.bf16.msra.mxu1 %v9536_v59  ;;  %3103 = vmatprep.subr.bf16.mxu0 %v9541_v58  ;;  %v9602_v59 = vld [vmem:[%s14599_s3 + $0x6e8] ss:$16 sps:$4 sm:$0xff]   ;;  %v9607_v58 = vld [vmem:[%s14599_s3 + $0x704] ss:$16 sps:$4 sm:$0xff]  }
 0x210   :  { %3176 = vmatprep.subr.bf16.mxu1 %v9544_v36  ;;  %v9610_v36 = vld [vmem:[%s14599_s3 + $0x70c] ss:$16 sps:$4 sm:$0xff]  }
 0x212   :  { %3104 = vmatpush1.bf16.msra.mxu0 %v9539_v18  ;;  %v9605_v18 = vld [vmem:[%s14599_s3 + $0x700] ss:$16 sps:$4 sm:$0xff]  }
 0x213   :  { %3177 = vmatpush1.bf16.msra.mxu1 %v9542_v60  ;;  %3105 = vmatprep.subr.bf16.mxu0 %v9547_v61  ;;  %v9608_v60 = vld [vmem:[%s14599_s3 + $0x708] ss:$16 sps:$4 sm:$0xff]   ;;  %v9613_v61 = vld [vmem:[%s14599_s3 + $0x724] ss:$16 sps:$4 sm:$0xff]  }
 0x214   :  { %3178 = vmatprep.subr.bf16.mxu1 %v9550_v26  ;;  %v9616_v26 = vld [vmem:[%s14599_s3 + $0x72c] ss:$16 sps:$4 sm:$0xff]  }
 0x216   :  { %3106 = vmatpush1.bf16.msra.mxu0 %v9545_v21  ;;  %v9611_v21 = vld [vmem:[%s14599_s3 + $0x720] ss:$16 sps:$4 sm:$0xff]  }
 0x217   :  { %3179 = vmatpush1.bf16.msra.mxu1 %v9548_v8  ;;  %3107 = vmatprep.subr.bf16.mxu0 %v9553_v35  ;;  %v9614_v8 = vld [vmem:[%s14599_s3 + $0x728] ss:$16 sps:$4 sm:$0xff]   ;;  %v9619_v35 = vld [vmem:[%s14599_s3 + $0x744] ss:$16 sps:$4 sm:$0xff]  }
 0x218   :  { %3180 = vmatprep.subr.bf16.mxu1 %v9556_v46  ;;  %v9622_v46 = vld [vmem:[%s14599_s3 + $0x74c] ss:$16 sps:$4 sm:$0xff]  }
 0x21a   :  { %3108 = vmatpush1.bf16.msra.mxu0 %v9551_v31  ;;  %v9617_v31 = vld [vmem:[%s14599_s3 + $0x740] ss:$16 sps:$4 sm:$0xff]  }
 0x21b   :  { %3181 = vmatpush1.bf16.msra.mxu1 %v9554_v62  ;;  %3640 = vmatprep.subr.bf16.mxu0 %v9559_v53  ;;  %v9620_v62 = vld [vmem:[%s14599_s3 + $0x748] ss:$16 sps:$4 sm:$0xff]   ;;  %v9625_v53 = vld [vmem:[%s14599_s3 + $0x764] ss:$16 sps:$4 sm:$0xff]  }
 0x21c   :  { %3713 = vmatprep.subr.bf16.mxu1 %v9562_v9  ;;  %v9628_v9 = vld [vmem:[%s14599_s3 + $0x76c] ss:$16 sps:$4 sm:$0xff]  }
 0x21d   :  { %3110 = vmatmul.mubr.bf16.vlgmr.msra.gmra.mrb[96].mxu0 %v14650_v37 }
 0x21e   :  { %3183 = vmatmul.mubr.bf16.vlgmr.msra.gmra.mrb[96].mxu1 %v14650_v37  ;;  %3119 = vmatprep.mubr.bf16.mxu0 %v14651_v52 }
 0x21f   :  { %3192 = vmatprep.mubr.bf16.mxu1 %v14651_v52  ;;  %3641 = vmatpush1.bf16.msra.mxu0 %v9557_v24  ;;  %v9623_v24 = vld [vmem:[%s14599_s3 + $0x760] ss:$16 sps:$4 sm:$0xff]  }
 0x220   :  { %3714 = vmatpush1.bf16.msra.mxu1 %v9560_v10  ;;  %3642 = vmatprep.subr.bf16.mxu0 %v9565_v23  ;;  %v9626_v10 = vld [vmem:[%s14599_s3 + $0x768] ss:$16 sps:$4 sm:$0xff]   ;;  %v9631_v23 = vld [vmem:[%s14599_s3 + $0x784] ss:$16 sps:$4 sm:$0xff]  }
 0x221   :  { %3715 = vmatprep.subr.bf16.mxu1 %v9568_v56  ;;  %v9634_v56 = vld [vmem:[%s14599_s3 + $0x78c] ss:$16 sps:$4 sm:$0xff]  }
 0x223   :  { %3643 = vmatpush1.bf16.msra.mxu0 %v9563_v33  ;;  %v9629_v33 = vld [vmem:[%s14599_s3 + $0x780] ss:$16 sps:$4 sm:$0xff]  }
 0x224   :  { %3716 = vmatpush1.bf16.msra.mxu1 %v9566_v12  ;;  %3644 = vmatprep.subr.bf16.mxu0 %v9571_v15  ;;  %v9632_v12 = vld [vmem:[%s14599_s3 + $0x788] ss:$16 sps:$4 sm:$0xff]   ;;  %v9637_v15 = vld [vmem:[%s14599_s3 + $0x7a4] ss:$16 sps:$4 sm:$0xff]  }
 0x225   :  { %3120 = vmatmul.mubr.bf16.gmra.mrb[100].mxu0 %v14652_v41  ;;  %3717 = vmatprep.subr.bf16.mxu1 %v9574_v57  ;;  %v9640_v57 = vld [vmem:[%s14599_s3 + $0x7ac] ss:$16 sps:$4 sm:$0xff]  }
 0x226   :  { %3193 = vmatmul.mubr.bf16.gmra.mrb[100].mxu1 %v14652_v41  ;;  %3129 = vmatprep.mubr.bf16.mxu0 %v14653_v43 }
 0x227   :  { %3202 = vmatprep.mubr.bf16.mxu1 %v14653_v43  ;;  %3645 = vmatpush1.bf16.msra.mxu0 %v9569_v27  ;;  %v9635_v27 = vld [vmem:[%s14599_s3 + $0x7a0] ss:$16 sps:$4 sm:$0xff]  }
 0x228   :  { %3718 = vmatpush1.bf16.msra.mxu1 %v9572_v4  ;;  %3646 = vmatprep.subr.bf16.mxu0 %v9577_v49  ;;  %v9638_v4 = vld [vmem:[%s14599_s3 + $0x7a8] ss:$16 sps:$4 sm:$0xff]   ;;  %v9643_v49 = vld [vmem:[%s14599_s3 + $0x7c4] ss:$16 sps:$4 sm:$0xff]  }
 0x229   :  { %3719 = vmatprep.subr.bf16.mxu1 %v9580_v38  ;;  %v9646_v38 = vld [vmem:[%s14599_s3 + $0x7cc] ss:$16 sps:$4 sm:$0xff]  }
 0x22b   :  { %3647 = vmatpush1.bf16.msra.mxu0 %v9575_v7  ;;  %v9641_v7 = vld [vmem:[%s14599_s3 + $0x7c0] ss:$16 sps:$4 sm:$0xff]  }
 0x22c   :  { %3720 = vmatpush1.bf16.msra.mxu1 %v9578_v19  ;;  %3648 = vmatprep.subr.bf16.mxu0 %v9583_v32  ;;  %v9644_v19 = vld [vmem:[%s14599_s3 + $0x7c8] ss:$16 sps:$4 sm:$0xff]   ;;  %v9649_v32 = vld [vmem:[%s14599_s3 + $0x7e4] ss:$16 sps:$4 sm:$0xff]  }
 0x22d   :  { %3130 = vmatmul.mubr.bf16.gmra.mrb[104].mxu0 %v14654_v48  ;;  %3721 = vmatprep.subr.bf16.mxu1 %v9586_v25  ;;  %v9652_v25 = vld [vmem:[%s14599_s3 + $0x7ec] ss:$16 sps:$4 sm:$0xff]  }
 0x22e   :  { %3203 = vmatmul.mubr.bf16.gmra.mrb[104].mxu1 %v14654_v48  ;;  %3139 = vmatprep.mubr.bf16.mxu0 %v14655_v6 }
 0x22f   :  { %3212 = vmatprep.mubr.bf16.mxu1 %v14655_v6  ;;  %3649 = vmatpush1.bf16.msra.mxu0 %v9581_v5  ;;  %v9647_v5 = vld [vmem:[%s14599_s3 + $0x7e0] ss:$16 sps:$4 sm:$0xff]  }
 0x230   :  { %3722 = vmatpush1.bf16.msra.mxu1 %v9584_v16  ;;  %3650 = vmatprep.subr.bf16.mxu0 %v9589_v14  ;;  %v9650_v16 = vld [vmem:[%s14599_s3 + $0x7e8] ss:$16 sps:$4 sm:$0xff]   ;;  %v9655_v14 = vld [vmem:[%s14599_s3 + $0x804] ss:$16 sps:$4 sm:$0xff]  }
 0x231   :  { %3723 = vmatprep.subr.bf16.mxu1 %v9592_v42  ;;  %v9658_v42 = vld [vmem:[%s14599_s3 + $0x80c] ss:$16 sps:$4 sm:$0xff]  }
 0x233   :  { %3651 = vmatpush1.bf16.msra.mxu0 %v9587_v44  ;;  %v9653_v44 = vld [vmem:[%s14599_s3 + $0x800] ss:$16 sps:$4 sm:$0xff]  }
 0x234   :  { %3724 = vmatpush1.bf16.msra.mxu1 %v9590_v0  ;;  %3652 = vmatprep.subr.bf16.mxu0 %v9595_v34  ;;  %v9656_v0 = vld [vmem:[%s14599_s3 + $0x808] ss:$16 sps:$4 sm:$0xff]   ;;  %v9661_v34 = vld [vmem:[%s14599_s3 + $0x824] ss:$16 sps:$4 sm:$0xff]  }
 0x235   :  { %3140 = vmatmul.mubr.bf16.gmra.mrb[108].mxu0 %v14656_v17  ;;  %3725 = vmatprep.subr.bf16.mxu1 %v9598_v29  ;;  %v9664_v29 = vld [vmem:[%s14599_s3 + $0x82c] ss:$16 sps:$4 sm:$0xff]  }
 0x236   :  { %3213 = vmatmul.mubr.bf16.gmra.mrb[108].mxu1 %v14656_v17  ;;  %3672 = vmatprep.mubr.bf16.mxu0 %v11662_v50 }
 0x237   :  { %3653 = vmatpush1.bf16.msra.mxu0 %v9593_v54  ;;  %3745 = vmatprep.mubr.bf16.mxu1 %v11662_v50  ;;  %v9659_v54 = vld [vmem:[%s14599_s3 + $0x820] ss:$16 sps:$4 sm:$0xff]  }
 0x238   :  { %3726 = vmatpush1.bf16.msra.mxu1 %v9596_v40  ;;  %3654 = vmatprep.subr.bf16.mxu0 %v9601_v45  ;;  %v9662_v40 = vld [vmem:[%s14599_s3 + $0x828] ss:$16 sps:$4 sm:$0xff]   ;;  %v9667_v45 = vld [vmem:[%s14599_s3 + $0x844] ss:$16 sps:$4 sm:$0xff]  }
 0x239   :  { %3727 = vmatprep.subr.bf16.mxu1 %v9604_v39  ;;  %v9670_v39 = vld [vmem:[%s14599_s3 + $0x84c] ss:$16 sps:$4 sm:$0xff]  }
 0x23b   :  { %3655 = vmatpush1.bf16.msra.mxu0 %v9599_v47  ;;  %v9665_v47 = vld [vmem:[%s14599_s3 + $0x840] ss:$16 sps:$4 sm:$0xff]  }
 0x23c   :  { %3728 = vmatpush1.bf16.msra.mxu1 %v9602_v59  ;;  %3656 = vmatprep.subr.bf16.mxu0 %v9607_v58  ;;  %v9668_v59 = vld [vmem:[%s14599_s3 + $0x848] ss:$16 sps:$4 sm:$0xff]   ;;  %v9673_v58 = vld [vmem:[%s14599_s3 + $0x864] ss:$16 sps:$4 sm:$0xff]  }
 0x23d   :  { %3729 = vmatprep.subr.bf16.mxu1 %v9610_v36  ;;  %v9676_v36 = vld [vmem:[%s14599_s3 + $0x86c] ss:$16 sps:$4 sm:$0xff]  }
 0x23f   :  { %3657 = vmatpush1.bf16.msra.mxu0 %v9605_v18  ;;  %v9671_v18 = vld [vmem:[%s14599_s3 + $0x860] ss:$16 sps:$4 sm:$0xff]  }
 0x240   :  { %3730 = vmatpush1.bf16.msra.mxu1 %v9608_v60  ;;  %3658 = vmatprep.subr.bf16.mxu0 %v9613_v61  ;;  %v9674_v60 = vld [vmem:[%s14599_s3 + $0x868] ss:$16 sps:$4 sm:$0xff]   ;;  %v9679_v61 = vld [vmem:[%s14599_s3 + $0x884] ss:$16 sps:$4 sm:$0xff]  }
 0x241   :  { %3731 = vmatprep.subr.bf16.mxu1 %v9616_v26  ;;  %v9682_v26 = vld [vmem:[%s14599_s3 + $0x88c] ss:$16 sps:$4 sm:$0xff]  }
 0x243   :  { %3659 = vmatpush1.bf16.msra.mxu0 %v9611_v21  ;;  %v9677_v21 = vld [vmem:[%s14599_s3 + $0x880] ss:$16 sps:$4 sm:$0xff]  }
 0x244   :  { %3732 = vmatpush1.bf16.msra.mxu1 %v9614_v8  ;;  %3660 = vmatprep.subr.bf16.mxu0 %v9619_v35  ;;  %v9680_v8 = vld [vmem:[%s14599_s3 + $0x888] ss:$16 sps:$4 sm:$0xff]   ;;  %v9685_v35 = vld [vmem:[%s14599_s3 + $0x8a4] ss:$16 sps:$4 sm:$0xff]  }
 0x245   :  { %3733 = vmatprep.subr.bf16.mxu1 %v9622_v46  ;;  %v9688_v46 = vld [vmem:[%s14599_s3 + $0x8ac] ss:$16 sps:$4 sm:$0xff]  }
 0x247   :  { %3661 = vmatpush1.bf16.msra.mxu0 %v9617_v31  ;;  %v9683_v31 = vld [vmem:[%s14599_s3 + $0x8a0] ss:$16 sps:$4 sm:$0xff]  }
 0x248   :  { %3734 = vmatpush1.bf16.msra.mxu1 %v9620_v62  ;;  %3662 = vmatprep.subr.bf16.mxu0 %v9625_v53  ;;  %v9686_v62 = vld [vmem:[%s14599_s3 + $0x8a8] ss:$16 sps:$4 sm:$0xff]   ;;  %v9691_v53 = vld [vmem:[%s14599_s3 + $0x8c4] ss:$16 sps:$4 sm:$0xff]  }
 0x249   :  { %3735 = vmatprep.subr.bf16.mxu1 %v9628_v9  ;;  %v9694_v9 = vld [vmem:[%s14599_s3 + $0x8cc] ss:$16 sps:$4 sm:$0xff]  }
 0x24b   :  { %3663 = vmatpush1.bf16.msra.mxu0 %v9623_v24  ;;  %v9689_v24 = vld [vmem:[%s14599_s3 + $0x8c0] ss:$16 sps:$4 sm:$0xff]  }
 0x24c   :  { %3736 = vmatpush1.bf16.msra.mxu1 %v9626_v10  ;;  %3664 = vmatprep.subr.bf16.mxu0 %v9631_v23  ;;  %v9692_v10 = vld [vmem:[%s14599_s3 + $0x8c8] ss:$16 sps:$4 sm:$0xff]   ;;  %v9697_v23 = vld [vmem:[%s14599_s3 + $0x8e4] ss:$16 sps:$4 sm:$0xff]  }
 0x24d   :  { %3737 = vmatprep.subr.bf16.mxu1 %v9634_v56  ;;  %v9700_v56 = vld [vmem:[%s14599_s3 + $0x8ec] ss:$16 sps:$4 sm:$0xff]  }
 0x24f   :  { %3665 = vmatpush1.bf16.msra.mxu0 %v9629_v33  ;;  %v9695_v33 = vld [vmem:[%s14599_s3 + $0x8e0] ss:$16 sps:$4 sm:$0xff]  }
 0x250   :  { %3738 = vmatpush1.bf16.msra.mxu1 %v9632_v12  ;;  %3666 = vmatprep.subr.bf16.mxu0 %v9637_v15  ;;  %v9698_v12 = vld [vmem:[%s14599_s3 + $0x8e8] ss:$16 sps:$4 sm:$0xff]   ;;  %v9703_v15 = vld [vmem:[%s14599_s3 + $0x904] ss:$16 sps:$4 sm:$0xff]  }
 0x251   :  { %3739 = vmatprep.subr.bf16.mxu1 %v9640_v57  ;;  %v9706_v57 = vld [vmem:[%s14599_s3 + $0x90c] ss:$16 sps:$4 sm:$0xff]  }
 0x253   :  { %3667 = vmatpush1.bf16.msra.mxu0 %v9635_v27  ;;  %v9701_v27 = vld [vmem:[%s14599_s3 + $0x900] ss:$16 sps:$4 sm:$0xff]  }
 0x254   :  { %3740 = vmatpush1.bf16.msra.mxu1 %v9638_v4  ;;  %3668 = vmatprep.subr.bf16.mxu0 %v9643_v49  ;;  %v9704_v4 = vld [vmem:[%s14599_s3 + $0x908] ss:$16 sps:$4 sm:$0xff]   ;;  %v9709_v49 = vld [vmem:[%s14599_s3 + $0x924] ss:$16 sps:$4 sm:$0xff]  }
 0x255   :  { %3741 = vmatprep.subr.bf16.mxu1 %v9646_v38  ;;  %v9712_v38 = vld [vmem:[%s14599_s3 + $0x92c] ss:$16 sps:$4 sm:$0xff]  }
 0x257   :  { %3669 = vmatpush1.bf16.msra.mxu0 %v9641_v7  ;;  %v9707_v7 = vld [vmem:[%s14599_s3 + $0x920] ss:$16 sps:$4 sm:$0xff]  }
 0x258   :  { %3742 = vmatpush1.bf16.msra.mxu1 %v9644_v19  ;;  %3670 = vmatprep.subr.bf16.mxu0 %v9649_v32  ;;  %v9710_v19 = vld [vmem:[%s14599_s3 + $0x928] ss:$16 sps:$4 sm:$0xff]   ;;  %v9715_v32 = vld [vmem:[%s14599_s3 + $0x944] ss:$16 sps:$4 sm:$0xff]  }
 0x259   :  { %3743 = vmatprep.subr.bf16.mxu1 %v9652_v25  ;;  %v9718_v25 = vld [vmem:[%s14599_s3 + $0x94c] ss:$16 sps:$4 sm:$0xff]  }
 0x25b   :  { %3671 = vmatpush1.bf16.msra.mxu0 %v9647_v5  ;;  %v9713_v5 = vld [vmem:[%s14599_s3 + $0x940] ss:$16 sps:$4 sm:$0xff]  }
 0x25c   :  { %3744 = vmatpush1.bf16.msra.mxu1 %v9650_v16  ;;  %4203 = vmatprep.subr.bf16.mxu0 %v9655_v14  ;;  %v9716_v16 = vld [vmem:[%s14599_s3 + $0x948] ss:$16 sps:$4 sm:$0xff]   ;;  %v9721_v14 = vld [vmem:[%s14599_s3 + $0x964] ss:$16 sps:$4 sm:$0xff]  }
 0x25d   :  { %4276 = vmatprep.subr.bf16.mxu1 %v9658_v42  ;;  %v9724_v42 = vld [vmem:[%s14599_s3 + $0x96c] ss:$16 sps:$4 sm:$0xff]  }
 0x25e   :  { %3673 = vmatmul.mubr.bf16.vlgmr.msra.gmra.mrb[96].mxu0 %v11655_v1 }
 0x25f   :  { %3746 = vmatmul.mubr.bf16.vlgmr.msra.gmra.mrb[96].mxu1 %v11655_v1  ;;  %3682 = vmatprep.mubr.bf16.mxu0 %v11706_v11 }
 0x260   :  { %3755 = vmatprep.mubr.bf16.mxu1 %v11706_v11  ;;  %4204 = vmatpush1.bf16.msra.mxu0 %v9653_v44  ;;  %v9719_v44 = vld [vmem:[%s14599_s3 + $0x960] ss:$16 sps:$4 sm:$0xff]  }
 0x261   :  { %4277 = vmatpush1.bf16.msra.mxu1 %v9656_v0  ;;  %4205 = vmatprep.subr.bf16.mxu0 %v9661_v34  ;;  %v9722_v0 = vld [vmem:[%s14599_s3 + $0x968] ss:$16 sps:$4 sm:$0xff]   ;;  %v9727_v34 = vld [vmem:[%s14599_s3 + $0x984] ss:$16 sps:$4 sm:$0xff]  }
 0x262   :  { %4278 = vmatprep.subr.bf16.mxu1 %v9664_v29  ;;  %v9730_v29 = vld [vmem:[%s14599_s3 + $0x98c] ss:$16 sps:$4 sm:$0xff]  }
 0x264   :  { %4206 = vmatpush1.bf16.msra.mxu0 %v9659_v54  ;;  %v9725_v54 = vld [vmem:[%s14599_s3 + $0x980] ss:$16 sps:$4 sm:$0xff]  }
 0x265   :  { %4279 = vmatpush1.bf16.msra.mxu1 %v9662_v40  ;;  %4207 = vmatprep.subr.bf16.mxu0 %v9667_v45  ;;  %v9728_v40 = vld [vmem:[%s14599_s3 + $0x988] ss:$16 sps:$4 sm:$0xff]   ;;  %v9733_v45 = vld [vmem:[%s14599_s3 + $0x9a4] ss:$16 sps:$4 sm:$0xff]  }
 0x266   :  { %3683 = vmatmul.mubr.bf16.gmra.mrb[100].mxu0 %v11699_v20  ;;  %4280 = vmatprep.subr.bf16.mxu1 %v9670_v39  ;;  %v9736_v39 = vld [vmem:[%s14599_s3 + $0x9ac] ss:$16 sps:$4 sm:$0xff]  }
 0x267   :  { %3756 = vmatmul.mubr.bf16.gmra.mrb[100].mxu1 %v11699_v20  ;;  %3692 = vmatprep.mubr.bf16.mxu0 %v11750_v28 }
 0x268   :  { %3765 = vmatprep.mubr.bf16.mxu1 %v11750_v28  ;;  %4208 = vmatpush1.bf16.msra.mxu0 %v9665_v47  ;;  %v9731_v47 = vld [vmem:[%s14599_s3 + $0x9a0] ss:$16 sps:$4 sm:$0xff]  }
 0x269   :  { %4281 = vmatpush1.bf16.msra.mxu1 %v9668_v59  ;;  %4209 = vmatprep.subr.bf16.mxu0 %v9673_v58  ;;  %v9734_v59 = vld [vmem:[%s14599_s3 + $0x9a8] ss:$16 sps:$4 sm:$0xff]   ;;  %v9739_v58 = vld [vmem:[%s14599_s3 + $0x9c4] ss:$16 sps:$4 sm:$0xff]  }
 0x26a   :  { %4282 = vmatprep.subr.bf16.mxu1 %v9676_v36  ;;  %v9742_v36 = vld [vmem:[%s14599_s3 + $0x9cc] ss:$16 sps:$4 sm:$0xff]  }
 0x26c   :  { %4210 = vmatpush1.bf16.msra.mxu0 %v9671_v18  ;;  %v9737_v18 = vld [vmem:[%s14599_s3 + $0x9c0] ss:$16 sps:$4 sm:$0xff]  }
 0x26d   :  { %4283 = vmatpush1.bf16.msra.mxu1 %v9674_v60  ;;  %4211 = vmatprep.subr.bf16.mxu0 %v9679_v61  ;;  %v9740_v60 = vld [vmem:[%s14599_s3 + $0x9c8] ss:$16 sps:$4 sm:$0xff]   ;;  %v9745_v61 = vld [vmem:[%s14599_s3 + $0x9e4] ss:$16 sps:$4 sm:$0xff]  }
 0x26e   :  { %3693 = vmatmul.mubr.bf16.gmra.mrb[104].mxu0 %v11743_v22  ;;  %4284 = vmatprep.subr.bf16.mxu1 %v9682_v26  ;;  %v9748_v26 = vld [vmem:[%s14599_s3 + $0x9ec] ss:$16 sps:$4 sm:$0xff]  }
 0x26f   :  { %3766 = vmatmul.mubr.bf16.gmra.mrb[104].mxu1 %v11743_v22  ;;  %3702 = vmatprep.mubr.bf16.mxu0 %v11796_v30 }
 0x270   :  { %3775 = vmatprep.mubr.bf16.mxu1 %v11796_v30  ;;  %4212 = vmatpush1.bf16.msra.mxu0 %v9677_v21  ;;  %v9743_v21 = vld [vmem:[%s14599_s3 + $0x9e0] ss:$16 sps:$4 sm:$0xff]  }
 0x271   :  { %4285 = vmatpush1.bf16.msra.mxu1 %v9680_v8  ;;  %4213 = vmatprep.subr.bf16.mxu0 %v9685_v35  ;;  %v9746_v8 = vld [vmem:[%s14599_s3 + $0x9e8] ss:$16 sps:$4 sm:$0xff]   ;;  %v10173_v35 = vld [vmem:[%s14599_s3 + $0x204] ss:$16 sps:$4 sm:$0xff]  }
 0x272   :  { %4286 = vmatprep.subr.bf16.mxu1 %v9688_v46  ;;  %v10174_v46 = vld [vmem:[%s14599_s3 + $0x20c] ss:$16 sps:$4 sm:$0xff]  }
 0x274   :  { %4214 = vmatpush1.bf16.msra.mxu0 %v9683_v31  ;;  %v10175_v31 = vld [vmem:[%s14599_s3 + $0x200] ss:$16 sps:$4 sm:$0xff]  }
 0x275   :  { %4287 = vmatpush1.bf16.msra.mxu1 %v9686_v62  ;;  %4215 = vmatprep.subr.bf16.mxu0 %v9691_v53  ;;  %v10176_v62 = vld [vmem:[%s14599_s3 + $0x208] ss:$16 sps:$4 sm:$0xff]   ;;  %v10177_v53 = vld [vmem:[%s14599_s3 + $0x224] ss:$16 sps:$4 sm:$0xff]  }
 0x276   :  { %3703 = vmatmul.mubr.bf16.gmra.mrb[108].mxu0 %v11792_v51  ;;  %4288 = vmatprep.subr.bf16.mxu1 %v9694_v9  ;;  %v10178_v9 = vld [vmem:[%s14599_s3 + $0x22c] ss:$16 sps:$4 sm:$0xff]  }
 0x277   :  { %3776 = vmatmul.mubr.bf16.gmra.mrb[108].mxu1 %v11792_v51  ;;  %4235 = vmatprep.mubr.bf16.mxu0 %v14651_v52 }
 0x278   :  { %4216 = vmatpush1.bf16.msra.mxu0 %v9689_v24  ;;  %4308 = vmatprep.mubr.bf16.mxu1 %v14651_v52  ;;  %v10179_v24 = vld [vmem:[%s14599_s3 + $0x220] ss:$16 sps:$4 sm:$0xff]  }
 0x279   :  { %4289 = vmatpush1.bf16.msra.mxu1 %v9692_v10  ;;  %4217 = vmatprep.subr.bf16.mxu0 %v9697_v23  ;;  %v10180_v10 = vld [vmem:[%s14599_s3 + $0x228] ss:$16 sps:$4 sm:$0xff]   ;;  %v10181_v23 = vld [vmem:[%s14599_s3 + $0x244] ss:$16 sps:$4 sm:$0xff]  }
 0x27a   :  { %4290 = vmatprep.subr.bf16.mxu1 %v9700_v56  ;;  %v10182_v56 = vld [vmem:[%s14599_s3 + $0x24c] ss:$16 sps:$4 sm:$0xff]  }
 0x27c   :  { %4218 = vmatpush1.bf16.msra.mxu0 %v9695_v33  ;;  %v10183_v33 = vld [vmem:[%s14599_s3 + $0x240] ss:$16 sps:$4 sm:$0xff]  }
 0x27d   :  { %4291 = vmatpush1.bf16.msra.mxu1 %v9698_v12  ;;  %4219 = vmatprep.subr.bf16.mxu0 %v9703_v15  ;;  %v10184_v12 = vld [vmem:[%s14599_s3 + $0x248] ss:$16 sps:$4 sm:$0xff]   ;;  %v10185_v15 = vld [vmem:[%s14599_s3 + $0x264] ss:$16 sps:$4 sm:$0xff]  }
 0x27e   :  { %4292 = vmatprep.subr.bf16.mxu1 %v9706_v57  ;;  %v10186_v57 = vld [vmem:[%s14599_s3 + $0x26c] ss:$16 sps:$4 sm:$0xff]  }
 0x280   :  { %4220 = vmatpush1.bf16.msra.mxu0 %v9701_v27  ;;  %v10187_v27 = vld [vmem:[%s14599_s3 + $0x260] ss:$16 sps:$4 sm:$0xff]  }
 0x281   :  { %4293 = vmatpush1.bf16.msra.mxu1 %v9704_v4  ;;  %4221 = vmatprep.subr.bf16.mxu0 %v9709_v49  ;;  %v10188_v4 = vld [vmem:[%s14599_s3 + $0x268] ss:$16 sps:$4 sm:$0xff]   ;;  %v10189_v49 = vld [vmem:[%s14599_s3 + $0x284] ss:$16 sps:$4 sm:$0xff]  }
 0x282   :  { %4294 = vmatprep.subr.bf16.mxu1 %v9712_v38  ;;  %v10190_v38 = vld [vmem:[%s14599_s3 + $0x28c] ss:$16 sps:$4 sm:$0xff]  }
 0x284   :  { %4222 = vmatpush1.bf16.msra.mxu0 %v9707_v7  ;;  %v14657_v7 = vld [vmem:[#allocation4_spill] sm:$0xff] }
 0x285   :  { %4295 = vmatpush1.bf16.msra.mxu1 %v9710_v19  ;;  %4223 = vmatprep.subr.bf16.mxu0 %v9715_v32  ;;  %v10191_v19 = vld [vmem:[%s14599_s3 + $0x280] ss:$16 sps:$4 sm:$0xff]   ;;  %v10192_v32 = vld [vmem:[%s14599_s3 + $0x288] ss:$16 sps:$4 sm:$0xff]  }
 0x286   :  { %4296 = vmatprep.subr.bf16.mxu1 %v9718_v25  ;;  %v10193_v25 = vld [vmem:[%s14599_s3 + $0x2a4] ss:$16 sps:$4 sm:$0xff]  }
 0x288   :  { %4224 = vmatpush1.bf16.msra.mxu0 %v9713_v5  ;;  %v10194_v5 = vld [vmem:[%s14599_s3 + $0x2ac] ss:$16 sps:$4 sm:$0xff]  }
 0x289   :  { %4297 = vmatpush1.bf16.msra.mxu1 %v9716_v16  ;;  %4225 = vmatprep.subr.bf16.mxu0 %v9721_v14  ;;  %v10195_v16 = vld [vmem:[%s14599_s3 + $0x2a0] ss:$16 sps:$4 sm:$0xff]   ;;  %v10196_v14 = vld [vmem:[%s14599_s3 + $0x2a8] ss:$16 sps:$4 sm:$0xff]  }
 0x28a   :  { %4298 = vmatprep.subr.bf16.mxu1 %v9724_v42  ;;  %v10197_v42 = vld [vmem:[%s14599_s3 + $0x2c4] ss:$16 sps:$4 sm:$0xff]  }
 0x28c   :  { %4226 = vmatpush1.bf16.msra.mxu0 %v9719_v44  ;;  %v14658_v44 = vld [vmem:[#allocation3_spill] sm:$0xff] }
 0x28d   :  { %4299 = vmatpush1.bf16.msra.mxu1 %v9722_v0  ;;  %4227 = vmatprep.subr.bf16.mxu0 %v9727_v34  ;;  %v10198_v0 = vld [vmem:[%s14599_s3 + $0x2cc] ss:$16 sps:$4 sm:$0xff]   ;;  %v10199_v34 = vld [vmem:[%s14599_s3 + $0x2c0] ss:$16 sps:$4 sm:$0xff]  }
 0x28e   :  { %4300 = vmatprep.subr.bf16.mxu1 %v9730_v29  ;;  %v10200_v29 = vld [vmem:[%s14599_s3 + $0x2c8] ss:$16 sps:$4 sm:$0xff]  }
 0x290   :  { %4228 = vmatpush1.bf16.msra.mxu0 %v9725_v54  ;;  %v10201_v54 = vld [vmem:[%s14599_s3 + $0x2e4] ss:$16 sps:$4 sm:$0xff]  }
 0x291   :  { %4301 = vmatpush1.bf16.msra.mxu1 %v9728_v40  ;;  %4229 = vmatprep.subr.bf16.mxu0 %v9733_v45  ;;  %v10202_v40 = vld [vmem:[%s14599_s3 + $0x2ec] ss:$16 sps:$4 sm:$0xff]   ;;  %v10203_v45 = vld [vmem:[%s14599_s3 + $0x2e0] ss:$16 sps:$4 sm:$0xff]  }
 0x292   :  { %4302 = vmatprep.subr.bf16.mxu1 %v9736_v39  ;;  %v10205_v39 = vld [vmem:[%s14599_s3 + $0x304] ss:$16 sps:$4 sm:$0xff]  }
 0x294   :  { %4230 = vmatpush1.bf16.msra.mxu0 %v9731_v47  ;;  %v10206_v47 = vld [vmem:[%s14599_s3 + $0x30c] ss:$16 sps:$4 sm:$0xff]  }
 0x295   :  { %4303 = vmatpush1.bf16.msra.mxu1 %v9734_v59  ;;  %4231 = vmatprep.subr.bf16.mxu0 %v9739_v58  ;;  %v10207_v59 = vld [vmem:[%s14599_s3 + $0x300] ss:$16 sps:$4 sm:$0xff]   ;;  %v10208_v58 = vld [vmem:[%s14599_s3 + $0x308] ss:$16 sps:$4 sm:$0xff]  }
 0x296   :  { %4304 = vmatprep.subr.bf16.mxu1 %v9742_v36  ;;  %v10209_v36 = vld [vmem:[%s14599_s3 + $0x324] ss:$16 sps:$4 sm:$0xff]  }
 0x298   :  { %4232 = vmatpush1.bf16.msra.mxu0 %v9737_v18  ;;  %v10210_v18 = vld [vmem:[%s14599_s3 + $0x32c] ss:$16 sps:$4 sm:$0xff]  }
 0x299   :  { %4305 = vmatpush1.bf16.msra.mxu1 %v9740_v60  ;;  %4233 = vmatprep.subr.bf16.mxu0 %v9745_v61  ;;  %v10211_v60 = vld [vmem:[%s14599_s3 + $0x320] ss:$16 sps:$4 sm:$0xff]   ;;  %v10212_v61 = vld [vmem:[%s14599_s3 + $0x328] ss:$16 sps:$4 sm:$0xff]  }
 0x29a   :  { %4306 = vmatprep.subr.bf16.mxu1 %v9748_v26  ;;  %v10213_v26 = vld [vmem:[%s14599_s3 + $0x344] ss:$16 sps:$4 sm:$0xff]  }
 0x29c   :  { %4234 = vmatpush1.bf16.msra.mxu0 %v9743_v21  ;;  %v10214_v21 = vld [vmem:[%s14599_s3 + $0x34c] ss:$16 sps:$4 sm:$0xff]  }
 0x29d   :  { %4307 = vmatpush1.bf16.msra.mxu1 %v9746_v8  ;;  %4381 = vmatprep.subr.bf16.mxu0 %v10173_v35  ;;  %v10215_v8 = vld [vmem:[%s14599_s3 + $0x340] ss:$16 sps:$4 sm:$0xff]   ;;  %v10216_v35 = vld [vmem:[%s14599_s3 + $0x348] ss:$16 sps:$4 sm:$0xff]  }
 0x29e   :  { %4454 = vmatprep.subr.bf16.mxu1 %v10174_v46  ;;  %v10217_v46 = vld [vmem:[%s14599_s3 + $0x364] ss:$16 sps:$4 sm:$0xff]  }
 0x29f   :  { %4236 = vmatmul.mubr.bf16.vlgmr.msra.gmra.mrb[96].mxu0 %v14652_v41 }
 0x2a0   :  { %4309 = vmatmul.mubr.bf16.vlgmr.msra.gmra.mrb[96].mxu1 %v14652_v41  ;;  %4245 = vmatprep.mubr.bf16.mxu0 %v14653_v43 }
 0x2a1   :  { %4318 = vmatprep.mubr.bf16.mxu1 %v14653_v43  ;;  %4382 = vmatpush1.bf16.msra.mxu0 %v10175_v31  ;;  %v10218_v31 = vld [vmem:[%s14599_s3 + $0x36c] ss:$16 sps:$4 sm:$0xff]  }
 0x2a2   :  { %4455 = vmatpush1.bf16.msra.mxu1 %v10176_v62  ;;  %4383 = vmatprep.subr.bf16.mxu0 %v10177_v53  ;;  %v10219_v62 = vld [vmem:[%s14599_s3 + $0x360] ss:$16 sps:$4 sm:$0xff]   ;;  %v10220_v53 = vld [vmem:[%s14599_s3 + $0x368] ss:$16 sps:$4 sm:$0xff]  }
 0x2a3   :  { %4456 = vmatprep.subr.bf16.mxu1 %v10178_v9  ;;  %v10221_v9 = vld [vmem:[%s14599_s3 + $0x384] ss:$16 sps:$4 sm:$0xff]  }
 0x2a5   :  { %4384 = vmatpush1.bf16.msra.mxu0 %v10179_v24  ;;  %v10222_v24 = vld [vmem:[%s14599_s3 + $0x38c] ss:$16 sps:$4 sm:$0xff]  }
 0x2a6   :  { %4457 = vmatpush1.bf16.msra.mxu1 %v10180_v10  ;;  %4385 = vmatprep.subr.bf16.mxu0 %v10181_v23  ;;  %v10223_v10 = vld [vmem:[%s14599_s3 + $0x380] ss:$16 sps:$4 sm:$0xff]   ;;  %v10224_v23 = vld [vmem:[%s14599_s3 + $0x388] ss:$16 sps:$4 sm:$0xff]  }
 0x2a7   :  { %4246 = vmatmul.mubr.bf16.gmra.mrb[100].mxu0 %v14654_v48  ;;  %4458 = vmatprep.subr.bf16.mxu1 %v10182_v56  ;;  %v10225_v56 = vld [vmem:[%s14599_s3 + $0x3a4] ss:$16 sps:$4 sm:$0xff]  }
 0x2a8   :  { %4319 = vmatmul.mubr.bf16.gmra.mrb[100].mxu1 %v14654_v48  ;;  %4255 = vmatprep.mubr.bf16.mxu0 %v14655_v6 }
 0x2a9   :  { %4328 = vmatprep.mubr.bf16.mxu1 %v14655_v6  ;;  %4386 = vmatpush1.bf16.msra.mxu0 %v10183_v33  ;;  %v10226_v33 = vld [vmem:[%s14599_s3 + $0x3ac] ss:$16 sps:$4 sm:$0xff]  }
 0x2aa   :  { %4459 = vmatpush1.bf16.msra.mxu1 %v10184_v12  ;;  %4387 = vmatprep.subr.bf16.mxu0 %v10185_v15  ;;  %v10227_v12 = vld [vmem:[%s14599_s3 + $0x3a0] ss:$16 sps:$4 sm:$0xff]   ;;  %v10228_v15 = vld [vmem:[%s14599_s3 + $0x3a8] ss:$16 sps:$4 sm:$0xff]  }
 0x2ab   :  { %4460 = vmatprep.subr.bf16.mxu1 %v10186_v57  ;;  %v10229_v57 = vld [vmem:[%s14599_s3 + $0x3c4] ss:$16 sps:$4 sm:$0xff]  }
 0x2ad   :  { %4388 = vmatpush1.bf16.msra.mxu0 %v10187_v27  ;;  %v10230_v27 = vld [vmem:[%s14599_s3 + $0x3cc] ss:$16 sps:$4 sm:$0xff]  }
 0x2ae   :  { %4461 = vmatpush1.bf16.msra.mxu1 %v10188_v4  ;;  %4389 = vmatprep.subr.bf16.mxu0 %v10189_v49  ;;  %v10231_v4 = vld [vmem:[%s14599_s3 + $0x3c0] ss:$16 sps:$4 sm:$0xff]   ;;  %v10232_v49 = vld [vmem:[%s14599_s3 + $0x3c8] ss:$16 sps:$4 sm:$0xff]  }
 0x2af   :  { %4256 = vmatmul.mubr.bf16.gmra.mrb[104].mxu0 %v14656_v17  ;;  %4462 = vmatprep.subr.bf16.mxu1 %v10190_v38  ;;  %v10233_v38 = vld [vmem:[%s14599_s3 + $0x3e4] ss:$16 sps:$4 sm:$0xff]  }
 0x2b0   :  { %4329 = vmatmul.mubr.bf16.gmra.mrb[104].mxu1 %v14656_v17  ;;  %4265 = vmatprep.mubr.bf16.mxu0 %v14657_v7 }
 0x2b1   :  { %4338 = vmatprep.mubr.bf16.mxu1 %v14657_v7  ;;  %4390 = vmatpush1.bf16.msra.mxu0 %v10191_v19  ;;  %v10234_v19 = vld [vmem:[%s14599_s3 + $0x3ec] ss:$16 sps:$4 sm:$0xff]  }
 0x2b2   :  { %4463 = vmatpush1.bf16.msra.mxu1 %v10192_v32  ;;  %4391 = vmatprep.subr.bf16.mxu0 %v10193_v25  ;;  %v10235_v32 = vld [vmem:[%s14599_s3 + $0x3e0] ss:$16 sps:$4 sm:$0xff]   ;;  %v10236_v25 = vld [vmem:[%s14599_s3 + $0x3e8] ss:$16 sps:$4 sm:$0xff]  }
 0x2b3   :  { %4464 = vmatprep.subr.bf16.mxu1 %v10194_v5  ;;  %v10237_v5 = vld [vmem:[%s14599_s3 + $0x4] ss:$16 sps:$4 sm:$0xff]  }
 0x2b5   :  { %4392 = vmatpush1.bf16.msra.mxu0 %v10195_v16  ;;  %v10238_v16 = vld [vmem:[%s14599_s3 + $0xc] ss:$16 sps:$4 sm:$0xff]  }
 0x2b6   :  { %4465 = vmatpush1.bf16.msra.mxu1 %v10196_v14  ;;  %4393 = vmatprep.subr.bf16.mxu0 %v10197_v42  ;;  %v10239_v14 = vld [vmem:[%s14599_s3] ss:$16 sps:$4 sm:$0xff]   ;;  %v10240_v42 = vld [vmem:[%s14599_s3 + $0x8] ss:$16 sps:$4 sm:$0xff]  }
 0x2b7   :  { %4266 = vmatmul.mubr.bf16.gmra.mrb[108].mxu0 %v14658_v44  ;;  %4466 = vmatprep.subr.bf16.mxu1 %v10198_v0  ;;  %v10241_v0 = vld [vmem:[%s14599_s3 + $0x24] ss:$16 sps:$4 sm:$0xff]  }
 0x2b8   :  { %4339 = vmatmul.mubr.bf16.gmra.mrb[108].mxu1 %v14658_v44  ;;  %4413 = vmatprep.mubr.bf16.mxu0 %v14649_v55 }
 0x2b9   :  { %4394 = vmatpush1.bf16.msra.mxu0 %v10199_v34  ;;  %4486 = vmatprep.mubr.bf16.mxu1 %v14649_v55  ;;  %v10204_v55 = vld [vmem:[%s14599_s3 + $0x2e8] ss:$16 sps:$4 sm:$0xff]   ;;  %v10243_v34 = vld [vmem:[%s14599_s3 + $0x20] ss:$16 sps:$4 sm:$0xff]  }
 0x2ba   :  { %4467 = vmatpush1.bf16.msra.mxu1 %v10200_v29  ;;  %4395 = vmatprep.subr.bf16.mxu0 %v10201_v54  ;;  %v10244_v29 = vld [vmem:[%s14599_s3 + $0x28] ss:$16 sps:$4 sm:$0xff]   ;;  %v10245_v54 = vld [vmem:[%s14599_s3 + $0x44] ss:$16 sps:$4 sm:$0xff]  }
 0x2bb   :  { %4468 = vmatprep.subr.bf16.mxu1 %v10202_v40  ;;  %v10246_v40 = vld [vmem:[%s14599_s3 + $0x4c] ss:$16 sps:$4 sm:$0xff]  }
 0x2bd   :  { %4396 = vmatpush1.bf16.msra.mxu0 %v10203_v45  ;;  %v10247_v45 = vld [vmem:[%s14599_s3 + $0x40] ss:$16 sps:$4 sm:$0xff]  }
 0x2be   :  { %4469 = vmatpush1.bf16.msra.mxu1 %v10204_v55  ;;  %4397 = vmatprep.subr.bf16.mxu0 %v10205_v39  ;;  %v10248_v55 = vld [vmem:[%s14599_s3 + $0x48] ss:$16 sps:$4 sm:$0xff]   ;;  %v10249_v39 = vld [vmem:[%s14599_s3 + $0x64] ss:$16 sps:$4 sm:$0xff]  }
 0x2bf   :  { %4470 = vmatprep.subr.bf16.mxu1 %v10206_v47  ;;  %v10250_v47 = vld [vmem:[%s14599_s3 + $0x6c] ss:$16 sps:$4 sm:$0xff]  }
 0x2c1   :  { %4398 = vmatpush1.bf16.msra.mxu0 %v10207_v59  ;;  %v10251_v59 = vld [vmem:[%s14599_s3 + $0x60] ss:$16 sps:$4 sm:$0xff]  }
 0x2c2   :  { %4471 = vmatpush1.bf16.msra.mxu1 %v10208_v58  ;;  %4399 = vmatprep.subr.bf16.mxu0 %v10209_v36  ;;  %v10252_v58 = vld [vmem:[%s14599_s3 + $0x68] ss:$16 sps:$4 sm:$0xff]   ;;  %v10253_v36 = vld [vmem:[%s14599_s3 + $0x84] ss:$16 sps:$4 sm:$0xff]  }
 0x2c3   :  { %4472 = vmatprep.subr.bf16.mxu1 %v10210_v18  ;;  %v10254_v18 = vld [vmem:[%s14599_s3 + $0x8c] ss:$16 sps:$4 sm:$0xff]  }
 0x2c5   :  { %4400 = vmatpush1.bf16.msra.mxu0 %v10211_v60  ;;  %v10255_v60 = vld [vmem:[%s14599_s3 + $0x80] ss:$16 sps:$4 sm:$0xff]  }
 0x2c6   :  { %4473 = vmatpush1.bf16.msra.mxu1 %v10212_v61  ;;  %4401 = vmatprep.subr.bf16.mxu0 %v10213_v26  ;;  %v10256_v61 = vld [vmem:[%s14599_s3 + $0x88] ss:$16 sps:$4 sm:$0xff]   ;;  %v10257_v26 = vld [vmem:[%s14599_s3 + $0xa4] ss:$16 sps:$4 sm:$0xff]  }
 0x2c7   :  { %4474 = vmatprep.subr.bf16.mxu1 %v10214_v21  ;;  %v10258_v21 = vld [vmem:[%s14599_s3 + $0xac] ss:$16 sps:$4 sm:$0xff]  }
 0x2c9   :  { %4402 = vmatpush1.bf16.msra.mxu0 %v10215_v8  ;;  %v10259_v8 = vld [vmem:[%s14599_s3 + $0xa0] ss:$16 sps:$4 sm:$0xff]  }
 0x2ca   :  { %4475 = vmatpush1.bf16.msra.mxu1 %v10216_v35  ;;  %4403 = vmatprep.subr.bf16.mxu0 %v10217_v46  ;;  %v10260_v35 = vld [vmem:[%s14599_s3 + $0xa8] ss:$16 sps:$4 sm:$0xff]   ;;  %v10261_v46 = vld [vmem:[%s14599_s3 + $0xc4] ss:$16 sps:$4 sm:$0xff]  }
 0x2cb   :  { %4476 = vmatprep.subr.bf16.mxu1 %v10218_v31  ;;  %v10262_v31 = vld [vmem:[%s14599_s3 + $0xcc] ss:$16 sps:$4 sm:$0xff]  }
 0x2cd   :  { %4404 = vmatpush1.bf16.msra.mxu0 %v10219_v62  ;;  %v10263_v62 = vld [vmem:[%s14599_s3 + $0xc0] ss:$16 sps:$4 sm:$0xff]  }
 0x2ce   :  { %4477 = vmatpush1.bf16.msra.mxu1 %v10220_v53  ;;  %4405 = vmatprep.subr.bf16.mxu0 %v10221_v9  ;;  %v10264_v53 = vld [vmem:[%s14599_s3 + $0xc8] ss:$16 sps:$4 sm:$0xff]   ;;  %v10265_v9 = vld [vmem:[%s14599_s3 + $0xe4] ss:$16 sps:$4 sm:$0xff]  }
 0x2cf   :  { %4478 = vmatprep.subr.bf16.mxu1 %v10222_v24  ;;  %v10266_v24 = vld [vmem:[%s14599_s3 + $0xec] ss:$16 sps:$4 sm:$0xff]  }
 0x2d1   :  { %4406 = vmatpush1.bf16.msra.mxu0 %v10223_v10  ;;  %v10267_v10 = vld [vmem:[%s14599_s3 + $0xe0] ss:$16 sps:$4 sm:$0xff]  }
 0x2d2   :  { %4479 = vmatpush1.bf16.msra.mxu1 %v10224_v23  ;;  %4407 = vmatprep.subr.bf16.mxu0 %v10225_v56  ;;  %v10269_v23 = vld [vmem:[%s14599_s3 + $0x104] ss:$16 sps:$4 sm:$0xff]   ;;  %v10270_v56 = vld [vmem:[%s14599_s3 + $0x10c] ss:$16 sps:$4 sm:$0xff]  }
 0x2d3   :  { %4480 = vmatprep.subr.bf16.mxu1 %v10226_v33  ;;  %v10271_v33 = vld [vmem:[%s14599_s3 + $0x100] ss:$16 sps:$4 sm:$0xff]  }
 0x2d5   :  { %4408 = vmatpush1.bf16.msra.mxu0 %v10227_v12  ;;  %v10272_v12 = vld [vmem:[%s14599_s3 + $0x108] ss:$16 sps:$4 sm:$0xff]  }
 0x2d6   :  { %4481 = vmatpush1.bf16.msra.mxu1 %v10228_v15  ;;  %4409 = vmatprep.subr.bf16.mxu0 %v10229_v57  ;;  %v10273_v15 = vld [vmem:[%s14599_s3 + $0x124] ss:$16 sps:$4 sm:$0xff]   ;;  %v10274_v57 = vld [vmem:[%s14599_s3 + $0x12c] ss:$16 sps:$4 sm:$0xff]  }
 0x2d7   :  { %4482 = vmatprep.subr.bf16.mxu1 %v10230_v27  ;;  %v10275_v27 = vld [vmem:[%s14599_s3 + $0x120] ss:$16 sps:$4 sm:$0xff]  }
 0x2d9   :  { %4410 = vmatpush1.bf16.msra.mxu0 %v10231_v4  ;;  %v10276_v4 = vld [vmem:[%s14599_s3 + $0x128] ss:$16 sps:$4 sm:$0xff]  }
 0x2da   :  { %4483 = vmatpush1.bf16.msra.mxu1 %v10232_v49  ;;  %4411 = vmatprep.subr.bf16.mxu0 %v10233_v38  ;;  %v10277_v49 = vld [vmem:[%s14599_s3 + $0x144] ss:$16 sps:$4 sm:$0xff]   ;;  %v10278_v38 = vld [vmem:[%s14599_s3 + $0x14c] ss:$16 sps:$4 sm:$0xff]  }
 0x2db   :  { %4484 = vmatprep.subr.bf16.mxu1 %v10234_v19  ;;  %v10279_v19 = vld [vmem:[%s14599_s3 + $0x140] ss:$16 sps:$4 sm:$0xff]  }
 0x2dd   :  { %4412 = vmatpush1.bf16.msra.mxu0 %v10235_v32  ;;  %v10280_v32 = vld [vmem:[%s14599_s3 + $0x148] ss:$16 sps:$4 sm:$0xff]  }
 0x2de   :  { %4485 = vmatpush1.bf16.msra.mxu1 %v10236_v25  ;;  %4527 = vmatprep.subr.bf16.mxu0 %v10237_v5  ;;  %v10281_v25 = vld [vmem:[%s14599_s3 + $0x164] ss:$16 sps:$4 sm:$0xff]   ;;  %v10282_v5 = vld [vmem:[%s14599_s3 + $0x16c] ss:$16 sps:$4 sm:$0xff]  }
 0x2df   :  { %4600 = vmatprep.subr.bf16.mxu1 %v10238_v16  ;;  %v10283_v16 = vld [vmem:[%s14599_s3 + $0x160] ss:$16 sps:$4 sm:$0xff]  }
 0x2e0   :  { %4414 = vmatmul.mubr.bf16.vlgmr.msra.gmra.mrb[112].mxu0 %v14650_v37 }
 0x2e1   :  { %4487 = vmatmul.mubr.bf16.vlgmr.msra.gmra.mrb[112].mxu1 %v14650_v37  ;;  %4423 = vmatprep.mubr.bf16.mxu0 %v14651_v52  ;;  %v10242_v37 = vld [vmem:[%s14599_s3 + $0x2c] ss:$16 sps:$4 sm:$0xff]  }
 0x2e2   :  { %4496 = vmatprep.mubr.bf16.mxu1 %v14651_v52  ;;  %4528 = vmatpush1.bf16.msra.mxu0 %v10239_v14  ;;  %v10284_v14 = vld [vmem:[%s14599_s3 + $0x168] ss:$16 sps:$4 sm:$0xff]  }
 0x2e3   :  { %4601 = vmatpush1.bf16.msra.mxu1 %v10240_v42  ;;  %4529 = vmatprep.subr.bf16.mxu0 %v10241_v0  ;;  %v10285_v42 = vld [vmem:[%s14599_s3 + $0x184] ss:$16 sps:$4 sm:$0xff]   ;;  %v10286_v0 = vld [vmem:[%s14599_s3 + $0x18c] ss:$16 sps:$4 sm:$0xff]  }
 0x2e4   :  { %4602 = vmatprep.subr.bf16.mxu1 %v10242_v37  ;;  %v10287_v37 = vld [vmem:[%s14599_s3 + $0x180] ss:$16 sps:$4 sm:$0xff]  }
 0x2e6   :  { %4530 = vmatpush1.bf16.msra.mxu0 %v10243_v34  ;;  %v10288_v34 = vld [vmem:[%s14599_s3 + $0x188] ss:$16 sps:$4 sm:$0xff]  }
 0x2e7   :  { %4603 = vmatpush1.bf16.msra.mxu1 %v10244_v29  ;;  %4531 = vmatprep.subr.bf16.mxu0 %v10245_v54  ;;  %v10289_v29 = vld [vmem:[%s14599_s3 + $0x1a4] ss:$16 sps:$4 sm:$0xff]   ;;  %v10290_v54 = vld [vmem:[%s14599_s3 + $0x1ac] ss:$16 sps:$4 sm:$0xff]  }
 0x2e8   :  { %4424 = vmatmul.mubr.bf16.gmra.mrb[116].mxu0 %v14652_v41  ;;  %4604 = vmatprep.subr.bf16.mxu1 %v10246_v40  ;;  %v10291_v40 = vld [vmem:[%s14599_s3 + $0x1a0] ss:$16 sps:$4 sm:$0xff]  }
 0x2e9   :  { %4497 = vmatmul.mubr.bf16.gmra.mrb[116].mxu1 %v14652_v41  ;;  %4433 = vmatprep.mubr.bf16.mxu0 %v14653_v43 }
 0x2ea   :  { %4506 = vmatprep.mubr.bf16.mxu1 %v14653_v43  ;;  %4532 = vmatpush1.bf16.msra.mxu0 %v10247_v45  ;;  %v10292_v45 = vld [vmem:[%s14599_s3 + $0x1a8] ss:$16 sps:$4 sm:$0xff]  }
 0x2eb   :  { %4605 = vmatpush1.bf16.msra.mxu1 %v10248_v55  ;;  %4533 = vmatprep.subr.bf16.mxu0 %v10249_v39  ;;  %v10293_v55 = vld [vmem:[%s14599_s3 + $0x1c4] ss:$16 sps:$4 sm:$0xff]   ;;  %v10294_v39 = vld [vmem:[%s14599_s3 + $0x1cc] ss:$16 sps:$4 sm:$0xff]  }
 0x2ec   :  { %4606 = vmatprep.subr.bf16.mxu1 %v10250_v47  ;;  %v10295_v47 = vld [vmem:[%s14599_s3 + $0x1c0] ss:$16 sps:$4 sm:$0xff]  }
 0x2ee   :  { %4534 = vmatpush1.bf16.msra.mxu0 %v10251_v59  ;;  %v10296_v59 = vld [vmem:[%s14599_s3 + $0x1c8] ss:$16 sps:$4 sm:$0xff]  }
 0x2ef   :  { %4607 = vmatpush1.bf16.msra.mxu1 %v10252_v58  ;;  %4535 = vmatprep.subr.bf16.mxu0 %v10253_v36  ;;  %v10297_v58 = vld [vmem:[%s14599_s3 + $0x1e4] ss:$16 sps:$4 sm:$0xff]   ;;  %v10298_v36 = vld [vmem:[%s14599_s3 + $0x1ec] ss:$16 sps:$4 sm:$0xff]  }
 0x2f0   :  { %4434 = vmatmul.mubr.bf16.gmra.mrb[120].mxu0 %v14654_v48  ;;  %4608 = vmatprep.subr.bf16.mxu1 %v10254_v18  ;;  %v10299_v18 = vld [vmem:[%s14599_s3 + $0x1e0] ss:$16 sps:$4 sm:$0xff]  }
 0x2f1   :  { %4507 = vmatmul.mubr.bf16.gmra.mrb[120].mxu1 %v14654_v48  ;;  %4443 = vmatprep.mubr.bf16.mxu0 %v14655_v6 }
 0x2f2   :  { %4516 = vmatprep.mubr.bf16.mxu1 %v14655_v6  ;;  %4536 = vmatpush1.bf16.msra.mxu0 %v10255_v60  ;;  %v10300_v60 = vld [vmem:[%s14599_s3 + $0x1e8] ss:$16 sps:$4 sm:$0xff]  }
 0x2f3   :  { %4609 = vmatpush1.bf16.msra.mxu1 %v10256_v61  ;;  %4537 = vmatprep.subr.bf16.mxu0 %v10257_v26  ;;  %v10301_v61 = vld [vmem:[%s14599_s3 + $0x404] ss:$16 sps:$4 sm:$0xff]   ;;  %v10302_v26 = vld [vmem:[%s14599_s3 + $0x40c] ss:$16 sps:$4 sm:$0xff]  }
 0x2f4   :  { %4610 = vmatprep.subr.bf16.mxu1 %v10258_v21  ;;  %v10303_v21 = vld [vmem:[%s14599_s3 + $0x400] ss:$16 sps:$4 sm:$0xff]  }
 0x2f6   :  { %4538 = vmatpush1.bf16.msra.mxu0 %v10259_v8  ;;  %v10304_v8 = vld [vmem:[%s14599_s3 + $0x408] ss:$16 sps:$4 sm:$0xff]  }
 0x2f7   :  { %4611 = vmatpush1.bf16.msra.mxu1 %v10260_v35  ;;  %4539 = vmatprep.subr.bf16.mxu0 %v10261_v46  ;;  %v10305_v35 = vld [vmem:[%s14599_s3 + $0x424] ss:$16 sps:$4 sm:$0xff]   ;;  %v10307_v46 = vld [vmem:[%s14599_s3 + $0x420] ss:$16 sps:$4 sm:$0xff]  }
 0x2f8   :  { %4444 = vmatmul.mubr.bf16.gmra.mrb[124].mxu0 %v14656_v17  ;;  %4612 = vmatprep.subr.bf16.mxu1 %v10262_v31  ;;  %v10308_v31 = vld [vmem:[%s14599_s3 + $0x428] ss:$16 sps:$4 sm:$0xff]  }
 0x2f9   :  { %4517 = vmatmul.mubr.bf16.gmra.mrb[124].mxu1 %v14656_v17  ;;  %4559 = vmatprep.mubr.bf16.mxu0 %v11618_v63 }
 0x2fa   :  { %4540 = vmatpush1.bf16.msra.mxu0 %v10263_v62  ;;  %4632 = vmatprep.mubr.bf16.mxu1 %v11618_v63  ;;  %v10268_v63 = vld [vmem:[%s14599_s3 + $0xe8] ss:$16 sps:$4 sm:$0xff]   ;;  %v10309_v62 = vld [vmem:[%s14599_s3 + $0x444] ss:$16 sps:$4 sm:$0xff]  }
 0x2fb   :  { %4613 = vmatpush1.bf16.msra.mxu1 %v10264_v53  ;;  %4541 = vmatprep.subr.bf16.mxu0 %v10265_v9  ;;  %v10310_v53 = vld [vmem:[%s14599_s3 + $0x44c] ss:$16 sps:$4 sm:$0xff]   ;;  %v10311_v9 = vld [vmem:[%s14599_s3 + $0x440] ss:$16 sps:$4 sm:$0xff]  }
 0x2fc   :  { %4614 = vmatprep.subr.bf16.mxu1 %v10266_v24  ;;  %v10312_v24 = vld [vmem:[%s14599_s3 + $0x448] ss:$16 sps:$4 sm:$0xff]  }
 0x2fe   :  { %4542 = vmatpush1.bf16.msra.mxu0 %v10267_v10  ;;  %v10313_v10 = vld [vmem:[%s14599_s3 + $0x464] ss:$16 sps:$4 sm:$0xff]  }
 0x2ff   :  { %4615 = vmatpush1.bf16.msra.mxu1 %v10268_v63  ;;  %4543 = vmatprep.subr.bf16.mxu0 %v10269_v23  ;;  %v10314_v63 = vld [vmem:[%s14599_s3 + $0x46c] ss:$16 sps:$4 sm:$0xff]   ;;  %v10315_v23 = vld [vmem:[%s14599_s3 + $0x460] ss:$16 sps:$4 sm:$0xff]  }
 0x300   :  { %4616 = vmatprep.subr.bf16.mxu1 %v10270_v56  ;;  %v10316_v56 = vld [vmem:[%s14599_s3 + $0x468] ss:$16 sps:$4 sm:$0xff]  }
 0x302   :  { %4544 = vmatpush1.bf16.msra.mxu0 %v10271_v33  ;;  %v10317_v33 = vld [vmem:[%s14599_s3 + $0x484] ss:$16 sps:$4 sm:$0xff]  }
 0x303   :  { %4617 = vmatpush1.bf16.msra.mxu1 %v10272_v12  ;;  %4545 = vmatprep.subr.bf16.mxu0 %v10273_v15  ;;  %v10318_v12 = vld [vmem:[%s14599_s3 + $0x48c] ss:$16 sps:$4 sm:$0xff]   ;;  %v10319_v15 = vld [vmem:[%s14599_s3 + $0x480] ss:$16 sps:$4 sm:$0xff]  }
 0x304   :  { %4618 = vmatprep.subr.bf16.mxu1 %v10274_v57  ;;  %v10320_v57 = vld [vmem:[%s14599_s3 + $0x488] ss:$16 sps:$4 sm:$0xff]  }
 0x306   :  { %4546 = vmatpush1.bf16.msra.mxu0 %v10275_v27  ;;  %v10321_v27 = vld [vmem:[%s14599_s3 + $0x4a4] ss:$16 sps:$4 sm:$0xff]  }
 0x307   :  { %4619 = vmatpush1.bf16.msra.mxu1 %v10276_v4  ;;  %4547 = vmatprep.subr.bf16.mxu0 %v10277_v49  ;;  %v10322_v4 = vld [vmem:[%s14599_s3 + $0x4ac] ss:$16 sps:$4 sm:$0xff]   ;;  %v10323_v49 = vld [vmem:[%s14599_s3 + $0x4a0] ss:$16 sps:$4 sm:$0xff]  }
 0x308   :  { %4620 = vmatprep.subr.bf16.mxu1 %v10278_v38  ;;  %v10324_v38 = vld [vmem:[%s14599_s3 + $0x4a8] ss:$16 sps:$4 sm:$0xff]  }
 0x30a   :  { %4548 = vmatpush1.bf16.msra.mxu0 %v10279_v19  ;;  %v10325_v19 = vld [vmem:[%s14599_s3 + $0x4c4] ss:$16 sps:$4 sm:$0xff]  }
 0x30b   :  { %4621 = vmatpush1.bf16.msra.mxu1 %v10280_v32  ;;  %4549 = vmatprep.subr.bf16.mxu0 %v10281_v25  ;;  %v10326_v32 = vld [vmem:[%s14599_s3 + $0x4cc] ss:$16 sps:$4 sm:$0xff]   ;;  %v10327_v25 = vld [vmem:[%s14599_s3 + $0x4c0] ss:$16 sps:$4 sm:$0xff]  }
 0x30c   :  { %4622 = vmatprep.subr.bf16.mxu1 %v10282_v5  ;;  %v10328_v5 = vld [vmem:[%s14599_s3 + $0x4c8] ss:$16 sps:$4 sm:$0xff]  }
 0x30e   :  { %4550 = vmatpush1.bf16.msra.mxu0 %v10283_v16  ;;  %v10329_v16 = vld [vmem:[%s14599_s3 + $0x4e4] ss:$16 sps:$4 sm:$0xff]  }
 0x30f   :  { %4623 = vmatpush1.bf16.msra.mxu1 %v10284_v14  ;;  %4551 = vmatprep.subr.bf16.mxu0 %v10285_v42  ;;  %v10330_v14 = vld [vmem:[%s14599_s3 + $0x4ec] ss:$16 sps:$4 sm:$0xff]   ;;  %v10331_v42 = vld [vmem:[%s14599_s3 + $0x4e0] ss:$16 sps:$4 sm:$0xff]  }
 0x310   :  { %4624 = vmatprep.subr.bf16.mxu1 %v10286_v0  ;;  %v10333_v0 = vld [vmem:[%s14599_s3 + $0x504] ss:$16 sps:$4 sm:$0xff]  }
 0x312   :  { %4552 = vmatpush1.bf16.msra.mxu0 %v10287_v37  ;;  %v10334_v37 = vld [vmem:[%s14599_s3 + $0x50c] ss:$16 sps:$4 sm:$0xff]  }
 0x313   :  { %4625 = vmatpush1.bf16.msra.mxu1 %v10288_v34  ;;  %4553 = vmatprep.subr.bf16.mxu0 %v10289_v29  ;;  %v10335_v34 = vld [vmem:[%s14599_s3 + $0x500] ss:$16 sps:$4 sm:$0xff]   ;;  %v10336_v29 = vld [vmem:[%s14599_s3 + $0x508] ss:$16 sps:$4 sm:$0xff]  }
 0x314   :  { %4626 = vmatprep.subr.bf16.mxu1 %v10290_v54  ;;  %v10337_v54 = vld [vmem:[%s14599_s3 + $0x524] ss:$16 sps:$4 sm:$0xff]  }
 0x316   :  { %4554 = vmatpush1.bf16.msra.mxu0 %v10291_v40  ;;  %v10338_v40 = vld [vmem:[%s14599_s3 + $0x52c] ss:$16 sps:$4 sm:$0xff]  }
 0x317   :  { %4627 = vmatpush1.bf16.msra.mxu1 %v10292_v45  ;;  %4555 = vmatprep.subr.bf16.mxu0 %v10293_v55  ;;  %v10339_v45 = vld [vmem:[%s14599_s3 + $0x520] ss:$16 sps:$4 sm:$0xff]   ;;  %v10340_v55 = vld [vmem:[%s14599_s3 + $0x528] ss:$16 sps:$4 sm:$0xff]  }
 0x318   :  { %4628 = vmatprep.subr.bf16.mxu1 %v10294_v39  ;;  %v10341_v39 = vld [vmem:[%s14599_s3 + $0x544] ss:$16 sps:$4 sm:$0xff]  }
 0x31a   :  { %4556 = vmatpush1.bf16.msra.mxu0 %v10295_v47  ;;  %v10342_v47 = vld [vmem:[%s14599_s3 + $0x54c] ss:$16 sps:$4 sm:$0xff]  }
 0x31b   :  { %4629 = vmatpush1.bf16.msra.mxu1 %v10296_v59  ;;  %4557 = vmatprep.subr.bf16.mxu0 %v10297_v58  ;;  %v10343_v59 = vld [vmem:[%s14599_s3 + $0x540] ss:$16 sps:$4 sm:$0xff]   ;;  %v10344_v58 = vld [vmem:[%s14599_s3 + $0x548] ss:$16 sps:$4 sm:$0xff]  }
 0x31c   :  { %4630 = vmatprep.subr.bf16.mxu1 %v10298_v36  ;;  %v10345_v36 = vld [vmem:[%s14599_s3 + $0x564] ss:$16 sps:$4 sm:$0xff]  }
 0x31e   :  { %4558 = vmatpush1.bf16.msra.mxu0 %v10299_v18  ;;  %v10346_v18 = vld [vmem:[%s14599_s3 + $0x56c] ss:$16 sps:$4 sm:$0xff]  }
 0x31f   :  { %4631 = vmatpush1.bf16.msra.mxu1 %v10300_v60  ;;  %4673 = vmatprep.subr.bf16.mxu0 %v10301_v61  ;;  %v10347_v60 = vld [vmem:[%s14599_s3 + $0x560] ss:$16 sps:$4 sm:$0xff]   ;;  %v10348_v61 = vld [vmem:[%s14599_s3 + $0x568] ss:$16 sps:$4 sm:$0xff]  }
 0x320   :  { %4746 = vmatprep.subr.bf16.mxu1 %v10302_v26  ;;  %v10349_v26 = vld [vmem:[%s14599_s3 + $0x584] ss:$16 sps:$4 sm:$0xff]  }
 0x321   :  { %4560 = vmatmul.mubr.bf16.vlgmr.msra.gmra.mrb[112].mxu0 %v11614_v13 }
 0x322   :  { %4633 = vmatmul.mubr.bf16.vlgmr.msra.gmra.mrb[112].mxu1 %v11614_v13  ;;  %4569 = vmatprep.mubr.bf16.mxu0 %v11662_v50  ;;  %v10306_v13 = vld [vmem:[%s14599_s3 + $0x42c] ss:$16 sps:$4 sm:$0xff]  }
 0x323   :  { %4642 = vmatprep.mubr.bf16.mxu1 %v11662_v50  ;;  %4674 = vmatpush1.bf16.msra.mxu0 %v10303_v21  ;;  %v10350_v21 = vld [vmem:[%s14599_s3 + $0x58c] ss:$16 sps:$4 sm:$0xff]  }
 0x324   :  { %4747 = vmatpush1.bf16.msra.mxu1 %v10304_v8  ;;  %4675 = vmatprep.subr.bf16.mxu0 %v10305_v35  ;;  %v10351_v8 = vld [vmem:[%s14599_s3 + $0x580] ss:$16 sps:$4 sm:$0xff]   ;;  %v10352_v35 = vld [vmem:[%s14599_s3 + $0x588] ss:$16 sps:$4 sm:$0xff]  }
 0x325   :  { %4748 = vmatprep.subr.bf16.mxu1 %v10306_v13  ;;  %v10353_v13 = vld [vmem:[%s14599_s3 + $0x5a4] ss:$16 sps:$4 sm:$0xff]  }
 0x327   :  { %4676 = vmatpush1.bf16.msra.mxu0 %v10307_v46  ;;  %v10354_v46 = vld [vmem:[%s14599_s3 + $0x5ac] ss:$16 sps:$4 sm:$0xff]  }
 0x328   :  { %4749 = vmatpush1.bf16.msra.mxu1 %v10308_v31  ;;  %4677 = vmatprep.subr.bf16.mxu0 %v10309_v62  ;;  %v10355_v31 = vld [vmem:[%s14599_s3 + $0x5a0] ss:$16 sps:$4 sm:$0xff]   ;;  %v10356_v62 = vld [vmem:[%s14599_s3 + $0x5a8] ss:$16 sps:$4 sm:$0xff]  }
 0x329   :  { %4570 = vmatmul.mubr.bf16.gmra.mrb[116].mxu0 %v11655_v1  ;;  %4750 = vmatprep.subr.bf16.mxu1 %v10310_v53  ;;  %v10357_v53 = vld [vmem:[%s14599_s3 + $0x5c4] ss:$16 sps:$4 sm:$0xff]  }
 0x32a   :  { %4643 = vmatmul.mubr.bf16.gmra.mrb[116].mxu1 %v11655_v1  ;;  %4579 = vmatprep.mubr.bf16.mxu0 %v11706_v11 }
 0x32b   :  { %4652 = vmatprep.mubr.bf16.mxu1 %v11706_v11  ;;  %4678 = vmatpush1.bf16.msra.mxu0 %v10311_v9  ;;  %v10358_v9 = vld [vmem:[%s14599_s3 + $0x5cc] ss:$16 sps:$4 sm:$0xff]  }
 0x32c   :  { %4751 = vmatpush1.bf16.msra.mxu1 %v10312_v24  ;;  %4679 = vmatprep.subr.bf16.mxu0 %v10313_v10  ;;  %v10359_v24 = vld [vmem:[%s14599_s3 + $0x5c0] ss:$16 sps:$4 sm:$0xff]   ;;  %v10360_v10 = vld [vmem:[%s14599_s3 + $0x5c8] ss:$16 sps:$4 sm:$0xff]  }
 0x32d   :  { %4752 = vmatprep.subr.bf16.mxu1 %v10314_v63  ;;  %v10361_v63 = vld [vmem:[%s14599_s3 + $0x5e4] ss:$16 sps:$4 sm:$0xff]  }
 0x32f   :  { %4680 = vmatpush1.bf16.msra.mxu0 %v10315_v23  ;;  %v10362_v23 = vld [vmem:[%s14599_s3 + $0x5ec] ss:$16 sps:$4 sm:$0xff]  }
 0x330   :  { %4753 = vmatpush1.bf16.msra.mxu1 %v10316_v56  ;;  %4681 = vmatprep.subr.bf16.mxu0 %v10317_v33  ;;  %v10363_v56 = vld [vmem:[%s14599_s3 + $0x5e0] ss:$16 sps:$4 sm:$0xff]   ;;  %v10364_v33 = vld [vmem:[%s14599_s3 + $0x5e8] ss:$16 sps:$4 sm:$0xff]  }
 0x331   :  { %4580 = vmatmul.mubr.bf16.gmra.mrb[120].mxu0 %v11699_v20  ;;  %4754 = vmatprep.subr.bf16.mxu1 %v10318_v12  ;;  %v10365_v12 = vld [vmem:[%s14599_s3 + $0x604] ss:$16 sps:$4 sm:$0xff]  }
 0x332   :  { %4653 = vmatmul.mubr.bf16.gmra.mrb[120].mxu1 %v11699_v20  ;;  %4589 = vmatprep.mubr.bf16.mxu0 %v11750_v28 }
 0x333   :  { %4662 = vmatprep.mubr.bf16.mxu1 %v11750_v28  ;;  %4682 = vmatpush1.bf16.msra.mxu0 %v10319_v15  ;;  %v10366_v15 = vld [vmem:[%s14599_s3 + $0x60c] ss:$16 sps:$4 sm:$0xff]  }
 0x334   :  { %4755 = vmatpush1.bf16.msra.mxu1 %v10320_v57  ;;  %4683 = vmatprep.subr.bf16.mxu0 %v10321_v27  ;;  %v10367_v57 = vld [vmem:[%s14599_s3 + $0x600] ss:$16 sps:$4 sm:$0xff]   ;;  %v10368_v27 = vld [vmem:[%s14599_s3 + $0x608] ss:$16 sps:$4 sm:$0xff]  }
 0x335   :  { %4756 = vmatprep.subr.bf16.mxu1 %v10322_v4  ;;  %v10369_v4 = vld [vmem:[%s14599_s3 + $0x624] ss:$16 sps:$4 sm:$0xff]  }
 0x337   :  { %4684 = vmatpush1.bf16.msra.mxu0 %v10323_v49  ;;  %v10371_v49 = vld [vmem:[%s14599_s3 + $0x620] ss:$16 sps:$4 sm:$0xff]  }
 0x338   :  { %4757 = vmatpush1.bf16.msra.mxu1 %v10324_v38  ;;  %4685 = vmatprep.subr.bf16.mxu0 %v10325_v19  ;;  %v10372_v38 = vld [vmem:[%s14599_s3 + $0x628] ss:$16 sps:$4 sm:$0xff]   ;;  %v10373_v19 = vld [vmem:[%s14599_s3 + $0x644] ss:$16 sps:$4 sm:$0xff]  }
 0x339   :  { %4590 = vmatmul.mubr.bf16.gmra.mrb[124].mxu0 %v11743_v22  ;;  %4758 = vmatprep.subr.bf16.mxu1 %v10326_v32  ;;  %v10374_v32 = vld [vmem:[%s14599_s3 + $0x64c] ss:$16 sps:$4 sm:$0xff]  }
 0x33a   :  { %4663 = vmatmul.mubr.bf16.gmra.mrb[124].mxu1 %v11743_v22  ;;  %4705 = vmatprep.mubr.bf16.mxu0 %v11662_v50 }
 0x33b   :  { %4686 = vmatpush1.bf16.msra.mxu0 %v10327_v25  ;;  %4778 = vmatprep.mubr.bf16.mxu1 %v11662_v50  ;;  %v10332_v50 = vld [vmem:[%s14599_s3 + $0x4e8] ss:$16 sps:$4 sm:$0xff]   ;;  %v10375_v25 = vld [vmem:[%s14599_s3 + $0x640] ss:$16 sps:$4 sm:$0xff]  }
 0x33c   :  { %4759 = vmatpush1.bf16.msra.mxu1 %v10328_v5  ;;  %4687 = vmatprep.subr.bf16.mxu0 %v10329_v16  ;;  %v10376_v5 = vld [vmem:[%s14599_s3 + $0x648] ss:$16 sps:$4 sm:$0xff]   ;;  %v10377_v16 = vld [vmem:[%s14599_s3 + $0x664] ss:$16 sps:$4 sm:$0xff]  }
 0x33d   :  { %4760 = vmatprep.subr.bf16.mxu1 %v10330_v14  ;;  %v10378_v14 = vld [vmem:[%s14599_s3 + $0x66c] ss:$16 sps:$4 sm:$0xff]  }
 0x33f   :  { %4688 = vmatpush1.bf16.msra.mxu0 %v10331_v42  ;;  %v10379_v42 = vld [vmem:[%s14599_s3 + $0x660] ss:$16 sps:$4 sm:$0xff]  }
 0x340   :  { %4761 = vmatpush1.bf16.msra.mxu1 %v10332_v50  ;;  %4689 = vmatprep.subr.bf16.mxu0 %v10333_v0  ;;  %v10380_v50 = vld [vmem:[%s14599_s3 + $0x668] ss:$16 sps:$4 sm:$0xff]   ;;  %v10381_v0 = vld [vmem:[%s14599_s3 + $0x684] ss:$16 sps:$4 sm:$0xff]  }
 0x341   :  { %4762 = vmatprep.subr.bf16.mxu1 %v10334_v37  ;;  %v10382_v37 = vld [vmem:[%s14599_s3 + $0x68c] ss:$16 sps:$4 sm:$0xff]  }
 0x343   :  { %4690 = vmatpush1.bf16.msra.mxu0 %v10335_v34 }
 0x344   :  { %4763 = vmatpush1.bf16.msra.mxu1 %v10336_v29  ;;  %4691 = vmatprep.subr.bf16.mxu0 %v10337_v54 }
 0x345   :  { %4764 = vmatprep.subr.bf16.mxu1 %v10338_v40  ;;  %v10383_v40 = vld [vmem:[%s14599_s3 + $0x680] ss:$16 sps:$4 sm:$0xff]  }
 0x347   :  { %4692 = vmatpush1.bf16.msra.mxu0 %v10339_v45 }
 0x348   :  { %4765 = vmatpush1.bf16.msra.mxu1 %v10340_v55  ;;  %4693 = vmatprep.subr.bf16.mxu0 %v10341_v39  ;;  %v10384_v39 = vld [vmem:[%s14599_s3 + $0x688] ss:$16 sps:$4 sm:$0xff]  }
 0x349   :  { %4766 = vmatprep.subr.bf16.mxu1 %v10342_v47  ;;  %v10385_v47 = vld [vmem:[%s14599_s3 + $0x6a4] ss:$16 sps:$4 sm:$0xff]  }
 0x34b   :  { %4694 = vmatpush1.bf16.msra.mxu0 %v10343_v59 }
 0x34c   :  { %4767 = vmatpush1.bf16.msra.mxu1 %v10344_v58  ;;  %4695 = vmatprep.subr.bf16.mxu0 %v10345_v36  ;;  %v10386_v36 = vld [vmem:[%s14599_s3 + $0x6ac] ss:$16 sps:$4 sm:$0xff]  }
 0x34d   :  { %4768 = vmatprep.subr.bf16.mxu1 %v10346_v18 }
 0x34f   :  { %4696 = vmatpush1.bf16.msra.mxu0 %v10347_v60  ;;  %v10387_v60 = vld [vmem:[%s14599_s3 + $0x6a0] ss:$16 sps:$4 sm:$0xff]  }
 0x350   :  { %4769 = vmatpush1.bf16.msra.mxu1 %v10348_v61  ;;  %4697 = vmatprep.subr.bf16.mxu0 %v10349_v26  ;;  %v10388_v61 = vld [vmem:[%s14599_s3 + $0x6a8] ss:$16 sps:$4 sm:$0xff]   ;;  %v10389_v26 = vld [vmem:[%s14599_s3 + $0x6c4] ss:$16 sps:$4 sm:$0xff]  }
 0x351   :  { %4770 = vmatprep.subr.bf16.mxu1 %v10350_v21  ;;  %v10390_v21 = vld [vmem:[%s14599_s3 + $0x6cc] ss:$16 sps:$4 sm:$0xff]  }
 0x353   :  { %4698 = vmatpush1.bf16.msra.mxu0 %v10351_v8 }
 0x354   :  { %4771 = vmatpush1.bf16.msra.mxu1 %v10352_v35  ;;  %4699 = vmatprep.subr.bf16.mxu0 %v10353_v13 }
 0x355   :  { %4772 = vmatprep.subr.bf16.mxu1 %v10354_v46  ;;  %v10391_v46 = vld [vmem:[%s14599_s3 + $0x6c0] ss:$16 sps:$4 sm:$0xff]  }
 0x357   :  { %4700 = vmatpush1.bf16.msra.mxu0 %v10355_v31 }
 0x358   :  { %4773 = vmatpush1.bf16.msra.mxu1 %v10356_v62  ;;  %4701 = vmatprep.subr.bf16.mxu0 %v10357_v53  ;;  %v10392_v53 = vld [vmem:[%s14599_s3 + $0x6c8] ss:$16 sps:$4 sm:$0xff]  }
 0x359   :  { %4774 = vmatprep.subr.bf16.mxu1 %v10358_v9  ;;  %v10393_v9 = vld [vmem:[%s14599_s3 + $0x6e4] ss:$16 sps:$4 sm:$0xff]  }
 0x35b   :  { %4702 = vmatpush1.bf16.msra.mxu0 %v10359_v24 }
 0x35c   :  { %4775 = vmatpush1.bf16.msra.mxu1 %v10360_v10  ;;  %4703 = vmatprep.subr.bf16.mxu0 %v10361_v63 }
 0x35d   :  { %4776 = vmatprep.subr.bf16.mxu1 %v10362_v23  ;;  %v10395_v23 = vld [vmem:[%s14599_s3 + $0x6e0] ss:$16 sps:$4 sm:$0xff]  }
 0x35f   :  { %4704 = vmatpush1.bf16.msra.mxu0 %v10363_v56  ;;  %v10396_v56 = vld [vmem:[%s14599_s3 + $0x6e8] ss:$16 sps:$4 sm:$0xff]  }
 0x360   :  { %4777 = vmatpush1.bf16.msra.mxu1 %v10364_v33  ;;  %4851 = vmatprep.subr.bf16.mxu0 %v10365_v12  ;;  %v10397_v33 = vld [vmem:[%s14599_s3 + $0x704] ss:$16 sps:$4 sm:$0xff]   ;;  %v10398_v12 = vld [vmem:[%s14599_s3 + $0x70c] ss:$16 sps:$4 sm:$0xff]  }
 0x361   :  { %4924 = vmatprep.subr.bf16.mxu1 %v10366_v15 }
 0x362   :  { %4706 = vmatmul.mubr.bf16.vlgmr.msra.gmra.mrb[112].mxu0 %v11655_v1 }
 0x363   :  { %4779 = vmatmul.mubr.bf16.vlgmr.msra.gmra.mrb[112].mxu1 %v11655_v1  ;;  %4715 = vmatprep.mubr.bf16.mxu0 %v11706_v11  ;;  %v10370_v1 = vld [vmem:[%s14599_s3 + $0x62c] ss:$16 sps:$4 sm:$0xff]  }
 0x364   :  { %4788 = vmatprep.mubr.bf16.mxu1 %v11706_v11  ;;  %4852 = vmatpush1.bf16.msra.mxu0 %v10367_v57 }
 0x365   :  { %4925 = vmatpush1.bf16.msra.mxu1 %v10368_v27  ;;  %4853 = vmatprep.subr.bf16.mxu0 %v10369_v4  ;;  %v10399_v4 = vld [vmem:[%s14599_s3 + $0x700] ss:$16 sps:$4 sm:$0xff]  }
 0x366   :  { %4926 = vmatprep.subr.bf16.mxu1 %v10370_v1 }
 0x368   :  { %4854 = vmatpush1.bf16.msra.mxu0 %v10371_v49 }
 0x369   :  { %4927 = vmatpush1.bf16.msra.mxu1 %v10372_v38  ;;  %4855 = vmatprep.subr.bf16.mxu0 %v10373_v19  ;;  %v10400_v38 = vld [vmem:[%s14599_s3 + $0x708] ss:$16 sps:$4 sm:$0xff]   ;;  %v10401_v19 = vld [vmem:[%s14599_s3 + $0x724] ss:$16 sps:$4 sm:$0xff]  }
 0x36a   :  { %4716 = vmatmul.mubr.bf16.gmra.mrb[116].mxu0 %v11699_v20  ;;  %4928 = vmatprep.subr.bf16.mxu1 %v10374_v32 }
 0x36b   :  { %4789 = vmatmul.mubr.bf16.gmra.mrb[116].mxu1 %v11699_v20  ;;  %4725 = vmatprep.mubr.bf16.mxu0 %v11750_v28 }
 0x36c   :  { %4798 = vmatprep.mubr.bf16.mxu1 %v11750_v28  ;;  %4856 = vmatpush1.bf16.msra.mxu0 %v10375_v25 }
 0x36d   :  { %4929 = vmatpush1.bf16.msra.mxu1 %v10376_v5  ;;  %4857 = vmatprep.subr.bf16.mxu0 %v10377_v16  ;;  %v10402_v5 = vld [vmem:[%s14599_s3 + $0x72c] ss:$16 sps:$4 sm:$0xff]  }
 0x36e   :  { %4930 = vmatprep.subr.bf16.mxu1 %v10378_v14  ;;  %v10403_v14 = vld [vmem:[%s14599_s3 + $0x720] ss:$16 sps:$4 sm:$0xff]  }
 0x370   :  { %4858 = vmatpush1.bf16.msra.mxu0 %v10379_v42  ;;  %v10404_v42 = vld [vmem:[%s14599_s3 + $0x728] ss:$16 sps:$4 sm:$0xff]  }
 0x371   :  { %4931 = vmatpush1.bf16.msra.mxu1 %v10380_v50  ;;  %4859 = vmatprep.subr.bf16.mxu0 %v10381_v0  ;;  %v10405_v50 = vld [vmem:[%s14599_s3 + $0x744] ss:$16 sps:$4 sm:$0xff]   ;;  %v10406_v0 = vld [vmem:[%s14599_s3 + $0x74c] ss:$16 sps:$4 sm:$0xff]  }
 0x372   :  { %4726 = vmatmul.mubr.bf16.gmra.mrb[120].mxu0 %v11743_v22  ;;  %4932 = vmatprep.subr.bf16.mxu1 %v10382_v37  ;;  %v13209_v34 = vpop.f32.mrb[96].mxu0 }
 0x373   :  { %4799 = vmatmul.mubr.bf16.gmra.mrb[120].mxu1 %v11743_v22  ;;  %4735 = vmatprep.mubr.bf16.mxu0 %v11796_v30  ;;  %v13213_v29 = vpop.f32.mrb[96].mxu1  ;;  %v13215_v54 = vpop.f32.mrb[97].mxu0 }
 0x374   :  { %4808 = vmatprep.mubr.bf16.mxu1 %v11796_v30  ;;  %4860 = vmatpush1.bf16.msra.mxu0 %v10383_v40  ;;  %v13221_v45 = vpop.f32.mrb[97].mxu1  ;;  %v13223_v55 = vpop.f32.mrb[98].mxu0 }
 0x375   :  { %4933 = vmatpush1.bf16.msra.mxu1 %v10384_v39  ;;  %4861 = vmatprep.subr.bf16.mxu0 %v10385_v47  ;;  %v13231_v59 = vpop.f32.mrb[98].mxu1  ;;  %v13233_v58 = vpop.f32.mrb[99].mxu0  ;;  %v10407_v47 = vld [vmem:[%s14599_s3 + $0x740] ss:$16 sps:$4 sm:$0xff]  }
 0x376   :  { %4934 = vmatprep.subr.bf16.mxu1 %v10386_v36  ;;  %v13238_v18 = vpop.f32.mrb[99].mxu1 }
 0x378   :  { %4862 = vmatpush1.bf16.msra.mxu0 %v10387_v60 }
 0x379   :  { %4935 = vmatpush1.bf16.msra.mxu1 %v10388_v61  ;;  %4863 = vmatprep.subr.bf16.mxu0 %v10389_v26  ;;  %v10408_v61 = vld [vmem:[%s14599_s3 + $0x748] ss:$16 sps:$4 sm:$0xff]   ;;  %v10409_v26 = vld [vmem:[%s14599_s3 + $0x764] ss:$16 sps:$4 sm:$0xff]  }
 0x37a   :  { %4736 = vmatmul.mubr.bf16.gmra.mrb[124].mxu0 %v11792_v51  ;;  %4936 = vmatprep.subr.bf16.mxu1 %v10390_v21  ;;  %v13253_v8 = vpop.f32.mrb[100].mxu0 }
 0x37b   :  { %4809 = vmatmul.mubr.bf16.gmra.mrb[124].mxu1 %v11792_v51  ;;  %4883 = vmatprep.mubr.bf16.mxu0 %v14651_v52  ;;  %v13257_v35 = vpop.f32.mrb[100].mxu1  ;;  %v13259_v13 = vpop.f32.mrb[101].mxu0 }
 0x37c   :  { %4864 = vmatpush1.bf16.msra.mxu0 %v10391_v46  ;;  %4956 = vmatprep.mubr.bf16.mxu1 %v14651_v52  ;;  %v13265_v31 = vpop.f32.mrb[101].mxu1  ;;  %v13267_v62 = vpop.f32.mrb[102].mxu0  ;;  %v10394_v52 = vld [vmem:[%s14599_s3 + $0x6ec] ss:$16 sps:$4 sm:$0xff]  }
 0x37d   :  { %4937 = vmatpush1.bf16.msra.mxu1 %v10392_v53  ;;  %4865 = vmatprep.subr.bf16.mxu0 %v10393_v9  ;;  %v13275_v24 = vpop.f32.mrb[102].mxu1  ;;  %v13277_v10 = vpop.f32.mrb[103].mxu0  ;;  %v10410_v53 = vld [vmem:[%s14599_s3 + $0x76c] ss:$16 sps:$4 sm:$0xff]  }
 0x37e   :  { %4938 = vmatprep.subr.bf16.mxu1 %v10394_v52  ;;  %v13282_v63 = vpop.f32.mrb[103].mxu1  ;;  %v10411_v52 = vld [vmem:[%s14599_s3 + $0x760] ss:$16 sps:$4 sm:$0xff]  }
 0x380   :  { %4866 = vmatpush1.bf16.msra.mxu0 %v10395_v23  ;;  %v10412_v23 = vld [vmem:[%s14599_s3 + $0x768] ss:$16 sps:$4 sm:$0xff]  }
 0x381   :  { %4939 = vmatpush1.bf16.msra.mxu1 %v10396_v56  ;;  %4867 = vmatprep.subr.bf16.mxu0 %v10397_v33  ;;  %v10413_v56 = vld [vmem:[%s14599_s3 + $0x784] ss:$16 sps:$4 sm:$0xff]   ;;  %v10414_v33 = vld [vmem:[%s14599_s3 + $0x78c] ss:$16 sps:$4 sm:$0xff]  }
 0x382   :  { %4940 = vmatprep.subr.bf16.mxu1 %v10398_v12  ;;  %v13296_v15 = vpop.f32.mrb[104].mxu0  ;;  %v10415_v12 = vld [vmem:[%s14599_s3 + $0x780] ss:$16 sps:$4 sm:$0xff]  }
 0x383   :  { %v13298_v57 = vpop.f32.mrb[104].mxu1  ;;  %v13300_v27 = vpop.f32.mrb[105].mxu0 }
 0x384   :  { %4868 = vmatpush1.bf16.msra.mxu0 %v10399_v4  ;;  %v13305_v1 = vpop.f32.mrb[105].mxu1  ;;  %v13307_v49 = vpop.f32.mrb[106].mxu0  ;;  %v10416_v4 = vld [vmem:[%s14599_s3 + $0x788] ss:$16 sps:$4 sm:$0xff]  }
 0x385   :  { %4941 = vmatpush1.bf16.msra.mxu1 %v10400_v38  ;;  %4869 = vmatprep.subr.bf16.mxu0 %v10401_v19  ;;  %v13315_v32 = vpop.f32.mrb[106].mxu1  ;;  %v13317_v25 = vpop.f32.mrb[107].mxu0  ;;  %v10417_v38 = vld [vmem:[%s14599_s3 + $0x7a4] ss:$16 sps:$4 sm:$0xff]   ;;  %v10418_v19 = vld [vmem:[%s14599_s3 + $0x7ac] ss:$16 sps:$4 sm:$0xff]  }
 0x386   :  { %4942 = vmatprep.subr.bf16.mxu1 %v10402_v5  ;;  %v13322_v16 = vpop.f32.mrb[107].mxu1  ;;  %v10419_v5 = vld [vmem:[%s14599_s3 + $0x7a0] ss:$16 sps:$4 sm:$0xff]  }
 0x388   :  { %4870 = vmatpush1.bf16.msra.mxu0 %v10403_v14  ;;  %v10420_v14 = vld [vmem:[%s14599_s3 + $0x7a8] ss:$16 sps:$4 sm:$0xff]  }
 0x389   :  { %4943 = vmatpush1.bf16.msra.mxu1 %v10404_v42  ;;  %4871 = vmatprep.subr.bf16.mxu0 %v10405_v50  ;;  %v10421_v42 = vld [vmem:[%s14599_s3 + $0x7c4] ss:$16 sps:$4 sm:$0xff]   ;;  %v10422_v50 = vld [vmem:[%s14599_s3 + $0x7cc] ss:$16 sps:$4 sm:$0xff]  }
 0x38a   :  { %4944 = vmatprep.subr.bf16.mxu1 %v10406_v0  ;;  %v13336_v37 = vpop.f32.mrb[108].mxu0  ;;  %v10423_v0 = vld [vmem:[%s14599_s3 + $0x7c0] ss:$16 sps:$4 sm:$0xff]  }
 0x38b   :  { %v13338_v40 = vpop.f32.mrb[108].mxu1  ;;  %v13340_v39 = vpop.f32.mrb[109].mxu0 }
 0x38c   :  { %4872 = vmatpush1.bf16.msra.mxu0 %v10407_v47  ;;  %v13345_v36 = vpop.f32.mrb[109].mxu1  ;;  %v13347_v60 = vpop.f32.mrb[110].mxu0  ;;  %v10424_v47 = vld [vmem:[%s14599_s3 + $0x7c8] ss:$16 sps:$4 sm:$0xff]  }
 0x38d   :  { %4945 = vmatpush1.bf16.msra.mxu1 %v10408_v61  ;;  %4873 = vmatprep.subr.bf16.mxu0 %v10409_v26  ;;  %v13355_v21 = vpop.f32.mrb[110].mxu1  ;;  %v13357_v46 = vpop.f32.mrb[111].mxu0  ;;  %v10425_v61 = vld [vmem:[%s14599_s3 + $0x7e4] ss:$16 sps:$4 sm:$0xff]   ;;  %v10426_v26 = vld [vmem:[%s14599_s3 + $0x7ec] ss:$16 sps:$4 sm:$0xff]  }
 0x38e   :  { %4946 = vmatprep.subr.bf16.mxu1 %v10410_v53  ;;  %v13362_v9 = vpop.f32.mrb[111].mxu1  ;;  %v10427_v53 = vld [vmem:[%s14599_s3 + $0x7e0] ss:$16 sps:$4 sm:$0xff]  }
 0x390   :  { %4874 = vmatpush1.bf16.msra.mxu0 %v10411_v52  ;;  %v10428_v52 = vld [vmem:[%s14599_s3 + $0x7e8] ss:$16 sps:$4 sm:$0xff]  }
 0x391   :  { %4947 = vmatpush1.bf16.msra.mxu1 %v10412_v23  ;;  %4875 = vmatprep.subr.bf16.mxu0 %v10413_v56  ;;  %v10429_v23 = vld [vmem:[%s14599_s3 + $0x804] ss:$16 sps:$4 sm:$0xff]   ;;  %v10430_v56 = vld [vmem:[%s14599_s3 + $0x80c] ss:$16 sps:$4 sm:$0xff]  }
 0x392   :  { %4948 = vmatprep.subr.bf16.mxu1 %v10414_v33  ;;  %v10431_v33 = vld [vmem:[%s14599_s3 + $0x800] ss:$16 sps:$4 sm:$0xff]  }
 0x394   :  { %4876 = vmatpush1.bf16.msra.mxu0 %v10415_v12  ;;  %v10432_v12 = vld [vmem:[%s14599_s3 + $0x808] ss:$16 sps:$4 sm:$0xff]  }
 0x395   :  { %4949 = vmatpush1.bf16.msra.mxu1 %v10416_v4  ;;  %4877 = vmatprep.subr.bf16.mxu0 %v10417_v38  ;;  %v10433_v4 = vld [vmem:[%s14599_s3 + $0x824] ss:$16 sps:$4 sm:$0xff]   ;;  %v10436_v38 = vld [vmem:[%s14599_s3 + $0x828] ss:$16 sps:$4 sm:$0xff]  }
 0x396   :  { %4950 = vmatprep.subr.bf16.mxu1 %v10418_v19  ;;  %v10437_v19 = vld [vmem:[%s14599_s3 + $0x844] ss:$16 sps:$4 sm:$0xff]  }
 0x398   :  { %4878 = vmatpush1.bf16.msra.mxu0 %v10419_v5  ;;  %v10438_v5 = vld [vmem:[%s14599_s3 + $0x84c] ss:$16 sps:$4 sm:$0xff]  }
 0x399   :  { %4951 = vmatpush1.bf16.msra.mxu1 %v10420_v14  ;;  %4879 = vmatprep.subr.bf16.mxu0 %v10421_v42  ;;  %v10439_v14 = vld [vmem:[%s14599_s3 + $0x840] ss:$16 sps:$4 sm:$0xff]   ;;  %v10440_v42 = vld [vmem:[%s14599_s3 + $0x848] ss:$16 sps:$4 sm:$0xff]  }
 0x39a   :  { %4952 = vmatprep.subr.bf16.mxu1 %v10422_v50  ;;  %v10441_v50 = vld [vmem:[%s14599_s3 + $0x864] ss:$16 sps:$4 sm:$0xff]  }
 0x39c   :  { %4880 = vmatpush1.bf16.msra.mxu0 %v10423_v0  ;;  %v10444_v0 = vld [vmem:[%s14599_s3 + $0x868] ss:$16 sps:$4 sm:$0xff]  }
 0x39d   :  { %4953 = vmatpush1.bf16.msra.mxu1 %v10424_v47  ;;  %4881 = vmatprep.subr.bf16.mxu0 %v10425_v61  ;;  %v10445_v47 = vld [vmem:[%s14599_s3 + $0x884] ss:$16 sps:$4 sm:$0xff]   ;;  %v10446_v61 = vld [vmem:[%s14599_s3 + $0x88c] ss:$16 sps:$4 sm:$0xff]  }
 0x39e   :  { %4954 = vmatprep.subr.bf16.mxu1 %v10426_v26  ;;  %v10447_v26 = vld [vmem:[%s14599_s3 + $0x880] ss:$16 sps:$4 sm:$0xff]  }
 0x3a0   :  { %4882 = vmatpush1.bf16.msra.mxu0 %v10427_v53  ;;  %v10448_v53 = vld [vmem:[%s14599_s3 + $0x888] ss:$16 sps:$4 sm:$0xff]  }
 0x3a1   :  { %4955 = vmatpush1.bf16.msra.mxu1 %v10428_v52  ;;  %5029 = vmatprep.subr.bf16.mxu0 %v10429_v23  ;;  %v10449_v52 = vld [vmem:[%s14599_s3 + $0x8a4] ss:$16 sps:$4 sm:$0xff]   ;;  %v10452_v23 = vld [vmem:[%s14599_s3 + $0x8a8] ss:$16 sps:$4 sm:$0xff]  }
 0x3a2   :  { %5102 = vmatprep.subr.bf16.mxu1 %v10430_v56  ;;  %v10453_v56 = vld [vmem:[%s14599_s3 + $0x8c4] ss:$16 sps:$4 sm:$0xff]  }
 0x3a3   :  { %4884 = vmatmul.mubr.bf16.vlgmr.msra.gmra.mrb[112].mxu0 %v14652_v41 }
 0x3a4   :  { %4957 = vmatmul.mubr.bf16.vlgmr.msra.gmra.mrb[112].mxu1 %v14652_v41  ;;  %4893 = vmatprep.mubr.bf16.mxu0 %v14653_v43  ;;  %v10434_v41 = vld [vmem:[%s14599_s3 + $0x82c] ss:$16 sps:$4 sm:$0xff]  }
 0x3a5   :  { %4966 = vmatprep.mubr.bf16.mxu1 %v14653_v43  ;;  %5030 = vmatpush1.bf16.msra.mxu0 %v10431_v33  ;;  %v10435_v43 = vld [vmem:[%s14599_s3 + $0x820] ss:$16 sps:$4 sm:$0xff]   ;;  %v10454_v33 = vld [vmem:[%s14599_s3 + $0x8cc] ss:$16 sps:$4 sm:$0xff]  }
 0x3a6   :  { %5103 = vmatpush1.bf16.msra.mxu1 %v10432_v12  ;;  %5031 = vmatprep.subr.bf16.mxu0 %v10433_v4  ;;  %v10455_v12 = vld [vmem:[%s14599_s3 + $0x8c0] ss:$16 sps:$4 sm:$0xff]   ;;  %v10456_v4 = vld [vmem:[%s14599_s3 + $0x8c8] ss:$16 sps:$4 sm:$0xff]  }
 0x3a7   :  { %5104 = vmatprep.subr.bf16.mxu1 %v10434_v41  ;;  %v10457_v41 = vld [vmem:[%s14599_s3 + $0x8e4] ss:$16 sps:$4 sm:$0xff]  }
 0x3a9   :  { %5032 = vmatpush1.bf16.msra.mxu0 %v10435_v43  ;;  %v10459_v43 = vld [vmem:[%s14599_s3 + $0x8e0] ss:$16 sps:$4 sm:$0xff]  }
 0x3aa   :  { %5105 = vmatpush1.bf16.msra.mxu1 %v10436_v38  ;;  %5033 = vmatprep.subr.bf16.mxu0 %v10437_v19  ;;  %v10461_v38 = vld [vmem:[%s14599_s3 + $0x904] ss:$16 sps:$4 sm:$0xff]   ;;  %v10462_v19 = vld [vmem:[%s14599_s3 + $0x90c] ss:$16 sps:$4 sm:$0xff]  }
 0x3ab   :  { %4894 = vmatmul.mubr.bf16.gmra.mrb[116].mxu0 %v14654_v48  ;;  %5106 = vmatprep.subr.bf16.mxu1 %v10438_v5  ;;  %v10463_v5 = vld [vmem:[%s14599_s3 + $0x900] ss:$16 sps:$4 sm:$0xff]  }
 0x3ac   :  { %4967 = vmatmul.mubr.bf16.gmra.mrb[116].mxu1 %v14654_v48  ;;  %4903 = vmatprep.mubr.bf16.mxu0 %v14655_v6  ;;  %v10442_v48 = vld [vmem:[%s14599_s3 + $0x86c] ss:$16 sps:$4 sm:$0xff]  }
 0x3ad   :  { %4976 = vmatprep.mubr.bf16.mxu1 %v14655_v6  ;;  %5034 = vmatpush1.bf16.msra.mxu0 %v10439_v14  ;;  %v10443_v6 = vld [vmem:[%s14599_s3 + $0x860] ss:$16 sps:$4 sm:$0xff]   ;;  %v10464_v14 = vld [vmem:[%s14599_s3 + $0x908] ss:$16 sps:$4 sm:$0xff]  }
 0x3ae   :  { %5107 = vmatpush1.bf16.msra.mxu1 %v10440_v42  ;;  %5035 = vmatprep.subr.bf16.mxu0 %v10441_v50  ;;  %v10465_v42 = vld [vmem:[%s14599_s3 + $0x924] ss:$16 sps:$4 sm:$0xff]   ;;  %v10466_v50 = vld [vmem:[%s14599_s3 + $0x92c] ss:$16 sps:$4 sm:$0xff]  }
 0x3af   :  { %5108 = vmatprep.subr.bf16.mxu1 %v10442_v48  ;;  %v10467_v48 = vld [vmem:[%s14599_s3 + $0x920] ss:$16 sps:$4 sm:$0xff]  }
 0x3b1   :  { %5036 = vmatpush1.bf16.msra.mxu0 %v10443_v6  ;;  %v10468_v6 = vld [vmem:[%s14599_s3 + $0x928] ss:$16 sps:$4 sm:$0xff]  }
 0x3b2   :  { %5109 = vmatpush1.bf16.msra.mxu1 %v10444_v0  ;;  %5037 = vmatprep.subr.bf16.mxu0 %v10445_v47  ;;  %v10469_v0 = vld [vmem:[%s14599_s3 + $0x944] ss:$16 sps:$4 sm:$0xff]   ;;  %v10470_v47 = vld [vmem:[%s14599_s3 + $0x94c] ss:$16 sps:$4 sm:$0xff]  }
 0x3b3   :  { %4904 = vmatmul.mubr.bf16.gmra.mrb[120].mxu0 %v14656_v17  ;;  %5110 = vmatprep.subr.bf16.mxu1 %v10446_v61  ;;  %v10471_v61 = vld [vmem:[%s14599_s3 + $0x940] ss:$16 sps:$4 sm:$0xff]  }
 0x3b4   :  { %4977 = vmatmul.mubr.bf16.gmra.mrb[120].mxu1 %v14656_v17  ;;  %4913 = vmatprep.mubr.bf16.mxu0 %v14657_v7  ;;  %v10450_v17 = vld [vmem:[%s14599_s3 + $0x8ac] ss:$16 sps:$4 sm:$0xff]  }
 0x3b5   :  { %4986 = vmatprep.mubr.bf16.mxu1 %v14657_v7  ;;  %5038 = vmatpush1.bf16.msra.mxu0 %v10447_v26  ;;  %v10451_v7 = vld [vmem:[%s14599_s3 + $0x8a0] ss:$16 sps:$4 sm:$0xff]   ;;  %v10472_v26 = vld [vmem:[%s14599_s3 + $0x948] ss:$16 sps:$4 sm:$0xff]  }
 0x3b6   :  { %5111 = vmatpush1.bf16.msra.mxu1 %v10448_v53  ;;  %5039 = vmatprep.subr.bf16.mxu0 %v10449_v52  ;;  %v10473_v53 = vld [vmem:[%s14599_s3 + $0x964] ss:$16 sps:$4 sm:$0xff]   ;;  %v10474_v52 = vld [vmem:[%s14599_s3 + $0x96c] ss:$16 sps:$4 sm:$0xff]  }
 0x3b7   :  { %5112 = vmatprep.subr.bf16.mxu1 %v10450_v17  ;;  %v10475_v17 = vld [vmem:[%s14599_s3 + $0x960] ss:$16 sps:$4 sm:$0xff]  }
 0x3b9   :  { %5040 = vmatpush1.bf16.msra.mxu0 %v10451_v7  ;;  %v10476_v7 = vld [vmem:[%s14599_s3 + $0x968] ss:$16 sps:$4 sm:$0xff]  }
 0x3ba   :  { %5113 = vmatpush1.bf16.msra.mxu1 %v10452_v23  ;;  %5041 = vmatprep.subr.bf16.mxu0 %v10453_v56  ;;  %v10477_v23 = vld [vmem:[%s14599_s3 + $0x984] ss:$16 sps:$4 sm:$0xff]   ;;  %v10478_v56 = vld [vmem:[%s14599_s3 + $0x98c] ss:$16 sps:$4 sm:$0xff]  }
 0x3bb   :  { %4914 = vmatmul.mubr.bf16.gmra.mrb[124].mxu0 %v14658_v44  ;;  %5114 = vmatprep.subr.bf16.mxu1 %v10454_v33  ;;  %v10479_v33 = vld [vmem:[%s14599_s3 + $0x980] ss:$16 sps:$4 sm:$0xff]  }
 0x3bc   :  { %4987 = vmatmul.mubr.bf16.gmra.mrb[124].mxu1 %v14658_v44  ;;  %5061 = vmatprep.mubr.bf16.mxu0 %v11706_v11  ;;  %v10458_v44 = vld [vmem:[%s14599_s3 + $0x8ec] ss:$16 sps:$4 sm:$0xff]  }
 0x3bd   :  { %5042 = vmatpush1.bf16.msra.mxu0 %v10455_v12  ;;  %5134 = vmatprep.mubr.bf16.mxu1 %v11706_v11  ;;  %v10460_v11 = vld [vmem:[%s14599_s3 + $0x8e8] ss:$16 sps:$4 sm:$0xff]  }
 0x3be   :  { %5115 = vmatpush1.bf16.msra.mxu1 %v10456_v4  ;;  %5043 = vmatprep.subr.bf16.mxu0 %v10457_v41  ;;  %v10480_v12 = vld [vmem:[%s14599_s3 + $0x988] ss:$16 sps:$4 sm:$0xff]   ;;  %v10481_v4 = vld [vmem:[%s14599_s3 + $0x9a4] ss:$16 sps:$4 sm:$0xff]   ;;  %v10482_v41 = vld [vmem:[%s14599_s3 + $0x9ac] ss:$16 sps:$4 sm:$0xff]  }
 0x3bf   :  { %5116 = vmatprep.subr.bf16.mxu1 %v10458_v44  ;;  %v10483_v44 = vld [vmem:[%s14599_s3 + $0x9a0] ss:$16 sps:$4 sm:$0xff]  }
 0x3c1   :  { %5044 = vmatpush1.bf16.msra.mxu0 %v10459_v43  ;;  %v10484_v43 = vld [vmem:[%s14599_s3 + $0x9a8] ss:$16 sps:$4 sm:$0xff]  }
 0x3c2   :  { %5117 = vmatpush1.bf16.msra.mxu1 %v10460_v11  ;;  %5045 = vmatprep.subr.bf16.mxu0 %v10461_v38  ;;  %v10485_v11 = vld [vmem:[%s14599_s3 + $0x9c4] ss:$16 sps:$4 sm:$0xff]   ;;  %v10486_v38 = vld [vmem:[%s14599_s3 + $0x9cc] ss:$16 sps:$4 sm:$0xff]  }
 0x3c3   :  { %5118 = vmatprep.subr.bf16.mxu1 %v10462_v19  ;;  %v9751_v19 = vld [vmem:[%s14601_s5 + $0x204] ss:$16 sps:$4 sm:$0xff]  }
 0x3c5   :  { %5046 = vmatpush1.bf16.msra.mxu0 %v10463_v5  ;;  %v10487_v5 = vld [vmem:[%s14599_s3 + $0x9c0] ss:$16 sps:$4 sm:$0xff]  }
 0x3c6   :  { %5119 = vmatpush1.bf16.msra.mxu1 %v10464_v14  ;;  %5047 = vmatprep.subr.bf16.mxu0 %v10465_v42  ;;  %v9754_v14 = vld [vmem:[%s14601_s5 + $0x20c] ss:$16 sps:$4 sm:$0xff]   ;;  %v10488_v42 = vld [vmem:[%s14599_s3 + $0x9c8] ss:$16 sps:$4 sm:$0xff]  }
 0x3c7   :  { %5120 = vmatprep.subr.bf16.mxu1 %v10466_v50  ;;  %v10489_v50 = vld [vmem:[%s14599_s3 + $0x9e4] ss:$16 sps:$4 sm:$0xff]  }
 0x3c9   :  { %5048 = vmatpush1.bf16.msra.mxu0 %v10467_v48  ;;  %v10490_v48 = vld [vmem:[%s14599_s3 + $0x9ec] ss:$16 sps:$4 sm:$0xff]  }
 0x3ca   :  { %5121 = vmatpush1.bf16.msra.mxu1 %v10468_v6  ;;  %5049 = vmatprep.subr.bf16.mxu0 %v10469_v0  ;;  %v10491_v6 = vld [vmem:[%s14599_s3 + $0x9e0] ss:$16 sps:$4 sm:$0xff]   ;;  %v10492_v0 = vld [vmem:[%s14599_s3 + $0x9e8] ss:$16 sps:$4 sm:$0xff]  }
 0x3cb   :  { %5122 = vmatprep.subr.bf16.mxu1 %v10470_v47  ;;  %v9749_v47 = vld [vmem:[%s14601_s5 + $0x200] ss:$16 sps:$4 sm:$0xff]  }
 0x3cd   :  { %5050 = vmatpush1.bf16.msra.mxu0 %v10471_v61  ;;  %v9752_v61 = vld [vmem:[%s14601_s5 + $0x208] ss:$16 sps:$4 sm:$0xff]  }
 0x3ce   :  { %5123 = vmatpush1.bf16.msra.mxu1 %v10472_v26  ;;  %5051 = vmatprep.subr.bf16.mxu0 %v10473_v53  ;;  %v9757_v26 = vld [vmem:[%s14601_s5 + $0x224] ss:$16 sps:$4 sm:$0xff]   ;;  %v9760_v53 = vld [vmem:[%s14601_s5 + $0x22c] ss:$16 sps:$4 sm:$0xff]  }
 0x3cf   :  { %5124 = vmatprep.subr.bf16.mxu1 %v10474_v52  ;;  %v9755_v52 = vld [vmem:[%s14601_s5 + $0x220] ss:$16 sps:$4 sm:$0xff]  }
 0x3d1   :  { %5052 = vmatpush1.bf16.msra.mxu0 %v10475_v17  ;;  %v9758_v17 = vld [vmem:[%s14601_s5 + $0x228] ss:$16 sps:$4 sm:$0xff]  }
 0x3d2   :  { %5125 = vmatpush1.bf16.msra.mxu1 %v10476_v7  ;;  %5053 = vmatprep.subr.bf16.mxu0 %v10477_v23  ;;  %v9763_v7 = vld [vmem:[%s14601_s5 + $0x244] ss:$16 sps:$4 sm:$0xff]   ;;  %v9764_v23 = vld [vmem:[%s14601_s5 + $0x248] ss:$16 sps:$4 sm:$0xff]  }
 0x3d3   :  { %5126 = vmatprep.subr.bf16.mxu1 %v10478_v56  ;;  %v9769_v56 = vld [vmem:[%s14601_s5 + $0x264] ss:$16 sps:$4 sm:$0xff]  }
 0x3d5   :  { %5054 = vmatpush1.bf16.msra.mxu0 %v10479_v33  ;;  %v9772_v33 = vld [vmem:[%s14601_s5 + $0x26c] ss:$16 sps:$4 sm:$0xff]  }
 0x3d6   :  { %5127 = vmatpush1.bf16.msra.mxu1 %v10480_v12  ;;  %5055 = vmatprep.subr.bf16.mxu0 %v10481_v4  ;;  %v9767_v12 = vld [vmem:[%s14601_s5 + $0x260] ss:$16 sps:$4 sm:$0xff]   ;;  %v9770_v4 = vld [vmem:[%s14601_s5 + $0x268] ss:$16 sps:$4 sm:$0xff]  }
 0x3d7   :  { %5128 = vmatprep.subr.bf16.mxu1 %v10482_v41  ;;  %v9775_v41 = vld [vmem:[%s14601_s5 + $0x284] ss:$16 sps:$4 sm:$0xff]  }
 0x3d9   :  { %5056 = vmatpush1.bf16.msra.mxu0 %v10483_v44  ;;  %v9776_v44 = vld [vmem:[%s14601_s5 + $0x288] ss:$16 sps:$4 sm:$0xff]  }
 0x3da   :  { %5129 = vmatpush1.bf16.msra.mxu1 %v10484_v43  ;;  %5057 = vmatprep.subr.bf16.mxu0 %v10485_v11  ;;  %v9781_v43 = vld [vmem:[%s14601_s5 + $0x2a4] ss:$16 sps:$4 sm:$0xff]   ;;  %v9784_v11 = vld [vmem:[%s14601_s5 + $0x2ac] ss:$16 sps:$4 sm:$0xff]  }
 0x3db   :  { %5130 = vmatprep.subr.bf16.mxu1 %v10486_v38  ;;  %v9779_v38 = vld [vmem:[%s14601_s5 + $0x2a0] ss:$16 sps:$4 sm:$0xff]  }
 0x3dd   :  { %5058 = vmatpush1.bf16.msra.mxu0 %v10487_v5  ;;  %v9787_v5 = vld [vmem:[%s14601_s5 + $0x2c4] ss:$16 sps:$4 sm:$0xff]  }
 0x3de   :  { %5131 = vmatpush1.bf16.msra.mxu1 %v10488_v42  ;;  %5059 = vmatprep.subr.bf16.mxu0 %v10489_v50  ;;  %v9793_v42 = vld [vmem:[%s14601_s5 + $0x2e4] ss:$16 sps:$4 sm:$0xff]   ;;  %v9796_v50 = vld [vmem:[%s14601_s5 + $0x2ec] ss:$16 sps:$4 sm:$0xff]  }
 0x3df   :  { %5132 = vmatprep.subr.bf16.mxu1 %v10490_v48  ;;  %v9791_v48 = vld [vmem:[%s14601_s5 + $0x2e0] ss:$16 sps:$4 sm:$0xff]  }
 0x3e1   :  { %5060 = vmatpush1.bf16.msra.mxu0 %v10491_v6  ;;  %v9794_v6 = vld [vmem:[%s14601_s5 + $0x2e8] ss:$16 sps:$4 sm:$0xff]  }
 0x3e2   :  { %5133 = vmatpush1.bf16.msra.mxu1 %v10492_v0  ;;  %5755 = vmatprep.subr.bf16.mxu0 %v9751_v19  ;;  %v9782_v19 = vld [vmem:[%s14601_s5 + $0x2a8] ss:$16 sps:$4 sm:$0xff]   ;;  %v9799_v0 = vld [vmem:[%s14601_s5 + $0x304] ss:$16 sps:$4 sm:$0xff]  }
 0x3e3   :  { %5798 = vmatprep.subr.bf16.mxu1 %v9754_v14  ;;  %v9788_v14 = vld [vmem:[%s14601_s5 + $0x2c8] ss:$16 sps:$4 sm:$0xff]  }
 0x3e4   :  { %5062 = vmatmul.mubr.bf16.vlgmr.msra.gmra.mrb[112].mxu0 %v11699_v20 }
 0x3e5   :  { %5135 = vmatmul.mubr.bf16.vlgmr.msra.gmra.mrb[112].mxu1 %v11699_v20  ;;  %5071 = vmatprep.mubr.bf16.mxu0 %v11750_v28  ;;  %v9766_v20 = vld [vmem:[%s14601_s5 + $0x24c] ss:$16 sps:$4 sm:$0xff]  }
 0x3e6   :  { %5144 = vmatprep.mubr.bf16.mxu1 %v11750_v28  ;;  %5756 = vmatpush1.bf16.msra.mxu0 %v9749_v47  ;;  %v9761_v28 = vld [vmem:[%s14601_s5 + $0x240] ss:$16 sps:$4 sm:$0xff]  }
 0x3e7   :  { %5799 = vmatpush1.bf16.msra.mxu1 %v9752_v61  ;;  %5757 = vmatprep.subr.bf16.mxu0 %v9757_v26  ;;  %v9797_v47 = vld [vmem:[%s14601_s5 + $0x300] ss:$16 sps:$4 sm:$0xff]   ;;  %v9800_v61 = vld [vmem:[%s14601_s5 + $0x308] ss:$16 sps:$4 sm:$0xff]   ;;  %v9805_v26 = vld [vmem:[%s14601_s5 + $0x324] ss:$16 sps:$4 sm:$0xff]  }
 0x3e8   :  { %5800 = vmatprep.subr.bf16.mxu1 %v9760_v53  ;;  %v9808_v53 = vld [vmem:[%s14601_s5 + $0x32c] ss:$16 sps:$4 sm:$0xff]  }
 0x3ea   :  { %5758 = vmatpush1.bf16.msra.mxu0 %v9755_v52  ;;  %v9803_v52 = vld [vmem:[%s14601_s5 + $0x320] ss:$16 sps:$4 sm:$0xff]  }
 0x3eb   :  { %5801 = vmatpush1.bf16.msra.mxu1 %v9758_v17  ;;  %5759 = vmatprep.subr.bf16.mxu0 %v9763_v7  ;;  %v9806_v17 = vld [vmem:[%s14601_s5 + $0x328] ss:$16 sps:$4 sm:$0xff]   ;;  %v9811_v7 = vld [vmem:[%s14601_s5 + $0x344] ss:$16 sps:$4 sm:$0xff]  }
 0x3ec   :  { %5072 = vmatmul.mubr.bf16.gmra.mrb[116].mxu0 %v11743_v22  ;;  %5802 = vmatprep.subr.bf16.mxu1 %v9766_v20  ;;  %v9814_v20 = vld [vmem:[%s14601_s5 + $0x34c] ss:$16 sps:$4 sm:$0xff]  }
 0x3ed   :  { %5145 = vmatmul.mubr.bf16.gmra.mrb[116].mxu1 %v11743_v22  ;;  %5081 = vmatprep.mubr.bf16.mxu0 %v11796_v30  ;;  %v9778_v22 = vld [vmem:[%s14601_s5 + $0x28c] ss:$16 sps:$4 sm:$0xff]  }
 0x3ee   :  { %5154 = vmatprep.mubr.bf16.mxu1 %v11796_v30  ;;  %5760 = vmatpush1.bf16.msra.mxu0 %v9761_v28  ;;  %v9773_v30 = vld [vmem:[%s14601_s5 + $0x280] ss:$16 sps:$4 sm:$0xff]  }
 0x3ef   :  { %5803 = vmatpush1.bf16.msra.mxu1 %v9764_v23  ;;  %5761 = vmatprep.subr.bf16.mxu0 %v9769_v56  ;;  %v9809_v28 = vld [vmem:[%s14601_s5 + $0x340] ss:$16 sps:$4 sm:$0xff]   ;;  %v9812_v23 = vld [vmem:[%s14601_s5 + $0x348] ss:$16 sps:$4 sm:$0xff]   ;;  %v9817_v56 = vld [vmem:[%s14601_s5 + $0x364] ss:$16 sps:$4 sm:$0xff]  }
 0x3f0   :  { %5804 = vmatprep.subr.bf16.mxu1 %v9772_v33  ;;  %v9820_v33 = vld [vmem:[%s14601_s5 + $0x36c] ss:$16 sps:$4 sm:$0xff]  }
 0x3f2   :  { %5762 = vmatpush1.bf16.msra.mxu0 %v9767_v12  ;;  %v9815_v12 = vld [vmem:[%s14601_s5 + $0x360] ss:$16 sps:$4 sm:$0xff]  }
 0x3f3   :  { %5805 = vmatpush1.bf16.msra.mxu1 %v9770_v4  ;;  %5763 = vmatprep.subr.bf16.mxu0 %v9775_v41  ;;  %v9818_v4 = vld [vmem:[%s14601_s5 + $0x368] ss:$16 sps:$4 sm:$0xff]   ;;  %v9823_v41 = vld [vmem:[%s14601_s5 + $0x384] ss:$16 sps:$4 sm:$0xff]  }
 0x3f4   :  { %5082 = vmatmul.mubr.bf16.gmra.mrb[120].mxu0 %v11792_v51  ;;  %5806 = vmatprep.subr.bf16.mxu1 %v9778_v22  ;;  %v9826_v22 = vld [vmem:[%s14601_s5 + $0x38c] ss:$16 sps:$4 sm:$0xff]  }
 0x3f5   :  { %5155 = vmatmul.mubr.bf16.gmra.mrb[120].mxu1 %v11792_v51  ;;  %5091 = vmatprep.mubr.bf16.mxu0 %v11833_v2  ;;  %v9790_v51 = vld [vmem:[%s14601_s5 + $0x2cc] ss:$16 sps:$4 sm:$0xff]  }
 0x3f6   :  { %5164 = vmatprep.mubr.bf16.mxu1 %v11833_v2  ;;  %5764 = vmatpush1.bf16.msra.mxu0 %v9773_v30  ;;  %v9785_v2 = vld [vmem:[%s14601_s5 + $0x2c0] ss:$16 sps:$4 sm:$0xff]  }
 0x3f7   :  { %5807 = vmatpush1.bf16.msra.mxu1 %v9776_v44  ;;  %5765 = vmatprep.subr.bf16.mxu0 %v9781_v43  ;;  %v9821_v30 = vld [vmem:[%s14601_s5 + $0x380] ss:$16 sps:$4 sm:$0xff]   ;;  %v9824_v44 = vld [vmem:[%s14601_s5 + $0x388] ss:$16 sps:$4 sm:$0xff]   ;;  %v9829_v43 = vld [vmem:[%s14601_s5 + $0x3a4] ss:$16 sps:$4 sm:$0xff]  }
 0x3f8   :  { %5808 = vmatprep.subr.bf16.mxu1 %v9784_v11  ;;  %v9832_v11 = vld [vmem:[%s14601_s5 + $0x3ac] ss:$16 sps:$4 sm:$0xff]  }
 0x3fa   :  { %5766 = vmatpush1.bf16.msra.mxu0 %v9779_v38  ;;  %v9827_v38 = vld [vmem:[%s14601_s5 + $0x3a0] ss:$16 sps:$4 sm:$0xff]  }
 0x3fb   :  { %5809 = vmatpush1.bf16.msra.mxu1 %v9782_v19  ;;  %5767 = vmatprep.subr.bf16.mxu0 %v9787_v5  ;;  %v9830_v19 = vld [vmem:[%s14601_s5 + $0x3a8] ss:$16 sps:$4 sm:$0xff]   ;;  %v9835_v5 = vld [vmem:[%s14601_s5 + $0x3c4] ss:$16 sps:$4 sm:$0xff]  }
 0x3fc   :  { %5092 = vmatmul.mubr.bf16.gmra.mrb[124].mxu0 %v11828_v3  ;;  %5810 = vmatprep.subr.bf16.mxu1 %v9790_v51  ;;  %v9838_v51 = vld [vmem:[%s14601_s5 + $0x3cc] ss:$16 sps:$4 sm:$0xff]  }
 0x3fd   :  { %5165 = vmatmul.mubr.bf16.gmra.mrb[124].mxu1 %v11828_v3  ;;  %v9802_v3 = vld [vmem:[%s14601_s5 + $0x30c] ss:$16 sps:$4 sm:$0xff]  }
 0x3fe   :  { %5768 = vmatpush1.bf16.msra.mxu0 %v9785_v2  ;;  %v9833_v2 = vld [vmem:[%s14601_s5 + $0x3c0] ss:$16 sps:$4 sm:$0xff]  }
 0x3ff   :  { %5811 = vmatpush1.bf16.msra.mxu1 %v9788_v14  ;;  %5769 = vmatprep.subr.bf16.mxu0 %v9793_v42  ;;  %v9836_v14 = vld [vmem:[%s14601_s5 + $0x3c8] ss:$16 sps:$4 sm:$0xff]   ;;  %v9841_v42 = vld [vmem:[%s14601_s5 + $0x3e4] ss:$16 sps:$4 sm:$0xff]  }
 0x400   :  { %5812 = vmatprep.subr.bf16.mxu1 %v9796_v50  ;;  %v9844_v50 = vld [vmem:[%s14601_s5 + $0x3ec] ss:$16 sps:$4 sm:$0xff]  }
 0x402   :  { %5770 = vmatpush1.bf16.msra.mxu0 %v9791_v48  ;;  %v9839_v48 = vld [vmem:[%s14601_s5 + $0x3e0] ss:$16 sps:$4 sm:$0xff]  }
 0x403   :  { %5813 = vmatpush1.bf16.msra.mxu1 %v9794_v6  ;;  %5771 = vmatprep.subr.bf16.mxu0 %v9799_v0  ;;  %v9842_v6 = vld [vmem:[%s14601_s5 + $0x3e8] ss:$16 sps:$4 sm:$0xff]   ;;  %v9847_v0 = vld [vmem:[%s14601_s5 + $0x4] ss:$16 sps:$4 sm:$0xff]  }
 0x404   :  { %5814 = vmatprep.subr.bf16.mxu1 %v9802_v3  ;;  %v9850_v3 = vld [vmem:[%s14601_s5 + $0xc] ss:$16 sps:$4 sm:$0xff]  }
 0x406   :  { %5772 = vmatpush1.bf16.msra.mxu0 %v9797_v47  ;;  %v1630_v47 = vld [vmem:[%s14602_s4] sm:$0x3] }
 0x407   :  { %5815 = vmatpush1.bf16.msra.mxu1 %v9800_v61  ;;  %5773 = vmatprep.subr.bf16.mxu0 %v9805_v26 }
 0x408   :  { %5816 = vmatprep.subr.bf16.mxu1 %v9808_v53 }
 0x40a   :  { %5774 = vmatpush1.bf16.msra.mxu0 %v9803_v52 }
 0x40b   :  { %5817 = vmatpush1.bf16.msra.mxu1 %v9806_v17  ;;  %5775 = vmatprep.subr.bf16.mxu0 %v9811_v7  ;;  %v14659_v7 = vld [vmem:[#allocation5_spill] sm:$0xff] }
 0x40c   :  { %5818 = vmatprep.subr.bf16.mxu1 %v9814_v20  ;;  %v13844_v20 = vrot.slane %v1630_v47, %v14659_v7 }
 0x40e   :  { %5776 = vmatpush1.bf16.msra.mxu0 %v9809_v28 }
 0x40f   :  { %5819 = vmatpush1.bf16.msra.mxu1 %v9812_v23  ;;  %5777 = vmatprep.subr.bf16.mxu0 %v9817_v56 }
 0x410   :  { %5820 = vmatprep.subr.bf16.mxu1 %v9820_v33 }
 0x412   :  { %5778 = vmatpush1.bf16.msra.mxu0 %v9815_v12  ;;  %v14660_v12 = vld [vmem:[#allocation6_spill] sm:$0xff] }
 0x413   :  { %5821 = vmatpush1.bf16.msra.mxu1 %v9818_v4  ;;  %5779 = vmatprep.subr.bf16.mxu0 %v9823_v41  ;;  %v13849_v4 = vrot.slane %v1630_v47, %v14660_v12 }
 0x414   :  { %5822 = vmatprep.subr.bf16.mxu1 %v9826_v22 }
 0x416   :  { %5780 = vmatpush1.bf16.msra.mxu0 %v9821_v30 }
 0x417   :  { %5823 = vmatpush1.bf16.msra.mxu1 %v9824_v44  ;;  %5781 = vmatprep.subr.bf16.mxu0 %v9829_v43 }
 0x418   :  { %5824 = vmatprep.subr.bf16.mxu1 %v9832_v11 }
 0x41a   :  { %5782 = vmatpush1.bf16.msra.mxu0 %v9827_v38 }
 0x41b   :  { %5825 = vmatpush1.bf16.msra.mxu1 %v9830_v19  ;;  %5783 = vmatprep.subr.bf16.mxu0 %v9835_v5 }
 0x41c   :  { %5826 = vmatprep.subr.bf16.mxu1 %v9838_v51 }
 0x41e   :  { %5784 = vmatpush1.bf16.msra.mxu0 %v9833_v2 }
 0x41f   :  { %5827 = vmatpush1.bf16.msra.mxu1 %v9836_v14  ;;  %5785 = vmatprep.subr.bf16.mxu0 %v9841_v42 }
 0x420   :  { %5828 = vmatprep.subr.bf16.mxu1 %v9844_v50 }
 0x422   :  { %5786 = vmatpush1.bf16.msra.mxu0 %v9839_v48 }
 0x423   :  { %5829 = vmatpush1.bf16.msra.mxu1 %v9842_v6  ;;  %6161 = vmatprep.subr.bf16.mxu0 %v9847_v0 }
 0x424   :  { %6204 = vmatprep.subr.bf16.mxu1 %v9850_v3 }
 0x4b7   :  { %v5063_v61 = vpop.f32.mrb[112].mxu0 }
 0x4b8   :  { %v5207_v26 = vmax.f32 %v13209_v34, %v5063_v61  ;;  %v5136_v53 = vpop.f32.mrb[112].mxu1  ;;  %v5065_v52 = vpop.f32.mrb[113].mxu0 }
 0x4b9   :  { %v5209_v17 = vmax.f32 %v13213_v29, %v5136_v53  ;;  %v5208_v28 = vmax.f32 %v13215_v54, %v5065_v52  ;;  %v5138_v23 = vpop.f32.mrb[113].mxu1  ;;  %v5067_v56 = vpop.f32.mrb[114].mxu0 }
 0x4ba   :  { %v5210_v33 = vmax.f32 %v13221_v45, %v5138_v23  ;;  %v5211_v41 = vmax.f32 %v13223_v55, %v5067_v56  ;;  %v5140_v22 = vpop.f32.mrb[114].mxu1  ;;  %v5069_v34 = vpop.f32.mrb[115].mxu0 }
 0x4bb   :  { %v5239_v30 = vmax.f32 %v5207_v26, %v5209_v17  ;;  %v5213_v44 = vmax.f32 %v13231_v59, %v5140_v22  ;;  %v5212_v29 = vmax.f32 %v13233_v58, %v5069_v34  ;;  %v5142_v43 = vpop.f32.mrb[115].mxu1 }
 0x4bc   :  { %v5240_v11 = vmax.f32 %v5208_v28, %v5210_v33  ;;  %v5214_v54 = vmax.f32 %v13238_v18, %v5142_v43 }
 0x4bd   :  { %v5266_v38 = vadd.f32 %v13844_v20, %v5239_v30  ;;  %v5241_v19 = vmax.f32 %v5211_v41, %v5213_v44 }
 0x4be   :  { %v5267_v45 = vadd.f32 %v13849_v4, %v5240_v11  ;;  %v5242_v5 = vmax.f32 %v5212_v29, %v5214_v54 }
 0x4bf   :  { %v5268_v51 = vadd.f32 %v13844_v20, %v5241_v19  ;;  %v5073_v55 = vpop.f32.mrb[116].mxu0  ;;  %v5282_v58 = vmax.f32 %v5266_v38, 0.0 }
 0x4c0   :  { %v5269_v2 = vadd.f32 %v13849_v4, %v5242_v5  ;;  %v5215_v14 = vmax.f32 %v13253_v8, %v5073_v55  ;;  %v5146_v59 = vpop.f32.mrb[116].mxu1  ;;  %v5075_v42 = vpop.f32.mrb[117].mxu0  ;;  %v5283_v3 = vmax.f32 %v5267_v45, 0.0 }
 0x4c1   :  { %v5284_v50 = vmax.f32 %v5268_v51, 0.0  ;;  %v5217_v48 = vmax.f32 %v13257_v35, %v5146_v59  ;;  %v5216_v18 = vmax.f32 %v13259_v13, %v5075_v42  ;;  %v5148_v6 = vpop.f32.mrb[117].mxu1  ;;  %v5077_v0 = vpop.f32.mrb[118].mxu0 }
 0x4c2   :  { %v5285_v47 = vmax.f32 %v5269_v2, 0.0  ;;  %v5218_v61 = vmax.f32 %v13265_v31, %v5148_v6  ;;  %v5219_v26 = vmax.f32 %v13267_v62, %v5077_v0  ;;  %v5150_v53 = vpop.f32.mrb[118].mxu1  ;;  %v5079_v52 = vpop.f32.mrb[119].mxu0 }
 0x4c3   :  { %v13864_v17 = vpack.c.bf16 %v5284_v50, %v5282_v58  ;;  %v5243_v8 = vmax.f32 %v5215_v14, %v5217_v48  ;;  %v5221_v28 = vmax.f32 %v13275_v24, %v5150_v53  ;;  %v5220_v23 = vmax.f32 %v13277_v10, %v5079_v52  ;;  %v5152_v35 = vpop.f32.mrb[119].mxu1 }
 0x4c4   :  { %v5244_v56 = vmax.f32 %v5216_v18, %v5218_v61  ;;  %v5222_v13 = vmax.f32 %v13282_v63, %v5152_v35  ;;  %v5299_v33 = vpack.c.bf16 %v5285_v47, %v5283_v3  ;;  %v9845_v18 = vld [vmem:[%s14601_s5] ss:$16 sps:$4 sm:$0xff]  }
 0x4c5   :  { %v5270_v41 = vadd.f32 %v13844_v20, %v5243_v8  ;;  %v5245_v22 = vmax.f32 %v5219_v26, %v5221_v28  ;;  %v9851_v61 = vld [vmem:[%s14601_s5 + $0x20] ss:$16 sps:$4 sm:$0xff]   ;;  %v9854_v28 = vld [vmem:[%s14601_s5 + $0x28] ss:$16 sps:$4 sm:$0xff]  }
 0x4c6   :  { %v5271_v31 = vadd.f32 %v13849_v4, %v5244_v56  ;;  %v5246_v62 = vmax.f32 %v5220_v23, %v5222_v13  ;;  %v9859_v23 = vld [vmem:[%s14601_s5 + $0x44] ss:$16 sps:$4 sm:$0xff]  }
 0x4c7   :  { %v5272_v34 = vadd.f32 %v13844_v20, %v5245_v22  ;;  %v5083_v30 = vpop.f32.mrb[120].mxu0  ;;  %v5286_v43 = vmax.f32 %v5270_v41, 0.0 }
 0x4c8   :  { %v5273_v44 = vadd.f32 %v13849_v4, %v5246_v62  ;;  %v5223_v24 = vmax.f32 %v13296_v15, %v5083_v30  ;;  %v5156_v29 = vpop.f32.mrb[120].mxu1  ;;  %v5085_v10 = vpop.f32.mrb[121].mxu0  ;;  %v5287_v45 = vmax.f32 %v5271_v31, 0.0  ;;  %v9862_v31 = vld [vmem:[%s14601_s5 + $0x4c] ss:$16 sps:$4 sm:$0xff]  }
 0x4c9   :  { %v5288_v11 = vmax.f32 %v5272_v34, 0.0  ;;  %v5225_v63 = vmax.f32 %v13298_v57, %v5156_v29  ;;  %v5224_v54 = vmax.f32 %v13300_v27, %v5085_v10  ;;  %v5158_v38 = vpop.f32.mrb[121].mxu1  ;;  %v5087_v19 = vpop.f32.mrb[122].mxu0 }
 0x4ca   :  { %v5289_v5 = vmax.f32 %v5273_v44, 0.0  ;;  %v5226_v51 = vmax.f32 %v13305_v1, %v5158_v38  ;;  %v5227_v55 = vmax.f32 %v13307_v49, %v5087_v19  ;;  %v5160_v2 = vpop.f32.mrb[122].mxu1  ;;  %v5089_v14 = vpop.f32.mrb[123].mxu0  ;;  %v9848_v1 = vld [vmem:[%s14601_s5 + $0x8] ss:$16 sps:$4 sm:$0xff]  }
 0x4cb   :  { %v5300_v59 = vpack.c.bf16 %v5288_v11, %v5286_v43  ;;  %v5247_v15 = vmax.f32 %v5223_v24, %v5225_v63  ;;  %v5229_v42 = vmax.f32 %v13315_v32, %v5160_v2  ;;  %v5228_v58 = vmax.f32 %v13317_v25, %v5089_v14  ;;  %v5162_v50 = vpop.f32.mrb[123].mxu1  ;;  %v9853_v25 = vld [vmem:[%s14601_s5 + $0x24] ss:$16 sps:$4 sm:$0xff]   ;;  %v9866_v2 = vld [vmem:[%s14601_s5 + $0x68] ss:$16 sps:$4 sm:$0xff]  }
 0x4cc   :  { %v5248_v57 = vmax.f32 %v5224_v54, %v5226_v51  ;;  %v5230_v27 = vmax.f32 %v13322_v16, %v5162_v50  ;;  %v5301_v48 = vpack.c.bf16 %v5289_v5, %v5287_v45  ;;  %v9856_v16 = vld [vmem:[%s14601_s5 + $0x2c] ss:$16 sps:$4 sm:$0xff]   ;;  %v9869_v50 = vld [vmem:[%s14601_s5 + $0x80] ss:$16 sps:$4 sm:$0xff]  }
 0x4cd   :  { %v5274_v49 = vadd.f32 %v13844_v20, %v5247_v15  ;;  %v5249_v6 = vmax.f32 %v5227_v55, %v5229_v42  ;;  %v9863_v55 = vld [vmem:[%s14601_s5 + $0x60] ss:$16 sps:$4 sm:$0xff]  }
 0x4ce   :  { %v5275_v32 = vadd.f32 %v13849_v4, %v5248_v57  ;;  %v5250_v0 = vmax.f32 %v5228_v58, %v5230_v27  ;;  %5787 = vmatprep.mubr.bf16.mxu0 %v5301_v48  ;;  %5830 = vmatprep.mubr.bf16.mxu1 %v5301_v48  ;;  %v9872_v57 = vld [vmem:[%s14601_s5 + $0x88] ss:$16 sps:$4 sm:$0xff]   ;;  %v9877_v48 = vld [vmem:[%s14601_s5 + $0xa4] ss:$16 sps:$4 sm:$0xff]  }
 0x4cf   :  { %v5276_v3 = vadd.f32 %v13844_v20, %v5249_v6  ;;  %5788 = vmatmul.mubr.bf16.vlgmr.msra.gmra.mrb[128].mxu0 %v5300_v59  ;;  %5831 = vmatmul.mubr.bf16.vlgmr.msra.gmra.mrb[128].mxu1 %v5300_v59  ;;  %v5093_v47 = vpop.f32.mrb[124].mxu0  ;;  %v5290_v35 = vmax.f32 %v5274_v49, 0.0  ;;  %v9878_v49 = vld [vmem:[%s14601_s5 + $0xa8] ss:$16 sps:$4 sm:$0xff]   ;;  %v9883_v6 = vld [vmem:[%s14601_s5 + $0xc4] ss:$16 sps:$4 sm:$0xff]  }
 0x4d0   :  { %v5277_v26 = vadd.f32 %v13849_v4, %v5250_v0  ;;  %6162 = vmatpush1.bf16.msra.mxu0 %v9845_v18  ;;  %6205 = vmatpush1.bf16.msra.mxu1 %v9848_v1  ;;  %v5231_v53 = vmax.f32 %v13336_v37, %v5093_v47  ;;  %v5166_v52 = vpop.f32.mrb[124].mxu1  ;;  %v5095_v8 = vpop.f32.mrb[125].mxu0  ;;  %v5291_v62 = vmax.f32 %v5275_v32, 0.0  ;;  %v9880_v18 = vld [vmem:[%s14601_s5 + $0xac] ss:$16 sps:$4 sm:$0xff]  }
 0x4d1   :  { %v5292_v56 = vmax.f32 %v5276_v3, 0.0  ;;  %v5233_v13 = vmax.f32 %v13338_v40, %v5166_v52  ;;  %6193 = vmatprep.mubr.bf16.mxu0 %v5299_v33  ;;  %6236 = vmatprep.mubr.bf16.mxu1 %v5299_v33  ;;  %v5232_v41 = vmax.f32 %v13340_v39, %v5095_v8  ;;  %v5168_v22 = vpop.f32.mrb[125].mxu1  ;;  %v5097_v37 = vpop.f32.mrb[126].mxu0  ;;  %v9875_v1 = vld [vmem:[%s14601_s5 + $0xa0] ss:$16 sps:$4 sm:$0xff]  }
 0x4d2   :  { %v5293_v34 = vmax.f32 %v5277_v26, 0.0  ;;  %v5234_v30 = vmax.f32 %v13345_v36, %v5168_v22  ;;  %v5235_v44 = vmax.f32 %v13347_v60, %v5097_v37  ;;  %v5170_v24 = vpop.f32.mrb[126].mxu1  ;;  %6163 = vmatprep.subr.bf16.mxu0 %v9853_v25  ;;  %6206 = vmatprep.subr.bf16.mxu1 %v9856_v16  ;;  %v5099_v40 = vpop.f32.mrb[127].mxu0  ;;  %v9857_v36 = vld [vmem:[%s14601_s5 + $0x40] ss:$16 sps:$4 sm:$0xff]  }
 0x4d3   :  { %v13914_v29 = vpack.c.bf16 %v5292_v56, %v5290_v35  ;;  %v5251_v33 = vmax.f32 %v5231_v53, %v5233_v13  ;;  %v5237_v39 = vmax.f32 %v13355_v21, %v5170_v24  ;;  %v5236_v10 = vmax.f32 %v13357_v46, %v5099_v40  ;;  %v5172_v43 = vpop.f32.mrb[127].mxu1  ;;  %v9860_v60 = vld [vmem:[%s14601_s5 + $0x48] ss:$16 sps:$4 sm:$0xff]   ;;  %v9865_v46 = vld [vmem:[%s14601_s5 + $0x64] ss:$16 sps:$4 sm:$0xff]  }
 0x4d4   :  { %v5252_v11 = vmax.f32 %v5232_v41, %v5234_v30  ;;  %v5238_v63 = vmax.f32 %v13362_v9, %v5172_v43  ;;  %6164 = vmatpush1.bf16.msra.mxu0 %v9851_v61  ;;  %6207 = vmatpush1.bf16.msra.mxu1 %v9854_v28  ;;  %v13925_v54 = vpack.c.bf16 %v5293_v34, %v5291_v62  ;;  %v9868_v9 = vld [vmem:[%s14601_s5 + $0x6c] ss:$16 sps:$4 sm:$0xff]   ;;  %v9881_v0 = vld [vmem:[%s14601_s5 + $0xc0] ss:$16 sps:$4 sm:$0xff]   ;;  %v9884_v25 = vld [vmem:[%s14601_s5 + $0xc8] ss:$16 sps:$4 sm:$0xff]  }
 0x4d5   :  { %v5278_v21 = vadd.f32 %v13844_v20, %v5251_v33  ;;  %v5253_v38 = vmax.f32 %v5235_v44, %v5237_v39  ;;  %6165 = vmatprep.subr.bf16.mxu0 %v9859_v23  ;;  %6208 = vmatprep.subr.bf16.mxu1 %v9862_v31  ;;  %v9886_v32 = vld [vmem:[%s14601_s5 + $0xcc] ss:$16 sps:$4 sm:$0xff]   ;;  %v9889_v16 = vld [vmem:[%s14601_s5 + $0xe4] ss:$16 sps:$4 sm:$0xff]   ;;  %v9887_v47 = vld [vmem:[%s14601_s5 + $0xe0] ss:$16 sps:$4 sm:$0xff]  }
 0x4d6   :  { %v5279_v19 = vadd.f32 %v13849_v4, %v5252_v11  ;;  %v5254_v45 = vmax.f32 %v5236_v10, %v5238_v63  ;;  %v9892_v3 = vld [vmem:[%s14601_s5 + $0xec] ss:$16 sps:$4 sm:$0xff]   ;;  %v9890_v61 = vld [vmem:[%s14601_s5 + $0xe8] ss:$16 sps:$4 sm:$0xff]   ;;  %v9895_v26 = vld [vmem:[%s14601_s5 + $0x104] ss:$16 sps:$4 sm:$0xff]  }
 0x4d7   :  { %v5280_v5 = vadd.f32 %v13844_v20, %v5253_v38  ;;  %v5294_v14 = vmax.f32 %v5278_v21, 0.0  ;;  %v9871_v20 = vld [vmem:[%s14601_s5 + $0x84] ss:$16 sps:$4 sm:$0xff]   ;;  %v9898_v53 = vld [vmem:[%s14601_s5 + $0x10c] ss:$16 sps:$4 sm:$0xff]  }
 0x4d8   :  { %v5281_v51 = vadd.f32 %v13849_v4, %v5254_v45  ;;  %6166 = vmatpush1.bf16.msra.mxu0 %v9857_v36  ;;  %6209 = vmatpush1.bf16.msra.mxu1 %v9860_v60  ;;  %v9874_v4 = vld [vmem:[%s14601_s5 + $0x8c] ss:$16 sps:$4 sm:$0xff]   ;;  %v5295_v15 = vmax.f32 %v5279_v19, 0.0  ;;  %v9893_v52 = vld [vmem:[%s14601_s5 + $0x100] ss:$16 sps:$4 sm:$0xff]  }
 0x4d9   :  { %v5296_v59 = vmax.f32 %v5280_v5, 0.0  ;;  %6167 = vmatprep.subr.bf16.mxu0 %v9865_v46  ;;  %6210 = vmatprep.subr.bf16.mxu1 %v9868_v9  ;;  %v9896_v8 = vld [vmem:[%s14601_s5 + $0x108] ss:$16 sps:$4 sm:$0xff]   ;;  %v9901_v28 = vld [vmem:[%s14601_s5 + $0x124] ss:$16 sps:$4 sm:$0xff]  }
 0x4da   :  { %v5297_v42 = vmax.f32 %v5281_v51, 0.0  ;;  %v9904_v23 = vld [vmem:[%s14601_s5 + $0x12c] ss:$16 sps:$4 sm:$0xff]   ;;  %v9899_v35 = vld [vmem:[%s14601_s5 + $0x120] ss:$16 sps:$4 sm:$0xff]  }
 0x4db   :  { %v13949_v58 = vpack.c.bf16 %v5296_v59, %v5294_v14  ;;  %v9902_v56 = vld [vmem:[%s14601_s5 + $0x128] ss:$16 sps:$4 sm:$0xff]   ;;  %v9907_v13 = vld [vmem:[%s14601_s5 + $0x144] ss:$16 sps:$4 sm:$0xff]   ;;  %v9910_v41 = vld [vmem:[%s14601_s5 + $0x14c] ss:$16 sps:$4 sm:$0xff]  }
 0x4dc   :  { %6168 = vmatpush1.bf16.msra.mxu0 %v9863_v55  ;;  %6211 = vmatpush1.bf16.msra.mxu1 %v9866_v2  ;;  %v13957_v27 = vpack.c.bf16 %v5297_v42, %v5295_v15  ;;  %v9905_v22 = vld [vmem:[%s14601_s5 + $0x140] ss:$16 sps:$4 sm:$0xff]   ;;  %v9908_v37 = vld [vmem:[%s14601_s5 + $0x148] ss:$16 sps:$4 sm:$0xff]   ;;  %v9913_v31 = vld [vmem:[%s14601_s5 + $0x164] ss:$16 sps:$4 sm:$0xff]  }
 0x4dd   :  { %6169 = vmatprep.subr.bf16.mxu0 %v9871_v20  ;;  %6212 = vmatprep.subr.bf16.mxu1 %v9874_v4  ;;  %v9916_v62 = vld [vmem:[%s14601_s5 + $0x16c] ss:$16 sps:$4 sm:$0xff]   ;;  %v9911_v34 = vld [vmem:[%s14601_s5 + $0x160] ss:$16 sps:$4 sm:$0xff]   ;;  %v9914_v30 = vld [vmem:[%s14601_s5 + $0x168] ss:$16 sps:$4 sm:$0xff]  }
 0x4de   :  { %v9919_v44 = vld [vmem:[%s14601_s5 + $0x184] ss:$16 sps:$4 sm:$0xff]   ;;  %v9922_v24 = vld [vmem:[%s14601_s5 + $0x18c] ss:$16 sps:$4 sm:$0xff]   ;;  %v9917_v40 = vld [vmem:[%s14601_s5 + $0x180] ss:$16 sps:$4 sm:$0xff]  }
 0x4df   :  { %v9920_v33 = vld [vmem:[%s14601_s5 + $0x188] ss:$16 sps:$4 sm:$0xff]   ;;  %v9925_v39 = vld [vmem:[%s14601_s5 + $0x1a4] ss:$16 sps:$4 sm:$0xff]   ;;  %v9928_v10 = vld [vmem:[%s14601_s5 + $0x1ac] ss:$16 sps:$4 sm:$0xff]  }
 0x4e0   :  { %6170 = vmatpush1.bf16.msra.mxu0 %v9869_v50  ;;  %6213 = vmatpush1.bf16.msra.mxu1 %v9872_v57  ;;  %v9923_v43 = vld [vmem:[%s14601_s5 + $0x1a0] ss:$16 sps:$4 sm:$0xff]   ;;  %v9926_v11 = vld [vmem:[%s14601_s5 + $0x1a8] ss:$16 sps:$4 sm:$0xff]   ;;  %v9931_v63 = vld [vmem:[%s14601_s5 + $0x1c4] ss:$16 sps:$4 sm:$0xff]  }
 0x4e1   :  { %6171 = vmatprep.subr.bf16.mxu0 %v9877_v48  ;;  %6214 = vmatprep.subr.bf16.mxu1 %v9880_v18  ;;  %v9934_v36 = vld [vmem:[%s14601_s5 + $0x1cc] ss:$16 sps:$4 sm:$0xff]   ;;  %v9929_v60 = vld [vmem:[%s14601_s5 + $0x1c0] ss:$16 sps:$4 sm:$0xff]   ;;  %v9932_v21 = vld [vmem:[%s14601_s5 + $0x1c8] ss:$16 sps:$4 sm:$0xff]  }
 0x4e2   :  { %v9937_v38 = vld [vmem:[%s14601_s5 + $0x1e4] ss:$16 sps:$4 sm:$0xff]   ;;  %v9940_v46 = vld [vmem:[%s14601_s5 + $0x1ec] ss:$16 sps:$4 sm:$0xff]   ;;  %v9935_v9 = vld [vmem:[%s14601_s5 + $0x1e0] ss:$16 sps:$4 sm:$0xff]  }
 0x4e3   :  { %v9938_v19 = vld [vmem:[%s14601_s5 + $0x1e8] ss:$16 sps:$4 sm:$0xff]   ;;  %v9943_v45 = vld [vmem:[%s14601_s5 + $0x404] ss:$16 sps:$4 sm:$0xff]   ;;  %v9946_v5 = vld [vmem:[%s14601_s5 + $0x40c] ss:$16 sps:$4 sm:$0xff]  }
 0x4e4   :  { %6172 = vmatpush1.bf16.msra.mxu0 %v9875_v1  ;;  %6215 = vmatpush1.bf16.msra.mxu1 %v9878_v49  ;;  %v9941_v51 = vld [vmem:[%s14601_s5 + $0x400] ss:$16 sps:$4 sm:$0xff]   ;;  %v9944_v55 = vld [vmem:[%s14601_s5 + $0x408] ss:$16 sps:$4 sm:$0xff]   ;;  %v9949_v2 = vld [vmem:[%s14601_s5 + $0x424] ss:$16 sps:$4 sm:$0xff]  }
 0x4e5   :  { %6173 = vmatprep.subr.bf16.mxu0 %v9883_v6  ;;  %6216 = vmatprep.subr.bf16.mxu1 %v9886_v32  ;;  %v9952_v14 = vld [vmem:[%s14601_s5 + $0x42c] ss:$16 sps:$4 sm:$0xff]   ;;  %v9947_v59 = vld [vmem:[%s14601_s5 + $0x420] ss:$16 sps:$4 sm:$0xff]   ;;  %v9950_v20 = vld [vmem:[%s14601_s5 + $0x428] ss:$16 sps:$4 sm:$0xff]  }
 0x4e6   :  { %v9955_v4 = vld [vmem:[%s14601_s5 + $0x444] ss:$16 sps:$4 sm:$0xff]   ;;  %v9953_v15 = vld [vmem:[%s14601_s5 + $0x440] ss:$16 sps:$4 sm:$0xff]   ;;  %v9956_v42 = vld [vmem:[%s14601_s5 + $0x448] ss:$16 sps:$4 sm:$0xff]  }
 0x4e7   :  { %v9964_v50 = vld [vmem:[%s14601_s5 + $0x46c] ss:$16 sps:$4 sm:$0xff]   ;;  %v9959_v57 = vld [vmem:[%s14601_s5 + $0x460] ss:$16 sps:$4 sm:$0xff]   ;;  %v9962_v48 = vld [vmem:[%s14601_s5 + $0x468] ss:$16 sps:$4 sm:$0xff]  }
 0x4e8   :  { %6174 = vmatpush1.bf16.msra.mxu0 %v9881_v0  ;;  %6217 = vmatpush1.bf16.msra.mxu1 %v9884_v25  ;;  %v9967_v18 = vld [vmem:[%s14601_s5 + $0x484] ss:$16 sps:$4 sm:$0xff]   ;;  %v9970_v1 = vld [vmem:[%s14601_s5 + $0x48c] ss:$16 sps:$4 sm:$0xff]   ;;  %v9965_v49 = vld [vmem:[%s14601_s5 + $0x480] ss:$16 sps:$4 sm:$0xff]  }
 0x4e9   :  { %6175 = vmatprep.subr.bf16.mxu0 %v9889_v16  ;;  %6218 = vmatprep.subr.bf16.mxu1 %v9892_v3  ;;  %v9968_v6 = vld [vmem:[%s14601_s5 + $0x488] ss:$16 sps:$4 sm:$0xff]   ;;  %v9973_v32 = vld [vmem:[%s14601_s5 + $0x4a4] ss:$16 sps:$4 sm:$0xff]   ;;  %v9976_v0 = vld [vmem:[%s14601_s5 + $0x4ac] ss:$16 sps:$4 sm:$0xff]  }
 0x4ea   :  { %v9971_v25 = vld [vmem:[%s14601_s5 + $0x4a0] ss:$16 sps:$4 sm:$0xff]   ;;  %v9974_v16 = vld [vmem:[%s14601_s5 + $0x4a8] ss:$16 sps:$4 sm:$0xff]   ;;  %v9979_v3 = vld [vmem:[%s14601_s5 + $0x4c4] ss:$16 sps:$4 sm:$0xff]  }
 0x4ec   :  { %6176 = vmatpush1.bf16.msra.mxu0 %v9887_v47  ;;  %6219 = vmatpush1.bf16.msra.mxu1 %v9890_v61  ;;  %v9982_v47 = vld [vmem:[%s14601_s5 + $0x4cc] ss:$16 sps:$4 sm:$0xff]   ;;  %v9977_v61 = vld [vmem:[%s14601_s5 + $0x4c0] ss:$16 sps:$4 sm:$0xff]  }
 0x4ed   :  { %6177 = vmatprep.subr.bf16.mxu0 %v9895_v26  ;;  %6220 = vmatprep.subr.bf16.mxu1 %v9898_v53  ;;  %v9980_v26 = vld [vmem:[%s14601_s5 + $0x4c8] ss:$16 sps:$4 sm:$0xff]   ;;  %v9985_v53 = vld [vmem:[%s14601_s5 + $0x4e4] ss:$16 sps:$4 sm:$0xff]  }
 0x4f0   :  { %6178 = vmatpush1.bf16.msra.mxu0 %v9893_v52  ;;  %6221 = vmatpush1.bf16.msra.mxu1 %v9896_v8  ;;  %v9983_v52 = vld [vmem:[%s14601_s5 + $0x4e0] ss:$16 sps:$4 sm:$0xff]   ;;  %v9988_v8 = vld [vmem:[%s14601_s5 + $0x4ec] ss:$16 sps:$4 sm:$0xff]  }
 0x4f1   :  { %6179 = vmatprep.subr.bf16.mxu0 %v9901_v28  ;;  %6222 = vmatprep.subr.bf16.mxu1 %v9904_v23  ;;  %v9986_v28 = vld [vmem:[%s14601_s5 + $0x4e8] ss:$16 sps:$4 sm:$0xff]   ;;  %v9991_v23 = vld [vmem:[%s14601_s5 + $0x504] ss:$16 sps:$4 sm:$0xff]  }
 0x4f4   :  { %6180 = vmatpush1.bf16.msra.mxu0 %v9899_v35  ;;  %6223 = vmatpush1.bf16.msra.mxu1 %v9902_v56  ;;  %v9994_v35 = vld [vmem:[%s14601_s5 + $0x50c] ss:$16 sps:$4 sm:$0xff]   ;;  %v9989_v56 = vld [vmem:[%s14601_s5 + $0x500] ss:$16 sps:$4 sm:$0xff]  }
 0x4f5   :  { %6181 = vmatprep.subr.bf16.mxu0 %v9907_v13  ;;  %6224 = vmatprep.subr.bf16.mxu1 %v9910_v41  ;;  %v9992_v13 = vld [vmem:[%s14601_s5 + $0x508] ss:$16 sps:$4 sm:$0xff]   ;;  %v9997_v41 = vld [vmem:[%s14601_s5 + $0x524] ss:$16 sps:$4 sm:$0xff]  }
 0x4f8   :  { %6182 = vmatpush1.bf16.msra.mxu0 %v9905_v22  ;;  %6225 = vmatpush1.bf16.msra.mxu1 %v9908_v37  ;;  %v10000_v22 = vld [vmem:[%s14601_s5 + $0x52c] ss:$16 sps:$4 sm:$0xff]   ;;  %v9995_v37 = vld [vmem:[%s14601_s5 + $0x520] ss:$16 sps:$4 sm:$0xff]  }
 0x4f9   :  { %6183 = vmatprep.subr.bf16.mxu0 %v9913_v31  ;;  %6226 = vmatprep.subr.bf16.mxu1 %v9916_v62  ;;  %v9998_v31 = vld [vmem:[%s14601_s5 + $0x528] ss:$16 sps:$4 sm:$0xff]   ;;  %v10003_v62 = vld [vmem:[%s14601_s5 + $0x544] ss:$16 sps:$4 sm:$0xff]  }
 0x4fc   :  { %6184 = vmatpush1.bf16.msra.mxu0 %v9911_v34  ;;  %6227 = vmatpush1.bf16.msra.mxu1 %v9914_v30  ;;  %v10006_v34 = vld [vmem:[%s14601_s5 + $0x54c] ss:$16 sps:$4 sm:$0xff]   ;;  %v10001_v30 = vld [vmem:[%s14601_s5 + $0x540] ss:$16 sps:$4 sm:$0xff]  }
 0x4fd   :  { %6185 = vmatprep.subr.bf16.mxu0 %v9919_v44  ;;  %6228 = vmatprep.subr.bf16.mxu1 %v9922_v24  ;;  %v10004_v44 = vld [vmem:[%s14601_s5 + $0x548] ss:$16 sps:$4 sm:$0xff]   ;;  %v10009_v24 = vld [vmem:[%s14601_s5 + $0x564] ss:$16 sps:$4 sm:$0xff]  }
 0x500   :  { %6186 = vmatpush1.bf16.msra.mxu0 %v9917_v40  ;;  %6229 = vmatpush1.bf16.msra.mxu1 %v9920_v33  ;;  %v10012_v40 = vld [vmem:[%s14601_s5 + $0x56c] ss:$16 sps:$4 sm:$0xff]   ;;  %v10007_v33 = vld [vmem:[%s14601_s5 + $0x560] ss:$16 sps:$4 sm:$0xff]  }
 0x501   :  { %6187 = vmatprep.subr.bf16.mxu0 %v9925_v39  ;;  %6230 = vmatprep.subr.bf16.mxu1 %v9928_v10  ;;  %v10010_v39 = vld [vmem:[%s14601_s5 + $0x568] ss:$16 sps:$4 sm:$0xff]   ;;  %v10015_v10 = vld [vmem:[%s14601_s5 + $0x584] ss:$16 sps:$4 sm:$0xff]  }
 0x504   :  { %6188 = vmatpush1.bf16.msra.mxu0 %v9923_v43  ;;  %6231 = vmatpush1.bf16.msra.mxu1 %v9926_v11  ;;  %v10018_v43 = vld [vmem:[%s14601_s5 + $0x58c] ss:$16 sps:$4 sm:$0xff]   ;;  %v10013_v11 = vld [vmem:[%s14601_s5 + $0x580] ss:$16 sps:$4 sm:$0xff]  }
 0x505   :  { %6189 = vmatprep.subr.bf16.mxu0 %v9931_v63  ;;  %6232 = vmatprep.subr.bf16.mxu1 %v9934_v36  ;;  %v10016_v63 = vld [vmem:[%s14601_s5 + $0x588] ss:$16 sps:$4 sm:$0xff]   ;;  %v10021_v36 = vld [vmem:[%s14601_s5 + $0x5a4] ss:$16 sps:$4 sm:$0xff]  }
 0x508   :  { %6190 = vmatpush1.bf16.msra.mxu0 %v9929_v60  ;;  %6233 = vmatpush1.bf16.msra.mxu1 %v9932_v21  ;;  %v10024_v60 = vld [vmem:[%s14601_s5 + $0x5ac] ss:$16 sps:$4 sm:$0xff]   ;;  %v10019_v21 = vld [vmem:[%s14601_s5 + $0x5a0] ss:$16 sps:$4 sm:$0xff]  }
 0x509   :  { %6191 = vmatprep.subr.bf16.mxu0 %v9937_v38  ;;  %6234 = vmatprep.subr.bf16.mxu1 %v9940_v46  ;;  %v10022_v38 = vld [vmem:[%s14601_s5 + $0x5a8] ss:$16 sps:$4 sm:$0xff]   ;;  %v10027_v46 = vld [vmem:[%s14601_s5 + $0x5c4] ss:$16 sps:$4 sm:$0xff]  }
 0x50c   :  { %6192 = vmatpush1.bf16.msra.mxu0 %v9935_v9  ;;  %6235 = vmatpush1.bf16.msra.mxu1 %v9938_v19  ;;  %v10030_v9 = vld [vmem:[%s14601_s5 + $0x5cc] ss:$16 sps:$4 sm:$0xff]   ;;  %v10025_v19 = vld [vmem:[%s14601_s5 + $0x5c0] ss:$16 sps:$4 sm:$0xff]  }
 0x50d   :  { %6632 = vmatprep.subr.bf16.mxu0 %v9943_v45  ;;  %6675 = vmatprep.subr.bf16.mxu1 %v9946_v5  ;;  %v10028_v45 = vld [vmem:[%s14601_s5 + $0x5c8] ss:$16 sps:$4 sm:$0xff]   ;;  %v10033_v5 = vld [vmem:[%s14601_s5 + $0x5e4] ss:$16 sps:$4 sm:$0xff]  }
 0x50f   :  { %6194 = vmatmul.mubr.bf16.vlgmr.msra.gmra.mrb[128].mxu0 %v13864_v17  ;;  %6237 = vmatmul.mubr.bf16.vlgmr.msra.gmra.mrb[128].mxu1 %v13864_v17  ;;  %v9958_v17 = vld [vmem:[%s14601_s5 + $0x44c] ss:$16 sps:$4 sm:$0xff]  }
 0x510   :  { %6633 = vmatpush1.bf16.msra.mxu0 %v9941_v51  ;;  %6664 = vmatprep.mubr.bf16.mxu0 %v13925_v54  ;;  %v10036_v51 = vld [vmem:[%s14601_s5 + $0x5ec] ss:$16 sps:$4 sm:$0xff]  }
 0x511   :  { %6676 = vmatpush1.bf16.msra.mxu1 %v9944_v55  ;;  %6707 = vmatprep.mubr.bf16.mxu1 %v13925_v54  ;;  %v9961_v54 = vld [vmem:[%s14601_s5 + $0x464] ss:$16 sps:$4 sm:$0xff]   ;;  %v10031_v55 = vld [vmem:[%s14601_s5 + $0x5e0] ss:$16 sps:$4 sm:$0xff]  }
 0x512   :  { %6634 = vmatprep.subr.bf16.mxu0 %v9949_v2  ;;  %6677 = vmatprep.subr.bf16.mxu1 %v9952_v14  ;;  %v10034_v2 = vld [vmem:[%s14601_s5 + $0x5e8] ss:$16 sps:$4 sm:$0xff]   ;;  %v10039_v14 = vld [vmem:[%s14601_s5 + $0x604] ss:$16 sps:$4 sm:$0xff]  }
 0x514   :  { %6635 = vmatpush1.bf16.msra.mxu0 %v9947_v59  ;;  %v10042_v59 = vld [vmem:[%s14601_s5 + $0x60c] ss:$16 sps:$4 sm:$0xff]  }
 0x515   :  { %6678 = vmatpush1.bf16.msra.mxu1 %v9950_v20  ;;  %6636 = vmatprep.subr.bf16.mxu0 %v9955_v4  ;;  %v10037_v20 = vld [vmem:[%s14601_s5 + $0x600] ss:$16 sps:$4 sm:$0xff]   ;;  %v10040_v4 = vld [vmem:[%s14601_s5 + $0x608] ss:$16 sps:$4 sm:$0xff]  }
 0x516   :  { %6679 = vmatprep.subr.bf16.mxu1 %v9958_v17  ;;  %v10045_v17 = vld [vmem:[%s14601_s5 + $0x624] ss:$16 sps:$4 sm:$0xff]  }
 0x518   :  { %6637 = vmatpush1.bf16.msra.mxu0 %v9953_v15  ;;  %v10048_v15 = vld [vmem:[%s14601_s5 + $0x62c] ss:$16 sps:$4 sm:$0xff]  }
 0x519   :  { %6680 = vmatpush1.bf16.msra.mxu1 %v9956_v42  ;;  %6638 = vmatprep.subr.bf16.mxu0 %v9961_v54  ;;  %v10043_v42 = vld [vmem:[%s14601_s5 + $0x620] ss:$16 sps:$4 sm:$0xff]   ;;  %v10046_v54 = vld [vmem:[%s14601_s5 + $0x628] ss:$16 sps:$4 sm:$0xff]  }
 0x51a   :  { %6681 = vmatprep.subr.bf16.mxu1 %v9964_v50  ;;  %v10051_v50 = vld [vmem:[%s14601_s5 + $0x644] ss:$16 sps:$4 sm:$0xff]  }
 0x51c   :  { %6639 = vmatpush1.bf16.msra.mxu0 %v9959_v57  ;;  %v10049_v57 = vld [vmem:[%s14601_s5 + $0x640] ss:$16 sps:$4 sm:$0xff]  }
 0x51d   :  { %6682 = vmatpush1.bf16.msra.mxu1 %v9962_v48  ;;  %6640 = vmatprep.subr.bf16.mxu0 %v9967_v18  ;;  %v10052_v48 = vld [vmem:[%s14601_s5 + $0x648] ss:$16 sps:$4 sm:$0xff]   ;;  %v10060_v18 = vld [vmem:[%s14601_s5 + $0x66c] ss:$16 sps:$4 sm:$0xff]  }
 0x51e   :  { %6683 = vmatprep.subr.bf16.mxu1 %v9970_v1  ;;  %v10055_v1 = vld [vmem:[%s14601_s5 + $0x660] ss:$16 sps:$4 sm:$0xff]  }
 0x520   :  { %6641 = vmatpush1.bf16.msra.mxu0 %v9965_v49  ;;  %v10058_v49 = vld [vmem:[%s14601_s5 + $0x668] ss:$16 sps:$4 sm:$0xff]  }
 0x521   :  { %6684 = vmatpush1.bf16.msra.mxu1 %v9968_v6  ;;  %6642 = vmatprep.subr.bf16.mxu0 %v9973_v32  ;;  %v10063_v6 = vld [vmem:[%s14601_s5 + $0x684] ss:$16 sps:$4 sm:$0xff]   ;;  %v10066_v32 = vld [vmem:[%s14601_s5 + $0x68c] ss:$16 sps:$4 sm:$0xff]  }
 0x522   :  { %6685 = vmatprep.subr.bf16.mxu1 %v9976_v0  ;;  %v10061_v0 = vld [vmem:[%s14601_s5 + $0x680] ss:$16 sps:$4 sm:$0xff]  }
 0x524   :  { %6643 = vmatpush1.bf16.msra.mxu0 %v9971_v25  ;;  %v10064_v25 = vld [vmem:[%s14601_s5 + $0x688] ss:$16 sps:$4 sm:$0xff]  }
 0x525   :  { %6686 = vmatpush1.bf16.msra.mxu1 %v9974_v16  ;;  %6644 = vmatprep.subr.bf16.mxu0 %v9979_v3  ;;  %v10069_v16 = vld [vmem:[%s14601_s5 + $0x6a4] ss:$16 sps:$4 sm:$0xff]   ;;  %v10072_v3 = vld [vmem:[%s14601_s5 + $0x6ac] ss:$16 sps:$4 sm:$0xff]  }
 0x526   :  { %6687 = vmatprep.subr.bf16.mxu1 %v9982_v47  ;;  %v10067_v47 = vld [vmem:[%s14601_s5 + $0x6a0] ss:$16 sps:$4 sm:$0xff]  }
 0x528   :  { %6645 = vmatpush1.bf16.msra.mxu0 %v9977_v61  ;;  %v10070_v61 = vld [vmem:[%s14601_s5 + $0x6a8] ss:$16 sps:$4 sm:$0xff]  }
 0x529   :  { %6688 = vmatpush1.bf16.msra.mxu1 %v9980_v26  ;;  %6646 = vmatprep.subr.bf16.mxu0 %v9985_v53  ;;  %v10075_v26 = vld [vmem:[%s14601_s5 + $0x6c4] ss:$16 sps:$4 sm:$0xff]   ;;  %v10078_v53 = vld [vmem:[%s14601_s5 + $0x6cc] ss:$16 sps:$4 sm:$0xff]  }
 0x52a   :  { %6689 = vmatprep.subr.bf16.mxu1 %v9988_v8  ;;  %v10076_v8 = vld [vmem:[%s14601_s5 + $0x6c8] ss:$16 sps:$4 sm:$0xff]  }
 0x52c   :  { %6647 = vmatpush1.bf16.msra.mxu0 %v9983_v52  ;;  %v10073_v52 = vld [vmem:[%s14601_s5 + $0x6c0] ss:$16 sps:$4 sm:$0xff]  }
 0x52d   :  { %6690 = vmatpush1.bf16.msra.mxu1 %v9986_v28  ;;  %6648 = vmatprep.subr.bf16.mxu0 %v9991_v23  ;;  %v10081_v28 = vld [vmem:[%s14601_s5 + $0x6e4] ss:$16 sps:$4 sm:$0xff]   ;;  %v10084_v23 = vld [vmem:[%s14601_s5 + $0x6ec] ss:$16 sps:$4 sm:$0xff]  }
 0x52e   :  { %6691 = vmatprep.subr.bf16.mxu1 %v9994_v35  ;;  %v10079_v35 = vld [vmem:[%s14601_s5 + $0x6e0] ss:$16 sps:$4 sm:$0xff]  }
 0x530   :  { %6649 = vmatpush1.bf16.msra.mxu0 %v9989_v56  ;;  %v10082_v56 = vld [vmem:[%s14601_s5 + $0x6e8] ss:$16 sps:$4 sm:$0xff]  }
 0x531   :  { %6692 = vmatpush1.bf16.msra.mxu1 %v9992_v13  ;;  %6650 = vmatprep.subr.bf16.mxu0 %v9997_v41  ;;  %v10087_v13 = vld [vmem:[%s14601_s5 + $0x704] ss:$16 sps:$4 sm:$0xff]   ;;  %v10090_v41 = vld [vmem:[%s14601_s5 + $0x70c] ss:$16 sps:$4 sm:$0xff]  }
 0x532   :  { %6693 = vmatprep.subr.bf16.mxu1 %v10000_v22  ;;  %v10085_v22 = vld [vmem:[%s14601_s5 + $0x700] ss:$16 sps:$4 sm:$0xff]  }
 0x534   :  { %6651 = vmatpush1.bf16.msra.mxu0 %v9995_v37  ;;  %v10088_v37 = vld [vmem:[%s14601_s5 + $0x708] ss:$16 sps:$4 sm:$0xff]  }
 0x535   :  { %6694 = vmatpush1.bf16.msra.mxu1 %v9998_v31  ;;  %6652 = vmatprep.subr.bf16.mxu0 %v10003_v62  ;;  %v10093_v31 = vld [vmem:[%s14601_s5 + $0x724] ss:$16 sps:$4 sm:$0xff]   ;;  %v10096_v62 = vld [vmem:[%s14601_s5 + $0x72c] ss:$16 sps:$4 sm:$0xff]  }
 0x536   :  { %6695 = vmatprep.subr.bf16.mxu1 %v10006_v34  ;;  %v10091_v34 = vld [vmem:[%s14601_s5 + $0x720] ss:$16 sps:$4 sm:$0xff]  }
 0x538   :  { %6653 = vmatpush1.bf16.msra.mxu0 %v10001_v30  ;;  %v10094_v30 = vld [vmem:[%s14601_s5 + $0x728] ss:$16 sps:$4 sm:$0xff]  }
 0x539   :  { %6696 = vmatpush1.bf16.msra.mxu1 %v10004_v44  ;;  %6654 = vmatprep.subr.bf16.mxu0 %v10009_v24  ;;  %v10099_v44 = vld [vmem:[%s14601_s5 + $0x744] ss:$16 sps:$4 sm:$0xff]   ;;  %v10102_v24 = vld [vmem:[%s14601_s5 + $0x74c] ss:$16 sps:$4 sm:$0xff]  }
 0x53a   :  { %6697 = vmatprep.subr.bf16.mxu1 %v10012_v40  ;;  %v10097_v40 = vld [vmem:[%s14601_s5 + $0x740] ss:$16 sps:$4 sm:$0xff]  }
 0x53c   :  { %6655 = vmatpush1.bf16.msra.mxu0 %v10007_v33  ;;  %v10100_v33 = vld [vmem:[%s14601_s5 + $0x748] ss:$16 sps:$4 sm:$0xff]  }
 0x53d   :  { %6698 = vmatpush1.bf16.msra.mxu1 %v10010_v39  ;;  %6656 = vmatprep.subr.bf16.mxu0 %v10015_v10  ;;  %v10105_v39 = vld [vmem:[%s14601_s5 + $0x764] ss:$16 sps:$4 sm:$0xff]   ;;  %v10108_v10 = vld [vmem:[%s14601_s5 + $0x76c] ss:$16 sps:$4 sm:$0xff]  }
 0x53e   :  { %6699 = vmatprep.subr.bf16.mxu1 %v10018_v43  ;;  %v10103_v43 = vld [vmem:[%s14601_s5 + $0x760] ss:$16 sps:$4 sm:$0xff]  }
 0x540   :  { %6657 = vmatpush1.bf16.msra.mxu0 %v10013_v11  ;;  %v10106_v11 = vld [vmem:[%s14601_s5 + $0x768] ss:$16 sps:$4 sm:$0xff]  }
 0x541   :  { %6700 = vmatpush1.bf16.msra.mxu1 %v10016_v63  ;;  %6658 = vmatprep.subr.bf16.mxu0 %v10021_v36  ;;  %v10111_v63 = vld [vmem:[%s14601_s5 + $0x784] ss:$16 sps:$4 sm:$0xff]   ;;  %v10114_v36 = vld [vmem:[%s14601_s5 + $0x78c] ss:$16 sps:$4 sm:$0xff]  }
 0x542   :  { %6701 = vmatprep.subr.bf16.mxu1 %v10024_v60  ;;  %v10109_v60 = vld [vmem:[%s14601_s5 + $0x780] ss:$16 sps:$4 sm:$0xff]  }
 0x544   :  { %6659 = vmatpush1.bf16.msra.mxu0 %v10019_v21  ;;  %v10112_v21 = vld [vmem:[%s14601_s5 + $0x788] ss:$16 sps:$4 sm:$0xff]  }
 0x545   :  { %6702 = vmatpush1.bf16.msra.mxu1 %v10022_v38  ;;  %6660 = vmatprep.subr.bf16.mxu0 %v10027_v46  ;;  %v10117_v38 = vld [vmem:[%s14601_s5 + $0x7a4] ss:$16 sps:$4 sm:$0xff]   ;;  %v10120_v46 = vld [vmem:[%s14601_s5 + $0x7ac] ss:$16 sps:$4 sm:$0xff]  }
 0x546   :  { %6703 = vmatprep.subr.bf16.mxu1 %v10030_v9  ;;  %v10115_v9 = vld [vmem:[%s14601_s5 + $0x7a0] ss:$16 sps:$4 sm:$0xff]  }
 0x548   :  { %6661 = vmatpush1.bf16.msra.mxu0 %v10025_v19  ;;  %v10118_v19 = vld [vmem:[%s14601_s5 + $0x7a8] ss:$16 sps:$4 sm:$0xff]  }
 0x549   :  { %6704 = vmatpush1.bf16.msra.mxu1 %v10028_v45  ;;  %6662 = vmatprep.subr.bf16.mxu0 %v10033_v5  ;;  %v10123_v45 = vld [vmem:[%s14601_s5 + $0x7c4] ss:$16 sps:$4 sm:$0xff]   ;;  %v10126_v5 = vld [vmem:[%s14601_s5 + $0x7cc] ss:$16 sps:$4 sm:$0xff]  }
 0x54a   :  { %6705 = vmatprep.subr.bf16.mxu1 %v10036_v51  ;;  %v10121_v51 = vld [vmem:[%s14601_s5 + $0x7c0] ss:$16 sps:$4 sm:$0xff]  }
 0x54c   :  { %6663 = vmatpush1.bf16.msra.mxu0 %v10031_v55  ;;  %v10124_v55 = vld [vmem:[%s14601_s5 + $0x7c8] ss:$16 sps:$4 sm:$0xff]  }
 0x54d   :  { %6706 = vmatpush1.bf16.msra.mxu1 %v10034_v2  ;;  %7111 = vmatprep.subr.bf16.mxu0 %v10039_v14  ;;  %v10129_v2 = vld [vmem:[%s14601_s5 + $0x7e4] ss:$16 sps:$4 sm:$0xff]   ;;  %v10132_v14 = vld [vmem:[%s14601_s5 + $0x7ec] ss:$16 sps:$4 sm:$0xff]  }
 0x54e   :  { %7154 = vmatprep.subr.bf16.mxu1 %v10042_v59  ;;  %v10127_v59 = vld [vmem:[%s14601_s5 + $0x7e0] ss:$16 sps:$4 sm:$0xff]  }
 0x54f   :  { %6665 = vmatmul.mubr.bf16.vlgmr.msra.gmra.mrb[128].mxu0 %v13914_v29 }
 0x550   :  { %6708 = vmatmul.mubr.bf16.vlgmr.msra.gmra.mrb[128].mxu1 %v13914_v29  ;;  %7112 = vmatpush1.bf16.msra.mxu0 %v10037_v20  ;;  %v10054_v29 = vld [vmem:[%s14601_s5 + $0x64c] ss:$16 sps:$4 sm:$0xff]   ;;  %v10130_v20 = vld [vmem:[%s14601_s5 + $0x7e8] ss:$16 sps:$4 sm:$0xff]  }
 0x551   :  { %7143 = vmatprep.mubr.bf16.mxu0 %v13957_v27  ;;  %7155 = vmatpush1.bf16.msra.mxu1 %v10040_v4  ;;  %v10133_v4 = vld [vmem:[%s14603_s7 + $0x40] sm:$0xff]  }
 0x552   :  { %7186 = vmatprep.mubr.bf16.mxu1 %v13957_v27  ;;  %7113 = vmatprep.subr.bf16.mxu0 %v10045_v17  ;;  %v10057_v27 = vld [vmem:[%s14601_s5 + $0x664] ss:$16 sps:$4 sm:$0xff]  }
 0x553   :  { %7156 = vmatprep.subr.bf16.mxu1 %v10048_v15  ;;  %v10134_v17 = vld [vmem:[%s14603_s7 + $0xc0] sm:$0xff]  }
 0x554   :  { %7114 = vmatpush1.bf16.msra.mxu0 %v10043_v42  ;;  %v10135_v15 = vld [vmem:[%s14603_s7] sm:$0xff]  }
 0x555   :  { %7157 = vmatpush1.bf16.msra.mxu1 %v10046_v54  ;;  %7115 = vmatprep.subr.bf16.mxu0 %v10051_v50  ;;  %v10136_v42 = vld [vmem:[%s14603_s7 + $0x80] sm:$0xff]   ;;  %v10137_v54 = vld [vmem:[%s14603_s7 + $0x48] sm:$0xff]  }
 0x556   :  { %7158 = vmatprep.subr.bf16.mxu1 %v10054_v29  ;;  %v10138_v50 = vld [vmem:[%s14603_s7 + $0xc8] sm:$0xff]  }
 0x557   :  { %v10139_v29 = vld [vmem:[%s14603_s7 + $0x8] sm:$0xff]  }
 0x558   :  { %7116 = vmatpush1.bf16.msra.mxu0 %v10049_v57  ;;  %v10140_v57 = vld [vmem:[%s14603_s7 + $0x88] sm:$0xff]  }
 0x559   :  { %7159 = vmatpush1.bf16.msra.mxu1 %v10052_v48  ;;  %7117 = vmatprep.subr.bf16.mxu0 %v10057_v27  ;;  %v10141_v48 = vld [vmem:[%s14603_s7 + $0x50] sm:$0xff]  }
 0x55a   :  { %7160 = vmatprep.subr.bf16.mxu1 %v10060_v18  ;;  %v10143_v27 = vld [vmem:[%s14603_s7 + $0x10] sm:$0xff]  }
 0x55b   :  { %v10144_v18 = vld [vmem:[%s14603_s7 + $0x90] sm:$0xff]  }
 0x55c   :  { %7118 = vmatpush1.bf16.msra.mxu0 %v10055_v1  ;;  %v10145_v1 = vld [vmem:[%s14603_s7 + $0x58] sm:$0xff]  }
 0x55d   :  { %7161 = vmatpush1.bf16.msra.mxu1 %v10058_v49  ;;  %7119 = vmatprep.subr.bf16.mxu0 %v10063_v6  ;;  %v10146_v49 = vld [vmem:[%s14603_s7 + $0xd8] sm:$0xff]  }
 0x55e   :  { %7162 = vmatprep.subr.bf16.mxu1 %v10066_v32  ;;  %v10147_v6 = vld [vmem:[%s14603_s7 + $0x18] sm:$0xff]  }
 0x55f   :  { %v10148_v32 = vld [vmem:[%s14603_s7 + $0x98] sm:$0xff]  }
 0x560   :  { %7120 = vmatpush1.bf16.msra.mxu0 %v10061_v0  ;;  %v10149_v0 = vld [vmem:[%s14603_s7 + $0x60] sm:$0xff]  }
 0x561   :  { %7163 = vmatpush1.bf16.msra.mxu1 %v10064_v25  ;;  %7121 = vmatprep.subr.bf16.mxu0 %v10069_v16  ;;  %v10150_v25 = vld [vmem:[%s14603_s7 + $0xe0] sm:$0xff]  }
 0x562   :  { %7164 = vmatprep.subr.bf16.mxu1 %v10072_v3  ;;  %v10151_v16 = vld [vmem:[%s14603_s7 + $0x20] sm:$0xff]  }
 0x563   :  { %v10152_v3 = vld [vmem:[%s14603_s7 + $0xa0] sm:$0xff]  }
 0x564   :  { %7122 = vmatpush1.bf16.msra.mxu0 %v10067_v47  ;;  %v10153_v47 = vld [vmem:[%s14603_s7 + $0x68] sm:$0xff]  }
 0x565   :  { %7165 = vmatpush1.bf16.msra.mxu1 %v10070_v61  ;;  %7123 = vmatprep.subr.bf16.mxu0 %v10075_v26  ;;  %v10154_v61 = vld [vmem:[%s14603_s7 + $0xe8] sm:$0xff]  }
 0x566   :  { %7166 = vmatprep.subr.bf16.mxu1 %v10078_v53  ;;  %v10155_v26 = vld [vmem:[%s14603_s7 + $0x28] sm:$0xff]  }
 0x567   :  { %v10156_v53 = vld [vmem:[%s14603_s7 + $0xa8] sm:$0xff]  }
 0x568   :  { %7124 = vmatpush1.bf16.msra.mxu0 %v10073_v52  ;;  %v10157_v52 = vld [vmem:[%s14603_s7 + $0x70] sm:$0xff]  }
 0x569   :  { %7167 = vmatpush1.bf16.msra.mxu1 %v10076_v8  ;;  %7125 = vmatprep.subr.bf16.mxu0 %v10081_v28  ;;  %v10158_v8 = vld [vmem:[%s14603_s7 + $0xf0] sm:$0xff]  }
 0x56a   :  { %7168 = vmatprep.subr.bf16.mxu1 %v10084_v23  ;;  %v10159_v28 = vld [vmem:[%s14603_s7 + $0x30] sm:$0xff]  }
 0x56b   :  { %v10160_v23 = vld [vmem:[%s14603_s7 + $0xb0] sm:$0xff]  }
 0x56c   :  { %7126 = vmatpush1.bf16.msra.mxu0 %v10079_v35  ;;  %v10161_v35 = vld [vmem:[%s14603_s7 + $0x78] sm:$0xff]  }
 0x56d   :  { %7169 = vmatpush1.bf16.msra.mxu1 %v10082_v56  ;;  %7127 = vmatprep.subr.bf16.mxu0 %v10087_v13  ;;  %v10162_v56 = vld [vmem:[%s14603_s7 + $0xf8] sm:$0xff]  }
 0x56e   :  { %7170 = vmatprep.subr.bf16.mxu1 %v10090_v41  ;;  %v10163_v13 = vld [vmem:[%s14603_s7 + $0x38] sm:$0xff]  }
 0x56f   :  { %v10164_v41 = vld [vmem:[%s14603_s7 + $0xb8] sm:$0xff]  }
 0x570   :  { %7128 = vmatpush1.bf16.msra.mxu0 %v10085_v22  ;;  %v7205_v22 = vld [vmem:[%s14604_s6] sm:$0xf] }
 0x571   :  { %7171 = vmatpush1.bf16.msra.mxu1 %v10088_v37  ;;  %7129 = vmatprep.subr.bf16.mxu0 %v10093_v31  ;;  %v14661_v37 = vld [vmem:[#allocation2_spill] sm:$0xff] }
 0x572   :  { %7172 = vmatprep.subr.bf16.mxu1 %v10096_v62  ;;  %v7217_v31 = vsub.s32 2, %v14661_v37  ;;  %v7221_v62 = vsub.s32 3, %v14661_v37 }
 0x574   :  { %7130 = vmatpush1.bf16.msra.mxu0 %v10091_v34  ;;  %v7210_v34 = vrot.slane %v7205_v22, %v14659_v7 }
 0x575   :  { %7173 = vmatpush1.bf16.msra.mxu1 %v10094_v30  ;;  %7131 = vmatprep.subr.bf16.mxu0 %v10099_v44  ;;  %v7218_v30 = vrot.slane %v7205_v22, %v7217_v31  ;;  %v7214_v44 = vrot.slane %v7205_v22, %v14660_v12 }
 0x576   :  { %7174 = vmatprep.subr.bf16.mxu1 %v10102_v24  ;;  %v7222_v24 = vrot.slane %v7205_v22, %v7221_v62 }
 0x578   :  { %7132 = vmatpush1.bf16.msra.mxu0 %v10097_v40 }
 0x579   :  { %7175 = vmatpush1.bf16.msra.mxu1 %v10100_v33  ;;  %7133 = vmatprep.subr.bf16.mxu0 %v10105_v39 }
 0x57a   :  { %7176 = vmatprep.subr.bf16.mxu1 %v10108_v10 }
 0x57c   :  { %7134 = vmatpush1.bf16.msra.mxu0 %v10103_v43 }
 0x57d   :  { %7177 = vmatpush1.bf16.msra.mxu1 %v10106_v11  ;;  %7135 = vmatprep.subr.bf16.mxu0 %v10111_v63 }
 0x57e   :  { %7178 = vmatprep.subr.bf16.mxu1 %v10114_v36 }
 0x580   :  { %7136 = vmatpush1.bf16.msra.mxu0 %v10109_v60 }
 0x581   :  { %7179 = vmatpush1.bf16.msra.mxu1 %v10112_v21  ;;  %7137 = vmatprep.subr.bf16.mxu0 %v10117_v38 }
 0x582   :  { %7180 = vmatprep.subr.bf16.mxu1 %v10120_v46 }
 0x584   :  { %7138 = vmatpush1.bf16.msra.mxu0 %v10115_v9 }
 0x585   :  { %7181 = vmatpush1.bf16.msra.mxu1 %v10118_v19  ;;  %7139 = vmatprep.subr.bf16.mxu0 %v10123_v45 }
 0x586   :  { %7182 = vmatprep.subr.bf16.mxu1 %v10126_v5 }
 0x588   :  { %7140 = vmatpush1.bf16.msra.mxu0 %v10121_v51 }
 0x589   :  { %7183 = vmatpush1.bf16.msra.mxu1 %v10124_v55  ;;  %7141 = vmatprep.subr.bf16.mxu0 %v10129_v2 }
 0x58a   :  { %7184 = vmatprep.subr.bf16.mxu1 %v10132_v14 }
 0x58c   :  { %7142 = vmatpush1.bf16.msra.mxu0 %v10127_v59 }
 0x58d   :  { %7185 = vmatpush1.bf16.msra.mxu1 %v10130_v20  ;;  %8813 = vmatprep.subr.bf16.mxu0 %v10133_v4 }
 0x58e   :  { %8835 = vmatprep.subr.bf16.mxu1 %v10134_v17 }
 0x58f   :  { %7144 = vmatmul.mubr.bf16.vlgmr.msra.gmra.mrb[128].mxu0 %v13949_v58 }
 0x590   :  { %7187 = vmatmul.mubr.bf16.vlgmr.msra.gmra.mrb[128].mxu1 %v13949_v58  ;;  %8814 = vmatpush3.bf16.msra.mxu0 %v10135_v15  ;;  %v10142_v58 = vld [vmem:[%s14603_s7 + $0xd0] sm:$0xff]  }
 0x591   :  { %8836 = vmatpush3.bf16.msra.mxu1 %v10136_v42  ;;  %8815 = vmatprep.subr.bf16.mxu0 %v10137_v54 }
 0x592   :  { %8837 = vmatprep.subr.bf16.mxu1 %v10138_v50 }
 0x594   :  { %8816 = vmatpush3.bf16.msra.mxu0 %v10139_v29  ;;  %v8780_v29 = vld [vmem:[%s14605_s8] ss:$0 sm:$0xff] }
 0x595   :  { %8838 = vmatpush3.bf16.msra.mxu1 %v10140_v57  ;;  %8817 = vmatprep.subr.bf16.mxu0 %v10141_v48 }
 0x596   :  { %8839 = vmatprep.subr.bf16.mxu1 %v10142_v58 }
 0x598   :  { %8818 = vmatpush3.bf16.msra.mxu0 %v10143_v27 }
 0x599   :  { %8840 = vmatpush3.bf16.msra.mxu1 %v10144_v18  ;;  %8819 = vmatprep.subr.bf16.mxu0 %v10145_v1 }
 0x59a   :  { %8841 = vmatprep.subr.bf16.mxu1 %v10146_v49 }
 0x59c   :  { %8820 = vmatpush3.bf16.msra.mxu0 %v10147_v6 }
 0x59d   :  { %8842 = vmatpush3.bf16.msra.mxu1 %v10148_v32  ;;  %8821 = vmatprep.subr.bf16.mxu0 %v10149_v0 }
 0x59e   :  { %8843 = vmatprep.subr.bf16.mxu1 %v10150_v25 }
 0x5a0   :  { %8822 = vmatpush3.bf16.msra.mxu0 %v10151_v16 }
 0x5a1   :  { %8844 = vmatpush3.bf16.msra.mxu1 %v10152_v3  ;;  %8823 = vmatprep.subr.bf16.mxu0 %v10153_v47 }
 0x5a2   :  { %8845 = vmatprep.subr.bf16.mxu1 %v10154_v61 }
 0x5a4   :  { %8824 = vmatpush3.bf16.msra.mxu0 %v10155_v26 }
 0x5a5   :  { %8846 = vmatpush3.bf16.msra.mxu1 %v10156_v53  ;;  %8825 = vmatprep.subr.bf16.mxu0 %v10157_v52 }
 0x5a6   :  { %8847 = vmatprep.subr.bf16.mxu1 %v10158_v8 }
 0x5a8   :  { %8826 = vmatpush3.bf16.msra.mxu0 %v10159_v28 }
 0x5a9   :  { %8848 = vmatpush3.bf16.msra.mxu1 %v10160_v23  ;;  %8827 = vmatprep.subr.bf16.mxu0 %v10161_v35 }
 0x5aa   :  { %8849 = vmatprep.subr.bf16.mxu1 %v10162_v56 }
 0x5ac   :  { %8828 = vmatpush3.bf16.msra.mxu0 %v10163_v13 }
 0x5ad   :  { %8850 = vmatpush3.bf16.msra.mxu1 %v10164_v41 }
 0x662   :  { %v7145_v40 = vpop.f32.mrb[128].mxu0 }
 0x663   :  { %v7227_v33 = vadd.f32 %v7210_v34, %v7145_v40  ;;  %v7188_v39 = vpop.f32.mrb[128].mxu1  ;;  %v7147_v10 = vpop.f32.mrb[129].mxu0 }
 0x664   :  { %v7229_v43 = vadd.f32 %v7218_v30, %v7188_v39  ;;  %v7228_v11 = vadd.f32 %v7214_v44, %v7147_v10  ;;  %v7190_v63 = vpop.f32.mrb[129].mxu1  ;;  %v7149_v36 = vpop.f32.mrb[130].mxu0 }
 0x665   :  { %v7230_v60 = vadd.f32 %v7222_v24, %v7190_v63  ;;  %v7231_v21 = vadd.f32 %v7210_v34, %v7149_v36  ;;  %v7192_v38 = vpop.f32.mrb[130].mxu1  ;;  %v7151_v46 = vpop.f32.mrb[131].mxu0  ;;  %v7235_v7 = vmax.f32 %v7227_v33, 0.0 }
 0x666   :  { %v7233_v9 = vadd.f32 %v7218_v30, %v7192_v38  ;;  %v7232_v19 = vadd.f32 %v7214_v44, %v7151_v46  ;;  %v7194_v45 = vpop.f32.mrb[131].mxu1  ;;  %v7237_v12 = vmax.f32 %v7229_v43, 0.0  ;;  %v7236_v55 = vmax.f32 %v7228_v11, 0.0 }
 0x667   :  { %v7239_v5 = vmax.f32 %v7231_v21, 0.0  ;;  %v7234_v51 = vadd.f32 %v7222_v24, %v7194_v45  ;;  %v7238_v59 = vmax.f32 %v7230_v60, 0.0 }
 0x668   :  { %v7241_v2 = vmax.f32 %v7233_v9, 0.0  ;;  %v7240_v14 = vmax.f32 %v7232_v19, 0.0 }
 0x669   :  { %v7243_v20 = vpack.c.bf16 %v7239_v5, %v7235_v7  ;;  %v7242_v4 = vmax.f32 %v7234_v51, 0.0 }
 0x66a   :  { %v7245_v17 = vpack.c.bf16 %v7241_v2, %v7237_v12  ;;  %v7244_v15 = vpack.c.bf16 %v7240_v14, %v7236_v55 }
 0x66b   :  { %v7246_v42 = vpack.c.bf16 %v7242_v4, %v7238_v59 }
 0x66c   :  { %7542 = vmatprep.mubr.bf16.mxu0 %v7244_v15 }
 0x66d   :  { %7583 = vmatprep.mubr.bf16.mxu1 %v7246_v42  ;;  %7543 = vmatmul.mubr.bf16.vlgmr.msra.gmra.mrb[132].mxu0 %v7243_v20 }
 0x66e   :  { %7584 = vmatmul.mubr.bf16.vlgmr.msra.gmra.mrb[132].mxu1 %v7245_v17 }
 0x740   :  { %v8829_v54 = vpop.f32.mrb[132].mxu0 }
 0x741   :  { %v8851_v50 = vpop.f32.mrb[132].mxu1  ;;  %v8830_v57 = vpop.f32.mrb[133].mxu0 }
 0x742   :  { %v8831_v48 = vadd.f32 %v8830_v57, %v8829_v54  ;;  %v8852_v58 = vpop.f32.mrb[133].mxu1  ;;  %v8832_v27 = vpop.f32.mrb[134].mxu0 }
 0x743   :  { %v8853_v18 = vadd.f32 %v8852_v58, %v8851_v50  ;;  %v8854_v1 = vpop.f32.mrb[134].mxu1  ;;  %v8833_v49 = vpop.f32.mrb[135].mxu0 }
 0x744   :  { %v7545_v6 = vadd.f32 %v8831_v48, %v8780_v29  ;;  %v8834_v32 = vadd.f32 %v8833_v49, %v8832_v27  ;;  %v8855_v0 = vpop.f32.mrb[135].mxu1 }
 0x745   :  { %v8856_v25 = vadd.f32 %v8855_v0, %v8854_v1 }
 0x746   :  { %v7586_v16 = vadd.f32 %v8853_v18, %v7545_v6  ;;  %v7548_v3 = vadd.f32 %v8834_v32, %v8780_v29 }
 0x748   :  { %v7589_v47 = vadd.f32 %v8856_v25, %v7548_v3  ;;  %7592 = vmax.xlane.f32.xlu0 %v7586_v16 }
 0x74c   :  { %7594 = vmax.xlane.f32.xlu0 %v7589_v47 }
 0x7d5   :  { %v7593_v61 = vpop.xlane.xlu0 %7592 }
 0x7d6   :  { %v7596_v26 = vsub.f32 %v7586_v16, %v7593_v61 }
 0x7d8   :  { %v7598_v53 = vmul.f32 1.442695, %v7596_v26 }
 0x7d9   :  { %v7595_v52 = vpop.xlane.xlu0 %7594 }
 0x7da   :  { %v7597_v8 = vsub.f32 %v7589_v47, %v7595_v52  ;;  %10165 = vpow2.f32 %v7598_v53 }
 0x7dc   :  { %v7600_v28 = vmul.f32 1.442695, %v7597_v8 }
 0x7de   :  { %10167 = vpow2.f32 %v7600_v28 }
 0x7e4   :  { %v10166_v23 = vpop.eup %10165 }
 0x7e5   :  { %7602 = vadd.xlane.f32.xlu1 %v10166_v23 }
 0x7e8   :  { %v10168_v35 = vpop.eup %10167 }
 0x7e9   :  { %7604 = vadd.xlane.f32.xlu1 %v10168_v35 }
 0x872   :  { %v7603_v56 = vpop.xlane.xlu1 %7602 }
 0x873   :  { %10169 = vlog2.f32 %v7603_v56 }
 0x876   :  { %v7605_v13 = vpop.xlane.xlu1 %7604 }
 0x877   :  { %10171 = vlog2.f32 %v7605_v13 }
 0x87d   :  { %v10170_v41 = vpop.eup %10169 }
 0x87e   :  { %v7607_v22 = vmul.f32 0.6931472, %v10170_v41 }
 0x880   :  { %v7610_v37 = vadd.f32 %v7607_v22, %v7593_v61 }
 0x881   :  { %v10172_v31 = vpop.eup %10171 }
 0x882   :  { %v7612_v62 = vsub.f32 %v7586_v16, %v7610_v37  ;;  %v7609_v34 = vmul.f32 0.6931472, %v10172_v31 }
 0x884   :  { %7614 = vst [vmem:[%s14606_s9] sm:$0xff] %v7612_v62  ;;  %v7611_v30 = vadd.f32 %v7609_v34, %v7595_v52 }
 0x886   :  { %v7613_v44 = vsub.f32 %v7589_v47, %v7611_v30 }
 0x888   :  { %7615 = vst [vmem:[%s14606_s9 + $0x8] sm:$0xff] %v7613_v44 }

</bundles_post_ra>
